<compile_context>
chip_gen: v5e
topology: v5e:2x2
jax: 0.10.0
libtpu: 0.0.40
codegen_flags: <defaults>
</compile_context>

<pallas_src>
import jax
import jax.numpy as jnp
from jax import lax
from jax.experimental import pallas as pl
from jax.experimental.pallas import tpu as pltpu


_VMEM = pl.BlockSpec(memory_space=pltpu.MemorySpace.VMEM)


# ---------------------------------------------------------------------------
# Kernel 1: avgpool (over spatial) + fc_last + ReLU, fused.
# ---------------------------------------------------------------------------
def pool_fc_relu_kernel(fmap_ref, w_ref, b_ref, x_fully_ref, h_relu_ref):
    # fmap_ref: (BP, S, C) f32, w_ref: (C, 2048) bf16, b_ref: (1, 2048) f32
    S = fmap_ref.shape[1]
    pooled = jnp.sum(fmap_ref[...], axis=1) * (1.0 / S)                  # (BP, C)
    x_fully = jnp.dot(pooled.astype(w_ref.dtype), w_ref[...],
                      preferred_element_type=jnp.float32) + b_ref[...]  # (BP, 2048)
    x_fully_ref[...] = x_fully
    h_relu_ref[...] = jnp.maximum(x_fully, 0.0)


# ---------------------------------------------------------------------------
# Kernel 2: both bidirectional LSTMs + packed position/rotation heads.
# ---------------------------------------------------------------------------
def _sigmoid(x):
    # 0.5*(tanh(0.5x)+1): mathematically identical to sigmoid, runs on the EUP.
    return 0.5 * (jnp.tanh(0.5 * x) + 1.0)


def _lstm_cell(gates, c, H):
    i = _sigmoid(gates[:, 0:H])
    f = _sigmoid(gates[:, H:2 * H])
    g = jnp.tanh(gates[:, 2 * H:3 * H])
    o = _sigmoid(gates[:, 3 * H:4 * H])
    c_new = f * c + i * g
    h_new = o * jnp.tanh(c_new)
    return h_new, c_new


def _bidir_lstm(x_ref, wih_ref, whh_ref, b_ref, xw_f_ref, xw_r_ref, T, BP, H):
    """Both directions in one time loop; x@Wih precomputed outside the loop.

    x_ref: (T*BP, D) time-major-flat input (rows [t*BP, t*BP+BP) = batch at time t)
    wih_ref: (2, D, 4H) bf16, whh_ref: (2, H, 4H) bf16, b_ref: (2, 1, 4H) f32
    xw_*_ref: (T*BP, 4H) f32 VMEM scratch.
    Returns final hidden states (h_fwd, h_rev), each (BP, H) f32.
    """
    x_bf = x_ref[...].astype(jnp.bfloat16)
    xw_f_ref[...] = jnp.dot(x_bf, wih_ref[0],
                            preferred_element_type=jnp.float32) + b_ref[0]
    xw_r_ref[...] = jnp.dot(x_bf, wih_ref[1],
                            preferred_element_type=jnp.float32) + b_ref[1]
    # Loop-invariant recurrent weights, hoisted out of the recurrence.
    whh_f = whh_ref[0]
    whh_r = whh_ref[1]

    def step(t, carry):
        hf, cf, hr, cr = carry
        rf = pl.multiple_of(t * BP, BP)
        rr = pl.multiple_of((T - 1 - t) * BP, BP)        # reverse direction
        g_f = xw_f_ref[pl.ds(rf, BP), :] + jnp.dot(
            hf.astype(jnp.bfloat16), whh_f, preferred_element_type=jnp.float32)
        g_r = xw_r_ref[pl.ds(rr, BP), :] + jnp.dot(
            hr.astype(jnp.bfloat16), whh_r, preferred_element_type=jnp.float32)
        hf, cf = _lstm_cell(g_f, cf, H)
        hr, cr = _lstm_cell(g_r, cr, H)
        return hf, cf, hr, cr

    z = jnp.zeros((BP, H), jnp.float32)
    hf, _, hr, _ = lax.fori_loop(0, T, step, (z, z, z, z), unroll=2)
    return hf, hr


def lstm_heads_kernel(x_l2r_ref, x_u2d_ref,
                      wih_l2r_ref, whh_l2r_ref, b_l2r_ref,
                      wih_u2d_ref, whh_u2d_ref, b_u2d_ref,
                      w_heads_ref, b_heads_ref,
                      out_ref,
                      xw1f_ref, xw1r_ref, xw2f_ref, xw2r_ref):
    H = whh_l2r_ref.shape[1]
    BP = out_ref.shape[0]
    T1 = x_l2r_ref.shape[0] // BP
    T2 = x_u2d_ref.shape[0] // BP

    hf1, hr1 = _bidir_lstm(x_l2r_ref, wih_l2r_ref, whh_l2r_ref, b_l2r_ref,
                           xw1f_ref, xw1r_ref, T1, BP, H)
    hf2, hr2 = _bidir_lstm(x_u2d_ref, wih_u2d_ref, whh_u2d_ref, b_u2d_ref,
                           xw2f_ref, xw2r_ref, T2, BP, H)

    # concat(h_l2r[0], h_l2r[1], h_u2d[0], h_u2d[1]) @ packed heads -> (BP, 128)
    xcat = jnp.concatenate([hf1, hr1, hf2, hr2], axis=1).astype(jnp.bfloat16)
    out_ref[...] = jnp.dot(xcat, w_heads_ref[...],
                           preferred_element_type=jnp.float32) + b_heads_ref[...]


# ---------------------------------------------------------------------------
# Parameter construction (mirrors the module's layer shapes; init values are
# deterministic random stand-ins, LSTM/head biases are zero as in the module).
# ---------------------------------------------------------------------------
def init_params(key, use_euler6=False, hidden_size=256, feat_in=512):
    ori_dim = 6 if use_euler6 else 4
    H = hidden_size
    ks = jax.random.split(key, 11)

    params = {"ori_dim": ori_dim, "hidden_size": H}

    # f32 masters (used by the pure-JAX reference).
    w_last_T = 0.05 * jax.random.normal(ks[0], (feat_in, 2048), jnp.float32)
    b_last = jnp.zeros((1, 2048), jnp.float32)

    def lstm_p(k1, k2, D):
        w_ih_T = 0.1 * jax.random.normal(k1, (D, 4 * H), jnp.float32)
        w_hh_T = 0.1 * jax.random.normal(k2, (H, 4 * H), jnp.float32)
        b = jnp.zeros((1, 4 * H), jnp.float32)   # b_ih + b_hh, zero-init in module
        return (w_ih_T, w_hh_T, b)

    l2r_fwd = lstm_p(ks[1], ks[2], 64)
    l2r_rev = lstm_p(ks[3], ks[4], 64)
    u2d_fwd = lstm_p(ks[5], ks[6], 32)
    u2d_rev = lstm_p(ks[7], ks[8], 32)

    w_pos_T = 0.05 * jax.random.normal(ks[9], (4 * H, 3), jnp.float32)
    w_rot_T = 0.05 * jax.random.normal(ks[10], (4 * H, ori_dim), jnp.float32)

    params.update(w_last_T=w_last_T, b_last=b_last,
                  l2r_fwd=l2r_fwd, l2r_rev=l2r_rev,
                  u2d_fwd=u2d_fwd, u2d_rev=u2d_rev,
                  w_pos_T=w_pos_T, w_rot_T=w_rot_T)

    # Kernel-side parameters: direction-stacked, bf16 MXU operands, f32 biases,
    # heads packed into one lane-dense (4H, 128) matrix (cols 0:3 pos, 3:3+ori rot).
    params["k_w_last"] = w_last_T.astype(jnp.bfloat16)
    params["k_b_last"] = b_last
    params["k_wih_l2r"] = jnp.stack([l2r_fwd[0], l2r_rev[0]]).astype(jnp.bfloat16)
    params["k_whh_l2r"] = jnp.stack([l2r_fwd[1], l2r_rev[1]]).astype(jnp.bfloat16)
    params["k_b_l2r"] = jnp.stack([l2r_fwd[2], l2r_rev[2]])
    params["k_wih_u2d"] = jnp.stack([u2d_fwd[0], u2d_rev[0]]).astype(jnp.bfloat16)
    params["k_whh_u2d"] = jnp.stack([u2d_fwd[1], u2d_rev[1]]).astype(jnp.bfloat16)
    params["k_b_u2d"] = jnp.stack([u2d_fwd[2], u2d_rev[2]])
    w_heads = jnp.zeros((4 * H, 128), jnp.float32)
    w_heads = w_heads.at[:, 0:3].set(w_pos_T).at[:, 3:3 + ori_dim].set(w_rot_T)
    params["k_w_heads"] = w_heads.astype(jnp.bfloat16)
    params["k_b_heads"] = jnp.zeros((1, 128), jnp.float32)   # fc biases zero-init per module
    return params


# ---------------------------------------------------------------------------
# Forward wrapper (Pallas).
# ---------------------------------------------------------------------------
def resnet34_lstm_forward(params, fmap):
    """fmap: (B, C=512, Hs, Ws) backbone feature map. Returns (position, rotation, x_fully)."""
    B, C, Hs, Ws = fmap.shape
    S = Hs * Ws
    BP = ((B + 7) // 8) * 8           # pad batch to a sublane multiple
    H = params["hidden_size"]
    ori_dim = params["ori_dim"]
    T1, D1 = 32, 2048 // 32           # lstm_l2r: x.view(B, 32, 64)
    T2, D2 = D1, T1                   # lstm_u2d: x.permute(0,2,1) -> (B, 64, 32)

    # Layout plumbing only (tiny tensors): channels on lanes, padded batch.
    fmap_l = jnp.transpose(fmap.reshape(B, C, S), (0, 2, 1))           # (B, S, C)
    fmap_p = jnp.pad(fmap_l, ((0, BP - B), (0, 0), (0, 0)))            # (BP, S, C)

    x_fully_p, h_relu_p = pl.pallas_call(
        pool_fc_relu_kernel,
        out_shape=(jax.ShapeDtypeStruct((BP, 2048), jnp.float32),
                   jax.ShapeDtypeStruct((BP, 2048), jnp.float32)),
        in_specs=[_VMEM, _VMEM, _VMEM],
        out_specs=(_VMEM, _VMEM),
    )(fmap_p, params["k_w_last"], params["k_b_last"])

    # Time-major-flat LSTM inputs (no flips / stacks; reverse handled in-kernel).
    x32 = h_relu_p.reshape(BP, T1, D1)
    x_l2r = jnp.transpose(x32, (1, 0, 2)).reshape(T1 * BP, D1)         # (T1*BP, 64)
    x_u2d = jnp.transpose(x32, (2, 0, 1)).reshape(T2 * BP, D2)         # (T2*BP, 32)

    heads_p = pl.pallas_call(
        lstm_heads_kernel,
        out_shape=jax.ShapeDtypeStruct((BP, 128), jnp.float32),
        in_specs=[_VMEM] * 10,
        out_specs=_VMEM,
        scratch_shapes=[
            pltpu.VMEM((T1 * BP, 4 * H), jnp.float32),
            pltpu.VMEM((T1 * BP, 4 * H), jnp.float32),
            pltpu.VMEM((T2 * BP, 4 * H), jnp.float32),
            pltpu.VMEM((T2 * BP, 4 * H), jnp.float32),
        ],
    )(x_l2r, x_u2d,
      params["k_wih_l2r"], params["k_whh_l2r"], params["k_b_l2r"],
      params["k_wih_u2d"], params["k_whh_u2d"], params["k_b_u2d"],
      params["k_w_heads"], params["k_b_heads"])

    x_fully = x_fully_p[:B]
    position = heads_p[:B, 0:3]
    rotation = heads_p[:B, 3:3 + ori_dim]
    return position, rotation, x_fully


# ---------------------------------------------------------------------------
# Pure-JAX reference (mirrors the PyTorch forward) for verification.
# ---------------------------------------------------------------------------
def _lstm_final_ref(x_btd, w_ih_T, w_hh_T, b):
    B, T, D = x_btd.shape
    H = w_hh_T.shape[0]

    def step(carry, x_t):
        h, c = carry
        gates = x_t @ w_ih_T + h @ w_hh_T + b
        i = jax.nn.sigmoid(gates[:, 0:H])
        f = jax.nn.sigmoid(gates[:, H:2 * H])
        g = jnp.tanh(gates[:, 2 * H:3 * H])
        o = jax.nn.sigmoid(gates[:, 3 * H:4 * H])
        c = f * c + i * g
        h = o * jnp.tanh(c)
        return (h, c), None

    init = (jnp.zeros((B, H), jnp.float32), jnp.zeros((B, H), jnp.float32))
    (h_fin, _), _ = lax.scan(step, init, jnp.swapaxes(x_btd, 0, 1))
    return h_fin


def resnet34_lstm_forward_ref(params, fmap):
    B, C, Hs, Ws = fmap.shape
    pooled = jnp.mean(fmap.reshape(B, C, -1), axis=-1)
    x_fully = pooled @ params["w_last_T"] + params["b_last"]
    h = jnp.maximum(x_fully, 0.0)
    x32 = h.reshape(B, 32, 64)
    h_l2r_f = _lstm_final_ref(x32, *params["l2r_fwd"])
    h_l2r_r = _lstm_final_ref(x32[:, ::-1, :], *params["l2r_rev"])
    xu = jnp.transpose(x32, (0, 2, 1))
    h_u2d_f = _lstm_final_ref(xu, *params["u2d_fwd"])
    h_u2d_r = _lstm_final_ref(xu[:, ::-1, :], *params["u2d_rev"])
    xcat = jnp.concatenate([h_l2r_f, h_l2r_r, h_u2d_f, h_u2d_r], axis=1)
    position = xcat @ params["w_pos_T"]
    rotation = xcat @ params["w_rot_T"]
    return position, rotation, x_fully


if __name__ == "__main__":
    key = jax.random.PRNGKey(0)
    k_params, k_fmap = jax.random.split(key)

    # Small shapes consistent with the module: backbone features (B, 512, 4, 4),
    # hidden_size=256 (default), use_euler6=False -> rotation dim 4.
    params = init_params(k_params, use_euler6=False, hidden_size=256, feat_in=512)
    B, C, Hs, Ws = 2, 512, 4, 4
    fmap = jax.random.normal(k_fmap, (B, C, Hs, Ws), dtype=jnp.float32)

    position, rotation, x_fully = resnet34_lstm_forward(params, fmap)
    jax.block_until_ready((position, rotation, x_fully))

    r_pos, r_rot, r_xf = resnet34_lstm_forward_ref(params, fmap)
    assert position.shape == (B, 3) and rotation.shape == (B, 4)
    assert x_fully.shape == (B, 2048)
    # bf16 MXU operands in the kernels -> loosened tolerances vs the f32 reference.
    assert jnp.allclose(x_fully, r_xf, atol=1e-2, rtol=1e-2), "x_fully mismatch"
    assert jnp.allclose(position, r_pos, atol=5e-2, rtol=5e-2), "position mismatch"
    assert jnp.allclose(rotation, r_rot, atol=5e-2, rtol=5e-2), "rotation mismatch"

    print("KERNEL_OK")
</pallas_src>

<mosaic_0001>
module attributes {stable_mosaic.version = 11 : i64} {
  func.func @pool_fc_relu_kernel(%arg0: memref<8x16x512xf32, #tpu.memory_space<vmem>>, %arg1: memref<512x2048xbf16, #tpu.memory_space<vmem>>, %arg2: memref<1x2048xf32, #tpu.memory_space<vmem>>, %arg3: memref<8x2048xf32, #tpu.memory_space<vmem>>, %arg4: memref<8x2048xf32, #tpu.memory_space<vmem>>) attributes {dimension_semantics = [], scalar_prefetch = 0 : i64, scratch_operands = 0 : i64, tpu.core_type = #tpu.core_type<tc>} {
    %c0 = arith.constant 0 : index
    %c0_0 = arith.constant 0 : index
    %c0_1 = arith.constant 0 : index
    %0 = vector.load %arg0[%c0, %c0_0, %c0_1] : memref<8x16x512xf32, #tpu.memory_space<vmem>>, vector<8x16x512xf32>
    %cst = arith.constant dense<0.000000e+00> : vector<8x512xf32>
    %1 = vector.multi_reduction <add>, %0, %cst [1] : vector<8x16x512xf32> to vector<8x512xf32>
    %cst_2 = arith.constant 6.250000e-02 : f32
    %2 = vector.broadcast %cst_2 : f32 to vector<8x512xf32>
    %3 = arith.mulf %1, %2 : vector<8x512xf32>
    %4 = arith.truncf %3 : vector<8x512xf32> to vector<8x512xbf16>
    %c0_3 = arith.constant 0 : index
    %c0_4 = arith.constant 0 : index
    %5 = vector.load %arg1[%c0_3, %c0_4] : memref<512x2048xbf16, #tpu.memory_space<vmem>>, vector<512x2048xbf16>
    %cst_5 = arith.constant dense<0.000000e+00> : vector<8x2048xf32>
    %6 = tpu.matmul %4, %5, %cst_5 {dimension_numbers = #tpu.dot_dimension_numbers<[1], [0], [0], [1], [0, 0, 1, 1], [], []>} : vector<8x512xbf16>, vector<512x2048xbf16>, vector<8x2048xf32> -> vector<8x2048xf32>
    %c0_6 = arith.constant 0 : index
    %c0_7 = arith.constant 0 : index
    %7 = vector.load %arg2[%c0_6, %c0_7] : memref<1x2048xf32, #tpu.memory_space<vmem>>, vector<1x2048xf32>
    %8 = vector.broadcast %7 : vector<1x2048xf32> to vector<8x2048xf32>
    %9 = arith.addf %6, %8 : vector<8x2048xf32>
    %c0_8 = arith.constant 0 : index
    %c0_9 = arith.constant 0 : index
    %10 = vector.load %arg3[%c0_8, %c0_9] : memref<8x2048xf32, #tpu.memory_space<vmem>>, vector<8x2048xf32>
    tpu.vector_store %arg3[%c0_8, %c0_9], %9 {strides = array<i32>} : memref<8x2048xf32, #tpu.memory_space<vmem>>, vector<8x2048xf32>,
    %cst_10 = arith.constant 0.000000e+00 : f32
    %11 = vector.broadcast %cst_10 : f32 to vector<8x2048xf32>
    %12 = arith.maximumf %9, %11 : vector<8x2048xf32>
    %c0_11 = arith.constant 0 : index
    %c0_12 = arith.constant 0 : index
    %13 = vector.load %arg4[%c0_11, %c0_12] : memref<8x2048xf32, #tpu.memory_space<vmem>>, vector<8x2048xf32>
    tpu.vector_store %arg4[%c0_11, %c0_12], %12 {strides = array<i32>} : memref<8x2048xf32, #tpu.memory_space<vmem>>, vector<8x2048xf32>,
    return
  }
}

</mosaic_0001>

<bundles_post_ra>
// kernel: tpu_custom_call.1
= control target key start
LH: loop header
LB: loop body
LE: loop exit
PB: predicated region body
PF: predicated region fallthrough
CT: control target
= control target key end

     0   :  { %10 = vsyncpa [#allocation3], 0  ;;  %s7569_s0 = inlined_call_operand.hbm [shape: f32[8,16,512], index: 0, kind: input, shape index: {}]   ;;  %s7570_s1 = inlined_call_operand.hbm [shape: bf16[512,2048], index: 1, kind: input, shape index: {}]   ;;  %s7571_s2 = inlined_call_operand.hbm [shape: f32[1,2048], index: 2, kind: input, shape index: {}]   ;;  %s7572_s3 = inlined_call_operand.hbm [shape: f32[8,2048], index: 3, kind: output, shape index: {0}]   ;;  %s7573_s4 = inlined_call_operand.hbm [shape: f32[8,2048], index: 4, kind: output, shape index: {1}]  }
   0x1   :  { %11 = vsyncpa [#allocation6], 0 }
   0x2   :  { %12 = vsyncpa [#allocation4], 0  ;;  %s31_s17 = sshll.u32 %s7570_s1, 4  ;;  %s32_s17 = int_to_ptr.hbm [resolvable:$true] %s31_s17 }
   0x3   :  { %13 = vsyncpa [#allocation10], 0  ;;  %s7242_s18 = smov [#allocation5]   ;;  %s18_s22 = sshll.u32 %s7569_s0, 4  ;;  %s19_s22 = int_to_ptr.hbm [resolvable:$true] %s18_s22 }
   0x4   :  { %s33_s19 = sshll.u32 %s7242_s18, 4  ;;  %s7243_s23 = smov 1024   ;;  %s34_s19 = int_to_ptr.vmem [resolvable:$true] %s33_s19 }
   0x5   :  { %s7244_s24 = smov 64   ;;  %s7245_s25 = smov [#allocation2]  }
   0x6   :  { %39 = dma.hbm_to_vmem [thread:$0]  %s32_s17, 65536, %s34_s19, [#allocation6], %s7243_s23, %s7243_s23, %s7244_s24  }
   0x7   :  { %s20_s26 = sshll.u32 %s7245_s25, 4  ;;  %s7246_s27 = smov 512   ;;  %s21_s26 = int_to_ptr.vmem [resolvable:$true] %s20_s26 }
   0x8   :  { %s7247_s28 = smov 32   ;;  %s45_s30 = sshll.u32 %s7571_s2, 4  ;;  %s46_s30 = int_to_ptr.hbm [resolvable:$true] %s45_s30 }
   0x9   :  { %26 = dma.hbm_to_vmem [thread:$0]  %s19_s22, 8192, %s21_s26, [#allocation3], %s7246_s27, %s7246_s27, %s7247_s28  }
   0xa   :  { %s7248_s5 = smov [#allocation7]  }
   0xb   :  { %s47_s6 = sshll.u32 %s7248_s5, 4  ;;  %s48_s6 = int_to_ptr.vmem [resolvable:$true] %s47_s6 }
   0xc   :  { %50 = dma.hbm_to_vmem [thread:$0]  %s46_s30, 256, %s48_s6, [#allocation6]  }
   0xd   :  { %7234 = dma.done.wait [#allocation3], 8192  }
   0xe   :  { %7235 = vsyncadd [#allocation3], 4294959104 }
   0xf   :  { %7236 = dma.done.wait [#allocation6], 65792  }
  0x10   :  { %7237 = vsyncadd [#allocation6], 4294901504  ;;  %v4994_v0 = vld [vmem:[#allocation5 + $0x380] sm:$0xf]  ;;  %vm1027_vm0 = vcmask 1041409   ;;  %vm1029_vm1 = vcmask 1042434  }
  0x11   :  { %v6712_v1 = vld [vmem:[#allocation5 + $0x3bc] sm:$0xf0]  ;;  %vm1031_vm2 = vcmask 1043459   ;;  %vm1033_vm3 = vcmask 1044484   ;;  %vm1035_vm4 = vcmask 1045509   ;;  %vm1037_vm5 = vcmask 1046534  }
  0x12   :  { %v5506_v2 = vld [vmem:[#allocation5 + $0x780] sm:$0xf]  ;;  %v4995_v3 = vor.u32 %v6712_v1, %v4994_v0  ;;  %vm1039_vm6 = vcmask 1047559   ;;  %s7249_s0 = smov [#allocation8]   ;;  %s4517_s9 = sshll.u32 %s7572_s3, 4  ;;  %s4518_s9 = int_to_ptr.hbm [resolvable:$true] %s4517_s9 }
  0x13   :  { %v6840_v4 = vld [vmem:[#allocation5 + $0x7bc] sm:$0xf0]  ;;  %s4515_s2 = sshll.u32 %s7249_s0, 4  ;;  %s7250_s10 = smov [#allocation9]   ;;  %s4516_s2 = int_to_ptr.vmem [resolvable:$true] %s4515_s2 }
  0x14   :  { %v6018_v5 = vld [vmem:[#allocation5 + $0xb80] sm:$0xf]  ;;  %v5507_v7 = vor.u32 %v6840_v4, %v5506_v2  ;;  %3630 = vmatpush.bf16.msra.mxu0 %v4995_v3  ;;  %s4526_s11 = sshll.u32 %s7250_s10, 4  ;;  %s4528_s14 = sshll.u32 %s7573_s4, 4  ;;  %s4527_s11 = int_to_ptr.vmem [resolvable:$true] %s4526_s11  ;;  %s4529_s14 = int_to_ptr.hbm [resolvable:$true] %s4528_s14 }
  0x15   :  { %v6968_v6 = vld [vmem:[#allocation5 + $0xbbc] sm:$0xf0] }
  0x16   :  { %v6019_v8 = vor.u32 %v6968_v6, %v6018_v5  ;;  %v6530_v9 = vld [vmem:[#allocation5 + $0xf80] sm:$0xf]  ;;  %3643 = vmatpush.bf16.msra.mxu1 %v5507_v7 }
  0x17   :  { %v7096_v10 = vld [vmem:[#allocation5 + $0xfbc] sm:$0xf0] }
  0x18   :  { %v4930_v11 = vld [vmem:[#allocation5 + $0x300] sm:$0xf]  ;;  %v6531_v12 = vor.u32 %v7096_v10, %v6530_v9  ;;  %3656 = vmatpush.bf16.msra.mxu2 %v6019_v8 }
  0x19   :  { %v6696_v13 = vld [vmem:[#allocation5 + $0x33c] sm:$0xf0] }
  0x1a   :  { %v5442_v14 = vld [vmem:[#allocation5 + $0x700] sm:$0xf]  ;;  %v4931_v16 = vor.u32 %v6696_v13, %v4930_v11  ;;  %3669 = vmatpush.bf16.msra.mxu3 %v6531_v12 }
  0x1b   :  { %v6824_v15 = vld [vmem:[#allocation5 + $0x73c] sm:$0xf0] }
  0x1c   :  { %v5443_v17 = vor.u32 %v6824_v15, %v5442_v14  ;;  %v5954_v18 = vld [vmem:[#allocation5 + $0xb00] sm:$0xf]  ;;  %3631 = vmatpush.bf16.msra.mxu0 %v4931_v16 }
  0x1d   :  { %v6952_v19 = vld [vmem:[#allocation5 + $0xb3c] sm:$0xf0] }
  0x1e   :  { %v6466_v20 = vld [vmem:[#allocation5 + $0xf00] sm:$0xf]  ;;  %v5955_v21 = vor.u32 %v6952_v19, %v5954_v18  ;;  %3644 = vmatpush.bf16.msra.mxu1 %v5443_v17 }
  0x1f   :  { %v7080_v22 = vld [vmem:[#allocation5 + $0xf3c] sm:$0xf0] }
  0x20   :  { %v4866_v23 = vld [vmem:[#allocation5 + $0x280] sm:$0xf]  ;;  %v6467_v25 = vor.u32 %v7080_v22, %v6466_v20  ;;  %3657 = vmatpush.bf16.msra.mxu2 %v5955_v21 }
  0x21   :  { %v6680_v24 = vld [vmem:[#allocation5 + $0x2bc] sm:$0xf0] }
  0x22   :  { %v5378_v26 = vld [vmem:[#allocation5 + $0x680] sm:$0xf]  ;;  %v4867_v29 = vor.u32 %v6680_v24, %v4866_v23  ;;  %3670 = vmatpush.bf16.msra.mxu3 %v6467_v25 }
  0x23   :  { %v6808_v27 = vld [vmem:[#allocation5 + $0x6bc] sm:$0xf0] }
  0x24   :  { %v5890_v28 = vld [vmem:[#allocation5 + $0xa80] sm:$0xf]  ;;  %v5379_v33 = vor.u32 %v6808_v27, %v5378_v26  ;;  %3632 = vmatpush.bf16.msra.mxu0 %v4867_v29  ;;  %v4996_v29 = vld [vmem:[#allocation5 + $0x3c0] sm:$0xf0] }
  0x25   :  { %v6936_v30 = vld [vmem:[#allocation5 + $0xabc] sm:$0xf0] }
  0x26   :  { %v6402_v31 = vld [vmem:[#allocation5 + $0xe80] sm:$0xf]  ;;  %v5891_v34 = vor.u32 %v6936_v30, %v5890_v28  ;;  %3645 = vmatpush.bf16.msra.mxu1 %v5379_v33  ;;  %v6704_v28 = vld [vmem:[#allocation5 + $0x384] sm:$0xf] }
  0x27   :  { %v7064_v32 = vld [vmem:[#allocation5 + $0xebc] sm:$0xf0]  ;;  %v6832_v30 = vld [vmem:[#allocation5 + $0x784] sm:$0xf] }
  0x28   :  { %v4802_v35 = vld [vmem:[#allocation5 + $0x200] sm:$0xf]  ;;  %v6403_v38 = vor.u32 %v7064_v32, %v6402_v31  ;;  %3658 = vmatpush.bf16.msra.mxu2 %v5891_v34  ;;  %v5508_v31 = vld [vmem:[#allocation5 + $0x7c0] sm:$0xf0] }
  0x29   :  { %v6664_v36 = vld [vmem:[#allocation5 + $0x23c] sm:$0xf0]  ;;  %v6960_v33 = vld [vmem:[#allocation5 + $0xb84] sm:$0xf] }
  0x2a   :  { %v5314_v37 = vld [vmem:[#allocation5 + $0x600] sm:$0xf]  ;;  %v4803_v44 = vor.u32 %v6664_v36, %v4802_v35  ;;  %3671 = vmatpush.bf16.msra.mxu3 %v6403_v38  ;;  %v6020_v34 = vld [vmem:[#allocation5 + $0xbc0] sm:$0xf0] }
  0x2b   :  { %v6792_v39 = vld [vmem:[#allocation5 + $0x63c] sm:$0xf0]  ;;  %v7088_v35 = vld [vmem:[#allocation5 + $0xf84] sm:$0xf] }
  0x2c   :  { %v5826_v40 = vld [vmem:[#allocation5 + $0xa00] sm:$0xf]  ;;  %v5315_v45 = vor.u32 %v6792_v39, %v5314_v37  ;;  %3633 = vmatpush.bf16.msra.mxu0 %v4803_v44  ;;  %v6532_v38 = vld [vmem:[#allocation5 + $0xfc0] sm:$0xf0] }
  0x2d   :  { %v6920_v41 = vld [vmem:[#allocation5 + $0xa3c] sm:$0xf0]  ;;  %v6688_v39 = vld [vmem:[#allocation5 + $0x304] sm:$0xf] }
  0x2e   :  { %v6338_v42 = vld [vmem:[#allocation5 + $0xe00] sm:$0xf]  ;;  %v5827_v46 = vor.u32 %v6920_v41, %v5826_v40  ;;  %3646 = vmatpush.bf16.msra.mxu1 %v5315_v45  ;;  %v4932_v40 = vld [vmem:[#allocation5 + $0x340] sm:$0xf0] }
  0x2f   :  { %v7048_v43 = vld [vmem:[#allocation5 + $0xe3c] sm:$0xf0]  ;;  %v7287_v44 = vld [vmem:[#allocation5 + $0x740] sm:$0xf0] }
  0x30   :  { %v4738_v47 = vld [vmem:[#allocation5 + $0x180] sm:$0xf]  ;;  %v6339_v50 = vor.u32 %v7048_v43, %v6338_v42  ;;  %3659 = vmatpush.bf16.msra.mxu2 %v5827_v46  ;;  %v4999_v42 = vor.u32 %v6704_v28, %v4996_v29  ;;  %v7285_v43 = vld [vmem:[#allocation5 + $0x704] sm:$0xf]  ;;  %v5511_v46 = vor.u32 %v6832_v30, %v5508_v31 }
  0x31   :  { %v6648_v48 = vld [vmem:[#allocation5 + $0x1bc] sm:$0xf0]  ;;  %v7289_v45 = vld [vmem:[#allocation5 + $0xb04] sm:$0xf] }
  0x32   :  { %v5250_v49 = vld [vmem:[#allocation5 + $0x580] sm:$0xf]  ;;  %v4739_v56 = vor.u32 %v6648_v48, %v4738_v47  ;;  %3672 = vmatpush.bf16.msra.mxu3 %v6339_v50  ;;  %v6023_v47 = vor.u32 %v6960_v33, %v6020_v34  ;;  %v5956_v48 = vld [vmem:[#allocation5 + $0xb40] sm:$0xf0]  ;;  %v69_v33 = vld [vmem:[#allocation2 + $0x30] sm:$0xff] }
  0x33   :  { %v6776_v51 = vld [vmem:[#allocation5 + $0x5bc] sm:$0xf0]  ;;  %v7293_v50 = vld [vmem:[#allocation5 + $0xf40] sm:$0xf0] }
  0x34   :  { %v5762_v52 = vld [vmem:[#allocation5 + $0x980] sm:$0xf]  ;;  %v5251_v57 = vor.u32 %v6776_v51, %v5250_v49  ;;  %3634 = vmatpush.bf16.msra.mxu0 %v4739_v56  ;;  %v7291_v49 = vld [vmem:[#allocation5 + $0xf04] sm:$0xf]  ;;  %v6535_v51 = vor.u32 %v7088_v35, %v6532_v38  ;;  %v81_v38 = vld [vmem:[#allocation2 + $0x90] sm:$0xff] }
  0x35   :  { %v6904_v53 = vld [vmem:[#allocation5 + $0x9bc] sm:$0xf0]  ;;  %v7303_v56 = vld [vmem:[#allocation5 + $0xa84] sm:$0xf] }
  0x36   :  { %v6274_v54 = vld [vmem:[#allocation5 + $0xd80] sm:$0xf]  ;;  %v5763_v58 = vor.u32 %v6904_v53, %v5762_v52  ;;  %3647 = vmatpush.bf16.msra.mxu1 %v5251_v57  ;;  %v7295_v52 = vld [vmem:[#allocation5 + $0x284] sm:$0xf] }
  0x37   :  { %v7032_v55 = vld [vmem:[#allocation5 + $0xdbc] sm:$0xf0]  ;;  %v7297_v53 = vld [vmem:[#allocation5 + $0x2c0] sm:$0xf0] }
  0x38   :  { %v4674_v59 = vld [vmem:[#allocation5 + $0x100] sm:$0xf]  ;;  %v6275_v62 = vor.u32 %v7032_v55, %v6274_v54  ;;  %3660 = vmatpush.bf16.msra.mxu2 %v5763_v58  ;;  %v7299_v54 = vld [vmem:[#allocation5 + $0x684] sm:$0xf] }
  0x39   :  { %v6632_v60 = vld [vmem:[#allocation5 + $0x13c] sm:$0xf0]  ;;  %v7301_v55 = vld [vmem:[#allocation5 + $0x6c0] sm:$0xf0] }
  0x3a   :  { %v5186_v61 = vld [vmem:[#allocation5 + $0x500] sm:$0xf]  ;;  %v4675_v4 = vor.u32 %v6632_v60, %v4674_v59  ;;  %3673 = vmatpush.bf16.msra.mxu3 %v6275_v62  ;;  %v7305_v57 = vld [vmem:[#allocation5 + $0xac0] sm:$0xf0] }
  0x3b   :  { %v6760_v63 = vld [vmem:[#allocation5 + $0x53c] sm:$0xf0]  ;;  %v7307_v58 = vld [vmem:[#allocation5 + $0xe84] sm:$0xf] }
  0x3c   :  { %v5698_v0 = vld [vmem:[#allocation5 + $0x900] sm:$0xf]  ;;  %v5187_v5 = vor.u32 %v6760_v63, %v5186_v61  ;;  %3635 = vmatpush.bf16.msra.mxu0 %v4675_v4  ;;  %v7309_v59 = vld [vmem:[#allocation5 + $0xec0] sm:$0xf0]  ;;  %v4935_v4 = vor.u32 %v6688_v39, %v4932_v40 }
  0x3d   :  { %v6888_v1 = vld [vmem:[#allocation5 + $0x93c] sm:$0xf0]  ;;  %v7311_v60 = vld [vmem:[#allocation5 + $0x204] sm:$0xf] }
  0x3e   :  { %v6210_v2 = vld [vmem:[#allocation5 + $0xd00] sm:$0xf]  ;;  %v5699_v6 = vor.u32 %v6888_v1, %v5698_v0  ;;  %3648 = vmatpush.bf16.msra.mxu1 %v5187_v5  ;;  %v7313_v61 = vld [vmem:[#allocation5 + $0x240] sm:$0xf0] }
  0x3f   :  { %v7016_v3 = vld [vmem:[#allocation5 + $0xd3c] sm:$0xf0]  ;;  %v7315_v62 = vld [vmem:[#allocation5 + $0x604] sm:$0xf] }
  0x40   :  { %v4610_v7 = vld [vmem:[#allocation5 + $0x80] sm:$0xf]  ;;  %v6211_v10 = vor.u32 %v7016_v3, %v6210_v2  ;;  %3661 = vmatpush.bf16.msra.mxu2 %v5699_v6  ;;  %v7317_v63 = vld [vmem:[#allocation5 + $0x640] sm:$0xf0] }
  0x41   :  { %v6616_v8 = vld [vmem:[#allocation5 + $0xbc] sm:$0xf0]  ;;  %v7319_v0 = vld [vmem:[#allocation5 + $0xa04] sm:$0xf]  ;;  %v5319_v28 = vor.u32 %v7315_v62, %v7317_v63  ;;  %v125_v62 = vld [vmem:[#allocation2 + $0x1f0] sm:$0xff] }
  0x42   :  { %v5122_v9 = vld [vmem:[#allocation5 + $0x480] sm:$0xf]  ;;  %v4611_v16 = vor.u32 %v6616_v8, %v4610_v7  ;;  %3674 = vmatpush.bf16.msra.mxu3 %v6211_v10  ;;  %v7321_v1 = vld [vmem:[#allocation5 + $0xa40] sm:$0xf0]  ;;  %v5959_v10 = vor.u32 %v7289_v45, %v5956_v48  ;;  %v93_v45 = vld [vmem:[#allocation2 + $0xf0] sm:$0xff] }
  0x43   :  { %v6744_v11 = vld [vmem:[#allocation5 + $0x4bc] sm:$0xf0]  ;;  %v7323_v2 = vld [vmem:[#allocation5 + $0xe04] sm:$0xf]  ;;  %v5831_v29 = vor.u32 %v7319_v0, %v7321_v1  ;;  %v97_v48 = vld [vmem:[#allocation2 + $0x110] sm:$0xff] }
  0x44   :  { %v5634_v12 = vld [vmem:[#allocation5 + $0x880] sm:$0xf]  ;;  %v5123_v20 = vor.u32 %v6744_v11, %v5122_v9  ;;  %3636 = vmatpush.bf16.msra.mxu0 %v4611_v16  ;;  %v7325_v3 = vld [vmem:[#allocation5 + $0xe40] sm:$0xf0]  ;;  %v5447_v9 = vor.u32 %v7285_v43, %v7287_v44  ;;  %v6471_v16 = vor.u32 %v7291_v49, %v7293_v50  ;;  %v85_v43 = vld [vmem:[#allocation2 + $0xb0] sm:$0xff] }
  0x45   :  { %v6872_v13 = vld [vmem:[#allocation5 + $0x8bc] sm:$0xf0]  ;;  %v7327_v5 = vld [vmem:[#allocation5 + $0x184] sm:$0xf]  ;;  %v6343_v30 = vor.u32 %v7323_v2, %v7325_v3  ;;  %v89_v44 = vld [vmem:[#allocation2 + $0xd0] sm:$0xff] }
  0x46   :  { %v6146_v14 = vld [vmem:[#allocation5 + $0xc80] sm:$0xf]  ;;  %v5635_v21 = vor.u32 %v6872_v13, %v5634_v12  ;;  %3649 = vmatpush.bf16.msra.mxu1 %v5123_v20  ;;  %v7329_v6 = vld [vmem:[#allocation5 + $0x1c0] sm:$0xf0]  ;;  %v4871_v20 = vor.u32 %v7295_v52, %v7297_v53  ;;  %v101_v49 = vld [vmem:[#allocation2 + $0x130] sm:$0xff]  ;;  %v197_v52 = vadd.f32 %v85_v43, %v81_v38  ;;  %v225_v53 = vadd.f32 %v93_v45, %v89_v44 }
  0x47   :  { %v7000_v15 = vld [vmem:[#allocation5 + $0xcbc] sm:$0xf0]  ;;  %v7331_v7 = vld [vmem:[#allocation5 + $0x584] sm:$0xf]  ;;  %v4743_v34 = vor.u32 %v7327_v5, %v7329_v6  ;;  %v105_v50 = vld [vmem:[#allocation2 + $0x150] sm:$0xff] }
  0x48   :  { %v4546_v17 = vld [vmem:[#allocation5] sm:$0xf]  ;;  %v6147_v25 = vor.u32 %v7000_v15, %v6146_v14  ;;  %3662 = vmatpush.bf16.msra.mxu2 %v5635_v21  ;;  %v7333_v8 = vld [vmem:[#allocation5 + $0x5c0] sm:$0xf0]  ;;  %v5383_v21 = vor.u32 %v7299_v54, %v7301_v55  ;;  %v198_v0 = vrot.slane %v197_v52, 4  ;;  %v226_v1 = vrot.slane %v225_v53, 4 }
  0x49   :  { %v6600_v18 = vld [vmem:[#allocation5 + $0x3c] sm:$0xf0]  ;;  %v7338_v11 = vld [vmem:[#allocation5 + $0x984] sm:$0xf]  ;;  %v5255_v35 = vor.u32 %v7331_v7, %v7333_v8 }
  0x4a   :  { %v5058_v19 = vld [vmem:[#allocation5 + $0x400] sm:$0xf]  ;;  %v4547_v32 = vor.u32 %v6600_v18, %v4546_v17  ;;  %3675 = vmatpush.bf16.msra.mxu3 %v6147_v25  ;;  %v7340_v12 = vld [vmem:[#allocation5 + $0x9c0] sm:$0xf0] }
  0x4b   :  { %v6728_v22 = vld [vmem:[#allocation5 + $0x43c] sm:$0xf0]  ;;  %v7342_v13 = vld [vmem:[#allocation5 + $0xd84] sm:$0xf]  ;;  %v5767_v40 = vor.u32 %v7338_v11, %v7340_v12 }
  0x4c   :  { %v5570_v23 = vld [vmem:[#allocation5 + $0x800] sm:$0xf]  ;;  %v5059_v36 = vor.u32 %v6728_v22, %v5058_v19  ;;  %3637 = vmatpush.bf16.msra.mxu0 %v4547_v32  ;;  %v7344_v14 = vld [vmem:[#allocation5 + $0xdc0] sm:$0xf0]  ;;  %v5895_v22 = vor.u32 %v7303_v56, %v7305_v57  ;;  %v65_v32 = vld [vmem:[#allocation2 + $0x10] sm:$0xff] }
  0x4d   :  { %v6856_v24 = vld [vmem:[#allocation5 + $0x83c] sm:$0xf0]  ;;  %v7346_v15 = vld [vmem:[#allocation5 + $0x104] sm:$0xf]  ;;  %v141_v39 = vadd.f32 %v69_v33, %v65_v32  ;;  %v109_v56 = vld [vmem:[#allocation2 + $0x170] sm:$0xff]  ;;  %v199_v33 = vadd.f32 %v198_v0, %v197_v52 }
  0x4e   :  { %v6082_v26 = vld [vmem:[#allocation5 + $0xc00] sm:$0xf]  ;;  %v5571_v37 = vor.u32 %v6856_v24, %v5570_v23  ;;  %3650 = vmatpush.bf16.msra.mxu1 %v5059_v36  ;;  %v7350_v17 = vld [vmem:[#allocation5 + $0x140] sm:$0xf0]  ;;  %v6407_v23 = vor.u32 %v7307_v58, %v7309_v59  ;;  %v73_v36 = vld [vmem:[#allocation2 + $0x50] sm:$0xff] }
  0x4f   :  { %v6984_v27 = vld [vmem:[#allocation5 + $0xc3c] sm:$0xf0]  ;;  %v7352_v18 = vld [vmem:[#allocation5 + $0x504] sm:$0xf]  ;;  %v113_v57 = vld [vmem:[#allocation2 + $0x190] sm:$0xff]  ;;  %v200_v44 = vrot.slane %v199_v33, 2 }
  0x50   :  { %v6083_v41 = vor.u32 %v6984_v27, %v6082_v26  ;;  %3663 = vmatpush.bf16.msra.mxu2 %v5571_v37  ;;  %3682 = vmatpush.bf16.msrb.mxu0 %v4999_v42  ;;  %v7354_v19 = vld [vmem:[#allocation5 + $0x540] sm:$0xf0]  ;;  %v4807_v27 = vor.u32 %v7311_v60, %v7313_v61  ;;  %v77_v37 = vld [vmem:[#allocation2 + $0x70] sm:$0xff]  ;;  %v4679_v42 = vor.u32 %v7346_v15, %v7350_v17  ;;  %v66_v0 = vld [vmem:[#allocation2 + $0x18] sm:$0xff] }
  0x51   :  { %v7364_v24 = vld [vmem:[#allocation5 + $0x904] sm:$0xf]  ;;  %v117_v58 = vld [vmem:[#allocation2 + $0x1b0] sm:$0xff]  ;;  %v253_v60 = vadd.f32 %v101_v49, %v97_v48 }
  0x52   :  { %3676 = vmatpush.bf16.msra.mxu3 %v6083_v41  ;;  %3695 = vmatpush.bf16.msrb.mxu1 %v5511_v46  ;;  %v7366_v25 = vld [vmem:[#allocation5 + $0x940] sm:$0xf0]  ;;  %v6279_v41 = vor.u32 %v7342_v13, %v7344_v14  ;;  %v169_v46 = vadd.f32 %v77_v37, %v73_v36  ;;  %v121_v61 = vld [vmem:[#allocation2 + $0x1d0] sm:$0xff]  ;;  %v227_v36 = vadd.f32 %v226_v1, %v225_v53 }
  0x53   :  { %v7368_v26 = vld [vmem:[#allocation5 + $0xd04] sm:$0xf]  ;;  %v5703_v54 = vor.u32 %v7364_v24, %v7366_v25 }
  0x54   :  { %3708 = vmatpush.bf16.msrb.mxu2 %v6023_v47  ;;  %3683 = vmatpush.bf16.msrb.mxu0 %v4935_v4  ;;  %v7378_v31 = vld [vmem:[#allocation5 + $0xd40] sm:$0xf0]  ;;  %v5191_v47 = vor.u32 %v7352_v18, %v7354_v19  ;;  %v170_v59 = vrot.slane %v169_v46, 4  ;;  %v281_v4 = vadd.f32 %v109_v56, %v105_v50  ;;  %v228_v45 = vrot.slane %v227_v36, 2  ;;  %v70_v18 = vld [vmem:[#allocation2 + $0x38] sm:$0xff] }
  0x55   :  { %v6215_v55 = vor.u32 %v7368_v26, %v7378_v31  ;;  %v82_v31 = vld [vmem:[#allocation2 + $0x98] sm:$0xff] }
  0x56   :  { %3721 = vmatpush.bf16.msrb.mxu3 %v6535_v51  ;;  %3696 = vmatpush.bf16.msrb.mxu1 %v5447_v9  ;;  %v142_v51 = vrot.slane %v141_v39, 4  ;;  %v171_v9 = vadd.f32 %v170_v59, %v169_v46  ;;  %v282_v37 = vrot.slane %v281_v4, 4  ;;  %v229_v52 = vadd.f32 %v228_v45, %v227_v36 }
  0x58   :  { %3709 = vmatpush.bf16.msrb.mxu2 %v5959_v10  ;;  %3684 = vmatpush.bf16.msrb.mxu0 %v4871_v20  ;;  %v143_v63 = vadd.f32 %v142_v51, %v141_v39  ;;  %v254_v10 = vrot.slane %v253_v60, 4  ;;  %v337_v20 = vadd.f32 %v125_v62, %v121_v61  ;;  %v172_v38 = vrot.slane %v171_v9, 2 }
  0x59   :  { %v283_v48 = vadd.f32 %v282_v37, %v281_v4 }
  0x5a   :  { %3722 = vmatpush.bf16.msrb.mxu3 %v6471_v16  ;;  %3697 = vmatpush.bf16.msrb.mxu1 %v5383_v21  ;;  %v309_v16 = vadd.f32 %v117_v58, %v113_v57  ;;  %v144_v32 = vrot.slane %v143_v63, 2  ;;  %v255_v43 = vadd.f32 %v254_v10, %v253_v60  ;;  %v74_v10 = vld [vmem:[#allocation2 + $0x58] sm:$0xff] }
  0x5b   :  { %v284_v53 = vrot.slane %v283_v48, 2 }
  0x5c   :  { %3710 = vmatpush.bf16.msrb.mxu2 %v5895_v22  ;;  %3685 = vmatpush.bf16.msrb.mxu0 %v4807_v27  ;;  %v310_v21 = vrot.slane %v309_v16, 4  ;;  %v338_v22 = vrot.slane %v337_v20, 4  ;;  %v145_v39 = vadd.f32 %v144_v32, %v143_v63  ;;  %v256_v46 = vrot.slane %v255_v43, 2 }
  0x5d   :  { %v201_v27 = vadd.f32 %v200_v44, %v199_v33  ;;  %v285_v58 = vadd.f32 %v284_v53, %v283_v48  ;;  %v148_v33 = vadd.f32 %v70_v18, %v66_v0  ;;  %v102_v48 = vld [vmem:[#allocation2 + $0x138] sm:$0xff] }
  0x5e   :  { %3723 = vmatpush.bf16.msrb.mxu3 %v6407_v23  ;;  %3698 = vmatpush.bf16.msrb.mxu1 %v5319_v28  ;;  %v173_v23 = vadd.f32 %v172_v38, %v171_v9  ;;  %v311_v49 = vadd.f32 %v310_v21, %v309_v16  ;;  %v339_v50 = vadd.f32 %v338_v22, %v337_v20  ;;  %v146_v51 = vrot.slane %v145_v39, 1  ;;  %v78_v16 = vld [vmem:[#allocation2 + $0x78] sm:$0xff] }
  0x5f   :  { %v202_v3 = vrot.slane %v201_v27, 1  ;;  %v90_v21 = vld [vmem:[#allocation2 + $0xd8] sm:$0xff] }
  0x60   :  { %3711 = vmatpush.bf16.msrb.mxu2 %v5831_v29  ;;  %3686 = vmatpush.bf16.msrb.mxu0 %v4743_v34  ;;  %v174_v28 = vrot.slane %v173_v23, 1  ;;  %v257_v29 = vadd.f32 %v256_v46, %v255_v43  ;;  %v312_v56 = vrot.slane %v311_v49, 2  ;;  %v340_v57 = vrot.slane %v339_v50, 2  ;;  %v94_v22 = vld [vmem:[#allocation2 + $0xf8] sm:$0xff] }
  0x61   :  { %v147_v2 = vadd.f32 %v146_v51, %v145_v39  ;;  %v203_v7 = vadd.f32 %v202_v3, %v201_v27  ;;  %v98_v39 = vld [vmem:[#allocation2 + $0x118] sm:$0xff] }
  0x62   :  { %3724 = vmatpush.bf16.msrb.mxu3 %v6343_v30  ;;  %3699 = vmatpush.bf16.msrb.mxu1 %v5255_v35  ;;  %v230_v30 = vrot.slane %v229_v52, 1  ;;  %v175_v5 = vadd.f32 %v174_v28, %v173_v23  ;;  %v258_v6 = vrot.slane %v257_v29, 1  ;;  %v313_v34 = vadd.f32 %v312_v56, %v311_v49  ;;  %v106_v23 = vld [vmem:[#allocation2 + $0x158] sm:$0xff] }
  0x63   :  { %v341_v59 = vadd.f32 %v340_v57, %v339_v50  ;;  %v286_v35 = vrot.slane %v285_v58, 1  ;;  %v353_v60 = vmul.f32 0.0625, %v147_v2  ;;  %v361_v14 = vmul.f32 0.0625, %v203_v7  ;;  %v110_v46 = vld [vmem:[#allocation2 + $0x178] sm:$0xff] }
  0x64   :  { %3712 = vmatpush.bf16.msrb.mxu2 %v5767_v40  ;;  %v231_v8 = vadd.f32 %v230_v30, %v229_v52  ;;  %3687 = vmatpush.bf16.msrb.mxu0 %v4679_v42  ;;  %v259_v11 = vadd.f32 %v258_v6, %v257_v29  ;;  %v314_v12 = vrot.slane %v313_v34, 1  ;;  %v357_v61 = vmul.f32 0.0625, %v175_v5  ;;  %v114_v6 = vld [vmem:[#allocation2 + $0x198] sm:$0xff] }
  0x65   :  { %v342_v40 = vrot.slane %v341_v59, 1  ;;  %v287_v13 = vadd.f32 %v286_v35, %v285_v58  ;;  %v385_v62 = vpack.c.bf16 %v353_v60, %v353_v60  ;;  %v149_v49 = vrot.slane %v148_v33, 4  ;;  %v122_v60 = vld [vmem:[#allocation2 + $0x1d8] sm:$0xff] }
  0x66   :  { %3725 = vmatpush.bf16.msrb.mxu3 %v6279_v41  ;;  %3700 = vmatpush.bf16.msrb.mxu1 %v5191_v47  ;;  %v365_v41 = vmul.f32 0.0625, %v231_v8  ;;  %v315_v15 = vadd.f32 %v314_v12, %v313_v34  ;;  %v369_v42 = vmul.f32 0.0625, %v259_v11  ;;  %v389_v63 = vpack.c.bf16 %v357_v61, %v357_v61  ;;  %v118_v34 = vld [vmem:[#allocation2 + $0x1b8] sm:$0xff] }
  0x67   :  { %v343_v17 = vadd.f32 %v342_v40, %v341_v59  ;;  %v373_v19 = vmul.f32 0.0625, %v287_v13  ;;  %v393_v47 = vpack.c.bf16 %v361_v14, %v361_v14  ;;  %v997_v24 = vunpack.c.l.b16 %v385_v62  ;;  %v126_v11 = vld [vmem:[#allocation2 + $0x1f8] sm:$0xff] }
  0x68   :  { %3713 = vmatpush.bf16.msrb.mxu2 %v5703_v54  ;;  %v397_v1 = vpack.c.bf16 %v365_v41, %v365_v41  ;;  %v377_v25 = vmul.f32 0.0625, %v315_v15  ;;  %v401_v4 = vpack.c.bf16 %v369_v42, %v369_v42  ;;  %v1001_v9 = vunpack.c.l.b16 %v389_v63 }
  0x69   :  { %v381_v54 = vmul.f32 0.0625, %v343_v17  ;;  %v405_v20 = vpack.c.bf16 %v373_v19, %v373_v19  ;;  %v1005_v32 = vunpack.c.l.b16 %v393_v47  ;;  %v176_v50 = vadd.f32 %v78_v16, %v74_v10 }
  0x6a   :  { %3726 = vmatpush.bf16.msrb.mxu3 %v6215_v55  ;;  %v1009_v26 = vunpack.c.l.b16 %v397_v1  ;;  %v86_v55 = vld [vmem:[#allocation2 + $0xb8] sm:$0xff]  ;;  %v409_v36 = vpack.c.bf16 %v377_v25, %v377_v25  ;;  %v1013_v38 = vunpack.c.l.b16 %v401_v4  ;;  %v1048_v43 = vsel %vm1027_vm0, %v1001_v9, %v997_v24 }
  0x6b   :  { %v413_v37 = vpack.c.bf16 %v381_v54, %v381_v54  ;;  %v1017_v44 = vunpack.c.l.b16 %v405_v20  ;;  %v1049_v45 = vsel %vm1029_vm1, %v1005_v32, %v1048_v43  ;;  %v204_v53 = vadd.f32 %v86_v55, %v82_v31 }
  0x6c   :  { %v1021_v51 = vunpack.c.l.b16 %v409_v36  ;;  %v1050_v52 = vsel %vm1031_vm2, %v1009_v26, %v1049_v45  ;;  %v150_v29 = vadd.f32 %v149_v49, %v148_v33  ;;  %v177_v56 = vrot.slane %v176_v50, 4 }
  0x6d   :  { %v1025_v27 = vunpack.c.l.b16 %v413_v37  ;;  %v1051_v28 = vsel %vm1033_vm3, %v1013_v38, %v1050_v52  ;;  %v232_v57 = vadd.f32 %v94_v22, %v90_v21  ;;  %v205_v3 = vrot.slane %v204_v53, 4 }
  0x6e   :  { %v1052_v2 = vsel %vm1035_vm4, %v1017_v44, %v1051_v28  ;;  %v260_v30 = vadd.f32 %v102_v48, %v98_v39  ;;  %v288_v58 = vadd.f32 %v110_v46, %v106_v23  ;;  %v151_v59 = vrot.slane %v150_v29, 2 }
  0x6f   :  { %v1053_v5 = vsel %vm1037_vm5, %v1021_v51, %v1052_v2  ;;  %v178_v7 = vadd.f32 %v177_v56, %v176_v50  ;;  %v233_v8 = vrot.slane %v232_v57, 4  ;;  %v206_v12 = vadd.f32 %v205_v3, %v204_v53  ;;  %v63_v51 = vld [vmem:[#allocation2] sm:$0xff] }
  0x70   :  { %v1054_v35 = vsel %vm1039_vm6, %v1025_v27, %v1053_v5  ;;  %v261_v40 = vrot.slane %v260_v30, 4  ;;  %v289_v61 = vrot.slane %v288_v58, 4  ;;  %v152_v14 = vadd.f32 %v151_v59, %v150_v29  ;;  %v67_v27 = vld [vmem:[#allocation2 + $0x20] sm:$0xff] }
  0x71   :  { %v7430_v13 = vpack.c.b16 %v1054_v35, %v1054_v35  ;;  %v179_v41 = vrot.slane %v178_v7, 2  ;;  %v234_v62 = vadd.f32 %v233_v8, %v232_v57  ;;  %v207_v15 = vrot.slane %v206_v12, 2  ;;  %v71_v35 = vld [vmem:[#allocation2 + $0x40] sm:$0xff] }
  0x72   :  { %v262_v17 = vadd.f32 %v261_v40, %v260_v30  ;;  %v290_v42 = vadd.f32 %v289_v61, %v288_v58  ;;  %v316_v63 = vadd.f32 %v118_v34, %v114_v6  ;;  %v153_v0 = vrot.slane %v152_v14, 1 }
  0x73   :  { %3664 = vmatmul.bf16.vlgmr.msra.gmra.mxu2 %v7430_v13  ;;  %v180_v18 = vadd.f32 %v179_v41, %v178_v7  ;;  %v235_v19 = vrot.slane %v234_v62, 2  ;;  %v344_v47 = vadd.f32 %v126_v11, %v122_v60  ;;  %v208_v1 = vadd.f32 %v207_v15, %v206_v12  ;;  %v75_v60 = vld [vmem:[#allocation2 + $0x60] sm:$0xff] }
  0x74   :  { %v263_v24 = vrot.slane %v262_v17, 2  ;;  %v291_v25 = vrot.slane %v290_v42, 2  ;;  %v317_v54 = vrot.slane %v316_v63, 4  ;;  %v154_v4 = vadd.f32 %v153_v0, %v152_v14  ;;  %v79_v11 = vld [vmem:[#allocation2 + $0x80] sm:$0xff] }
  0x75   :  { %v181_v9 = vrot.slane %v180_v18, 1  ;;  %v236_v10 = vadd.f32 %v235_v19, %v234_v62  ;;  %v345_v16 = vrot.slane %v344_v47, 4  ;;  %v209_v20 = vrot.slane %v208_v1, 1  ;;  %v83_v14 = vld [vmem:[#allocation2 + $0xa0] sm:$0xff] }
  0x76   :  { %v264_v32 = vadd.f32 %v263_v24, %v262_v17  ;;  %v292_v26 = vadd.f32 %v291_v25, %v290_v42  ;;  %v318_v31 = vadd.f32 %v317_v54, %v316_v63  ;;  %v354_v37 = vmul.f32 0.0625, %v154_v4  ;;  %v87_v41 = vld [vmem:[#allocation2 + $0xc0] sm:$0xff] }
  0x77   :  { %v182_v55 = vadd.f32 %v181_v9, %v180_v18  ;;  %v237_v33 = vrot.slane %v236_v10, 1  ;;  %v346_v36 = vadd.f32 %v345_v16, %v344_v47  ;;  %v210_v38 = vadd.f32 %v209_v20, %v208_v1  ;;  %v91_v62 = vld [vmem:[#allocation2 + $0xe0] sm:$0xff] }
  0x78   :  { %v265_v43 = vrot.slane %v264_v32, 1  ;;  %v293_v21 = vrot.slane %v292_v26, 1  ;;  %v319_v22 = vrot.slane %v318_v31, 2  ;;  %v386_v48 = vpack.c.bf16 %v354_v37, %v354_v37  ;;  %v95_v47 = vld [vmem:[#allocation2 + $0x100] sm:$0xff] }
  0x79   :  { %v238_v39 = vadd.f32 %v237_v33, %v236_v10  ;;  %v347_v44 = vrot.slane %v346_v36, 2  ;;  %v358_v45 = vmul.f32 0.0625, %v182_v55  ;;  %v362_v50 = vmul.f32 0.0625, %v210_v38  ;;  %v99_v1 = vld [vmem:[#allocation2 + $0x120] sm:$0xff] }
  0x7a   :  { %v266_v23 = vadd.f32 %v265_v43, %v264_v32  ;;  %v294_v46 = vadd.f32 %v293_v21, %v292_v26  ;;  %v320_v49 = vadd.f32 %v319_v22, %v318_v31  ;;  %v998_v29 = vunpack.c.l.b16 %v386_v48  ;;  %v103_v9 = vld [vmem:[#allocation2 + $0x140] sm:$0xff] }
  0x7b   :  { %v348_v52 = vadd.f32 %v347_v44, %v346_v36  ;;  %v366_v53 = vmul.f32 0.0625, %v238_v39  ;;  %v390_v28 = vpack.c.bf16 %v358_v45, %v358_v45  ;;  %v394_v3 = vpack.c.bf16 %v362_v50, %v362_v50  ;;  %v107_v10 = vld [vmem:[#allocation2 + $0x160] sm:$0xff] }
  0x7c   :  { %v321_v56 = vrot.slane %v320_v49, 1  ;;  %v370_v57 = vmul.f32 0.0625, %v266_v23  ;;  %v374_v2 = vmul.f32 0.0625, %v294_v46  ;;  %v127_v6 = vadd.f32 %v67_v27, %v63_v51  ;;  %v111_v45 = vld [vmem:[#allocation2 + $0x180] sm:$0xff] }
  0x7d   :  { %v349_v30 = vrot.slane %v348_v52, 1  ;;  %v398_v58 = vpack.c.bf16 %v366_v53, %v366_v53  ;;  %v1002_v5 = vunpack.c.l.b16 %v390_v28  ;;  %v1006_v8 = vunpack.c.l.b16 %v394_v3  ;;  %v115_v48 = vld [vmem:[#allocation2 + $0x1a0] sm:$0xff] }
  0x7e   :  { %v322_v34 = vadd.f32 %v321_v56, %v320_v49  ;;  %v402_v59 = vpack.c.bf16 %v370_v57, %v370_v57  ;;  %v406_v7 = vpack.c.bf16 %v374_v2, %v374_v2  ;;  %v128_v15 = vrot.slane %v127_v6, 4  ;;  %v119_v51 = vld [vmem:[#allocation2 + $0x1c0] sm:$0xff] }
  0x7f   :  { %v350_v12 = vadd.f32 %v349_v30, %v348_v52  ;;  %v1010_v40 = vunpack.c.l.b16 %v398_v58  ;;  %v1055_v61 = vsel %vm1027_vm0, %v1002_v5, %v998_v29  ;;  %v155_v25 = vadd.f32 %v75_v60, %v71_v35  ;;  %v123_v27 = vld [vmem:[#allocation2 + $0x1e0] sm:$0xff] }
  0x80   :  { %v378_v17 = vmul.f32 0.0625, %v322_v34  ;;  %v1014_v42 = vunpack.c.l.b16 %v402_v59  ;;  %v1018_v63 = vunpack.c.l.b16 %v406_v7  ;;  %v1056_v0 = vsel %vm1029_vm1, %v1006_v8, %v1055_v61 }
  0x81   :  { %v382_v18 = vmul.f32 0.0625, %v350_v12  ;;  %v1057_v19 = vsel %vm1031_vm2, %v1010_v40, %v1056_v0  ;;  %v129_v24 = vadd.f32 %v128_v15, %v127_v6  ;;  %v183_v16 = vadd.f32 %v83_v14, %v79_v11 }
  0x82   :  { %v410_v54 = vpack.c.bf16 %v378_v17, %v378_v17  ;;  %v1058_v4 = vsel %vm1033_vm3, %v1014_v42, %v1057_v19  ;;  %v211_v20 = vadd.f32 %v91_v62, %v87_v41  ;;  %v156_v55 = vrot.slane %v155_v25, 4  ;;  %v6608_v19 = vld [vmem:[#allocation5 + $0x84] sm:$0xf] }
  0x83   :  { %v414_v32 = vpack.c.bf16 %v382_v18, %v382_v18  ;;  %v1059_v26 = vsel %vm1035_vm4, %v1018_v63, %v1058_v4  ;;  %v130_v31 = vrot.slane %v129_v24, 2  ;;  %v184_v36 = vrot.slane %v183_v16, 4  ;;  %v6736_v4 = vld [vmem:[#allocation5 + $0x484] sm:$0xf] }
  0x84   :  { %v1022_v33 = vunpack.c.l.b16 %v410_v54  ;;  %v212_v37 = vrot.slane %v211_v20, 4  ;;  %v239_v38 = vadd.f32 %v99_v1, %v95_v47  ;;  %v157_v22 = vadd.f32 %v156_v55, %v155_v25  ;;  %v4612_v47 = vld [vmem:[#allocation5 + $0xc0] sm:$0xf0] }
  0x85   :  { %v1026_v43 = vunpack.c.l.b16 %v414_v32  ;;  %v131_v21 = vadd.f32 %v130_v31, %v129_v24  ;;  %v267_v39 = vadd.f32 %v107_v10, %v103_v9  ;;  %v185_v23 = vadd.f32 %v184_v36, %v183_v16  ;;  %v5124_v32 = vld [vmem:[#allocation5 + $0x4c0] sm:$0xf0] }
  0x86   :  { %v1060_v44 = vsel %vm1037_vm5, %v1022_v33, %v1059_v26  ;;  %v213_v46 = vadd.f32 %v212_v37, %v211_v20  ;;  %v240_v49 = vrot.slane %v239_v38, 4  ;;  %v158_v53 = vrot.slane %v157_v22, 2 }
  0x87   :  { %v1061_v50 = vsel %vm1039_vm6, %v1026_v43, %v1060_v44  ;;  %v132_v52 = vrot.slane %v131_v21, 1  ;;  %v268_v28 = vrot.slane %v267_v39, 4  ;;  %v186_v56 = vrot.slane %v185_v23, 2 }
  0x88   :  { %v7440_v29 = vpack.c.b16 %v1061_v50, %v1061_v50  ;;  %v214_v57 = vrot.slane %v213_v46, 2  ;;  %v241_v2 = vadd.f32 %v240_v49, %v239_v38  ;;  %v159_v30 = vadd.f32 %v158_v53, %v157_v22  ;;  %v5636_v22 = vld [vmem:[#allocation5 + $0x8c0] sm:$0xf0]  ;;  %v68_v53 = vld [vmem:[#allocation2 + $0x28] sm:$0xff] }
  0x89   :  { %v133_v3 = vadd.f32 %v132_v52, %v131_v21  ;;  %v269_v58 = vadd.f32 %v268_v28, %v267_v39  ;;  %v295_v5 = vadd.f32 %v115_v48, %v111_v45  ;;  %v187_v6 = vadd.f32 %v186_v56, %v185_v23  ;;  %v6864_v21 = vld [vmem:[#allocation5 + $0x884] sm:$0xf]  ;;  %v64_v52 = vld [vmem:[#allocation2 + $0x8] sm:$0xff] }
  0x8a   :  { %3677 = vmatmul.bf16.vlgmr.msra.gmra.mxu3 %v7440_v29  ;;  %v215_v34 = vadd.f32 %v214_v57, %v213_v46  ;;  %v242_v59 = vrot.slane %v241_v2, 2  ;;  %v323_v7 = vadd.f32 %v123_v27, %v119_v51  ;;  %v160_v8 = vrot.slane %v159_v30, 1  ;;  %v6992_v23 = vld [vmem:[#allocation5 + $0xc84] sm:$0xf]  ;;  %v72_v28 = vld [vmem:[#allocation2 + $0x48] sm:$0xff] }
  0x8b   :  { %v270_v35 = vrot.slane %v269_v58, 2  ;;  %v296_v60 = vrot.slane %v295_v5, 4  ;;  %v351_v11 = vmul.f32 0.0625, %v133_v3  ;;  %v188_v12 = vrot.slane %v187_v6, 1  ;;  %v6148_v46 = vld [vmem:[#allocation5 + $0xcc0] sm:$0xf0] }
  0x8c   :  { %v216_v40 = vrot.slane %v215_v34, 1  ;;  %v243_v61 = vadd.f32 %v242_v59, %v241_v2  ;;  %v324_v14 = vrot.slane %v323_v7, 4  ;;  %v161_v41 = vadd.f32 %v160_v8, %v159_v30  ;;  %v76_v30 = vld [vmem:[#allocation2 + $0x68] sm:$0xff] }
  0x8d   :  { %v271_v62 = vadd.f32 %v270_v35, %v269_v58  ;;  %v297_v15 = vadd.f32 %v296_v60, %v295_v5  ;;  %v383_v17 = vpack.c.bf16 %v351_v11, %v351_v11  ;;  %v189_v42 = vadd.f32 %v188_v12, %v187_v6  ;;  %v80_v58 = vld [vmem:[#allocation2 + $0x88] sm:$0xff] }
  0x8e   :  { %v217_v63 = vadd.f32 %v216_v40, %v215_v34  ;;  %v244_v0 = vrot.slane %v243_v61, 1  ;;  %v325_v18 = vadd.f32 %v324_v14, %v323_v7  ;;  %v355_v25 = vmul.f32 0.0625, %v161_v41  ;;  %v84_v5 = vld [vmem:[#allocation2 + $0xa8] sm:$0xff] }
  0x8f   :  { %v272_v1 = vrot.slane %v271_v62, 1  ;;  %v298_v24 = vrot.slane %v297_v15, 2  ;;  %v995_v54 = vunpack.c.l.b16 %v383_v17  ;;  %v359_v16 = vmul.f32 0.0625, %v189_v42  ;;  %v88_v8 = vld [vmem:[#allocation2 + $0xc8] sm:$0xff] }
  0x90   :  { %v245_v9 = vadd.f32 %v244_v0, %v243_v61  ;;  %v326_v10 = vrot.slane %v325_v18, 2  ;;  %v363_v20 = vmul.f32 0.0625, %v217_v63  ;;  %v387_v55 = vpack.c.bf16 %v355_v25, %v355_v25  ;;  %v92_v35 = vld [vmem:[#allocation2 + $0xe8] sm:$0xff] }
  0x91   :  { %v273_v26 = vadd.f32 %v272_v1, %v271_v62  ;;  %v299_v31 = vadd.f32 %v298_v24, %v297_v15  ;;  %v4615_v33 = vor.u32 %v6608_v19, %v4612_v47  ;;  %v391_v38 = vpack.c.bf16 %v359_v16, %v359_v16  ;;  %v96_v40 = vld [vmem:[#allocation2 + $0x108] sm:$0xff] }
  0x92   :  { %v327_v36 = vadd.f32 %v326_v10, %v325_v18  ;;  %v367_v37 = vmul.f32 0.0625, %v245_v9  ;;  %v395_v43 = vpack.c.bf16 %v363_v20, %v363_v20  ;;  %v999_v45 = vunpack.c.l.b16 %v387_v55  ;;  %v100_v61 = vld [vmem:[#allocation2 + $0x128] sm:$0xff] }
  0x93   :  { %v300_v39 = vrot.slane %v299_v31, 1  ;;  %v371_v44 = vmul.f32 0.0625, %v273_v26  ;;  %3688 = vmatpush.bf16.msrb.mxu0 %v4615_v33  ;;  %v5127_v48 = vor.u32 %v6736_v4, %v5124_v32  ;;  %v1003_v51 = vunpack.c.l.b16 %v391_v38  ;;  %v104_v15 = vld [vmem:[#allocation2 + $0x148] sm:$0xff] }
  0x94   :  { %v328_v49 = vrot.slane %v327_v36, 1  ;;  %v399_v50 = vpack.c.bf16 %v367_v37, %v367_v37  ;;  %v1007_v27 = vunpack.c.l.b16 %v395_v43  ;;  %v1028_v2 = vsel %vm1027_vm0, %v999_v45, %v995_v54  ;;  %v108_v17 = vld [vmem:[#allocation2 + $0x168] sm:$0xff] }
  0x95   :  { %v301_v56 = vadd.f32 %v300_v39, %v299_v31  ;;  %v403_v57 = vpack.c.bf16 %v371_v44, %v371_v44  ;;  %3701 = vmatpush.bf16.msrb.mxu1 %v5127_v48  ;;  %v5639_v3 = vor.u32 %v6864_v21, %v5636_v22  ;;  %v1030_v59 = vsel %vm1029_vm1, %v1003_v51, %v1028_v2  ;;  %v112_v33 = vld [vmem:[#allocation2 + $0x188] sm:$0xff] }
  0x96   :  { %v329_v6 = vadd.f32 %v328_v49, %v327_v36  ;;  %v1011_v34 = vunpack.c.l.b16 %v399_v50  ;;  %v6151_v7 = vor.u32 %v6992_v23, %v6148_v46  ;;  %v1032_v12 = vsel %vm1031_vm2, %v1007_v27, %v1030_v59  ;;  %v116_v36 = vld [vmem:[#allocation2 + $0x1a8] sm:$0xff] }
  0x97   :  { %v375_v60 = vmul.f32 0.0625, %v301_v56  ;;  %v1015_v11 = vunpack.c.l.b16 %v403_v57  ;;  %3714 = vmatpush.bf16.msrb.mxu2 %v5639_v3  ;;  %v134_v14 = vadd.f32 %v68_v53, %v64_v52  ;;  %v162_v42 = vadd.f32 %v76_v30, %v72_v28  ;;  %v120_v22 = vld [vmem:[#allocation2 + $0x1c8] sm:$0xff] }
  0x98   :  { %v379_v41 = vmul.f32 0.0625, %v329_v6  ;;  %v1034_v62 = vsel %vm1033_vm3, %v1011_v34, %v1032_v12  ;;  %3727 = vmatpush.bf16.msrb.mxu3 %v6151_v7  ;;  %v190_v63 = vadd.f32 %v84_v5, %v80_v58  ;;  %v218_v47 = vadd.f32 %v92_v35, %v88_v8  ;;  %v124_v39 = vld [vmem:[#allocation2 + $0x1e8] sm:$0xff] }
  0x99   :  { %v407_v0 = vpack.c.bf16 %v375_v60, %v375_v60  ;;  %v1036_v18 = vsel %vm1035_vm4, %v1015_v11, %v1034_v62  ;;  %v135_v19 = vrot.slane %v134_v14, 4  ;;  %v163_v24 = vrot.slane %v162_v42, 4 }
  0x9a   :  { %v411_v1 = vpack.c.bf16 %v379_v41, %v379_v41  ;;  %v191_v25 = vrot.slane %v190_v63, 4  ;;  %v246_v54 = vadd.f32 %v100_v61, %v96_v40  ;;  %v219_v10 = vrot.slane %v218_v47, 4 }
  0x9b   :  { %v1019_v4 = vunpack.c.l.b16 %v407_v0  ;;  %v136_v9 = vadd.f32 %v135_v19, %v134_v14  ;;  %v274_v16 = vadd.f32 %v108_v17, %v104_v15  ;;  %v164_v32 = vadd.f32 %v163_v24, %v162_v42  ;;  %v6592_v19 = vld [vmem:[#allocation5 + $0x4] sm:$0xf] }
  0x9c   :  { %v1023_v20 = vunpack.c.l.b16 %v411_v1  ;;  %v192_v26 = vadd.f32 %v191_v25, %v190_v63  ;;  %v247_v31 = vrot.slane %v246_v54, 4  ;;  %v220_v38 = vadd.f32 %v219_v10, %v218_v47  ;;  %v4548_v47 = vld [vmem:[#allocation5 + $0x40] sm:$0xf0] }
  0x9d   :  { %v1038_v55 = vsel %vm1037_vm5, %v1019_v4, %v1036_v18  ;;  %v137_v37 = vrot.slane %v136_v9, 2  ;;  %v275_v43 = vrot.slane %v274_v16, 4  ;;  %v165_v44 = vrot.slane %v164_v32, 2  ;;  %v6720_v4 = vld [vmem:[#allocation5 + $0x404] sm:$0xf] }
  0x9e   :  { %v1040_v21 = vsel %vm1039_vm6, %v1023_v20, %v1038_v55  ;;  %v193_v45 = vrot.slane %v192_v26, 2  ;;  %v248_v48 = vadd.f32 %v247_v31, %v246_v54  ;;  %v221_v49 = vrot.slane %v220_v38, 2  ;;  %v5572_v31 = vld [vmem:[#allocation5 + $0x840] sm:$0xf0] }
  0x9f   :  { %v7450_v23 = vpack.c.b16 %v1040_v21, %v1040_v21  ;;  %v138_v46 = vadd.f32 %v137_v37, %v136_v9  ;;  %v276_v50 = vadd.f32 %v275_v43, %v274_v16  ;;  %v166_v51 = vadd.f32 %v165_v44, %v164_v32  ;;  %v5060_v9 = vld [vmem:[#allocation5 + $0x440] sm:$0xf0] }
  0xa0   :  { %v194_v27 = vadd.f32 %v193_v45, %v192_v26  ;;  %v249_v52 = vrot.slane %v248_v48, 2  ;;  %v302_v53 = vadd.f32 %v116_v36, %v112_v33  ;;  %v222_v56 = vadd.f32 %v221_v49, %v220_v38  ;;  %v6848_v26 = vld [vmem:[#allocation5 + $0x804] sm:$0xf]  ;;  %v5002_v45 = vld [vmem:[#allocation5 + $0x388] sm:$0xf] }
  0xa1   :  { %3638 = vmatmul.bf16.vlgmr.msra.gmra.mxu0 %v7450_v23  ;;  %v139_v28 = vrot.slane %v138_v46, 1  ;;  %v277_v57 = vrot.slane %v276_v50, 2  ;;  %v330_v2 = vadd.f32 %v124_v39, %v120_v22  ;;  %v167_v3 = vrot.slane %v166_v51, 1  ;;  %v6976_v38 = vld [vmem:[#allocation5 + $0xc04] sm:$0xf] }
  0xa2   :  { %v195_v30 = vrot.slane %v194_v27, 1  ;;  %v250_v58 = vadd.f32 %v249_v52, %v248_v48  ;;  %v303_v5 = vrot.slane %v302_v53, 4  ;;  %v223_v34 = vrot.slane %v222_v56, 1  ;;  %v6084_v43 = vld [vmem:[#allocation5 + $0xc40] sm:$0xf0] }
  0xa3   :  { %v140_v6 = vadd.f32 %v139_v28, %v138_v46  ;;  %v278_v59 = vadd.f32 %v277_v57, %v276_v50  ;;  %v331_v7 = vrot.slane %v330_v2, 4  ;;  %v168_v8 = vadd.f32 %v167_v3, %v166_v51  ;;  %v6713_v48 = vld [vmem:[#allocation5 + $0x3c4] sm:$0xf0] }
  0xa4   :  { %v196_v35 = vadd.f32 %v195_v30, %v194_v27  ;;  %v251_v60 = vrot.slane %v250_v58, 1  ;;  %v304_v11 = vadd.f32 %v303_v5, %v302_v53  ;;  %v224_v12 = vadd.f32 %v223_v34, %v222_v56  ;;  %v6026_v27 = vld [vmem:[#allocation5 + $0xb88] sm:$0xf] }
  0xa5   :  { %v279_v40 = vrot.slane %v278_v59, 1  ;;  %v332_v61 = vadd.f32 %v331_v7, %v330_v2  ;;  %v352_v14 = vmul.f32 0.0625, %v140_v6  ;;  %v356_v15 = vmul.f32 0.0625, %v168_v8  ;;  %v6969_v52 = vld [vmem:[#allocation5 + $0xbc4] sm:$0xf0] }
  0xa6   :  { %v252_v41 = vadd.f32 %v251_v60, %v250_v58  ;;  %v305_v62 = vrot.slane %v304_v11, 2  ;;  %v360_v17 = vmul.f32 0.0625, %v196_v35  ;;  %v364_v0 = vmul.f32 0.0625, %v224_v12  ;;  %v6538_v53 = vld [vmem:[#allocation5 + $0xf88] sm:$0xf] }
  0xa7   :  { %v280_v42 = vadd.f32 %v279_v40, %v278_v59  ;;  %v333_v63 = vrot.slane %v332_v61, 2  ;;  %v384_v18 = vpack.c.bf16 %v352_v14, %v352_v14  ;;  %v388_v25 = vpack.c.bf16 %v356_v15, %v356_v15  ;;  %v7097_v3 = vld [vmem:[#allocation5 + $0xfc4] sm:$0xf0] }
  0xa8   :  { %v306_v1 = vadd.f32 %v305_v62, %v304_v11  ;;  %v368_v24 = vmul.f32 0.0625, %v252_v41  ;;  %v392_v54 = vpack.c.bf16 %v360_v17, %v360_v17  ;;  %v396_v20 = vpack.c.bf16 %v364_v0, %v364_v0  ;;  %v4938_v30 = vld [vmem:[#allocation5 + $0x308] sm:$0xf] }
  0xa9   :  { %v334_v10 = vadd.f32 %v333_v63, %v332_v61  ;;  %v372_v16 = vmul.f32 0.0625, %v280_v42  ;;  %v996_v32 = vunpack.c.l.b16 %v384_v18  ;;  %v1000_v36 = vunpack.c.l.b16 %v388_v25  ;;  %v6697_v58 = vld [vmem:[#allocation5 + $0x344] sm:$0xf0] }
  0xaa   :  { %v307_v55 = vrot.slane %v306_v1, 1  ;;  %v400_v33 = vpack.c.bf16 %v368_v24, %v368_v24  ;;  %v1004_v37 = vunpack.c.l.b16 %v392_v54  ;;  %v1008_v39 = vunpack.c.l.b16 %v396_v20  ;;  %v5962_v7 = vld [vmem:[#allocation5 + $0xb08] sm:$0xf] }
  0xab   :  { %v335_v21 = vrot.slane %v334_v10, 1  ;;  %v404_v22 = vpack.c.bf16 %v372_v16, %v372_v16  ;;  %v4551_v44 = vor.u32 %v6592_v19, %v4548_v47  ;;  %v1041_v50 = vsel %vm1027_vm0, %v1000_v36, %v996_v32  ;;  %v6953_v8 = vld [vmem:[#allocation5 + $0xb44] sm:$0xf0] }
  0xac   :  { %v308_v46 = vadd.f32 %v307_v55, %v306_v1  ;;  %v1012_v49 = vunpack.c.l.b16 %v400_v33  ;;  %v5063_v51 = vor.u32 %v6720_v4, %v5060_v9  ;;  %v1042_v57 = vsel %vm1029_vm1, %v1004_v37, %v1041_v50  ;;  %v6474_v12 = vld [vmem:[#allocation5 + $0xf08] sm:$0xf] }
  0xad   :  { %v336_v28 = vadd.f32 %v335_v21, %v334_v10  ;;  %v1016_v56 = vunpack.c.l.b16 %v404_v22  ;;  %3689 = vmatpush.bf16.msrb.mxu0 %v4551_v44  ;;  %v5575_v2 = vor.u32 %v6848_v26, %v5572_v31  ;;  %v1043_v6 = vsel %vm1031_vm2, %v1008_v39, %v1042_v57  ;;  %v7081_v40 = vld [vmem:[#allocation5 + $0xf44] sm:$0xf0] }
  0xae   :  { %v376_v5 = vmul.f32 0.0625, %v308_v46  ;;  %3702 = vmatpush.bf16.msrb.mxu1 %v5063_v51  ;;  %v6087_v34 = vor.u32 %v6976_v38, %v6084_v43  ;;  %v5003_v59 = vor.u32 %v6713_v48, %v5002_v45  ;;  %v1044_v60 = vsel %vm1033_vm3, %v1012_v49, %v1043_v6  ;;  %v5514_v15 = vld [vmem:[#allocation5 + $0x788] sm:$0xf] }
  0xaf   :  { %v380_v35 = vmul.f32 0.0625, %v336_v28  ;;  %3715 = vmatpush.bf16.msrb.mxu2 %v5575_v2  ;;  %v6027_v11 = vor.u32 %v6969_v52, %v6026_v27  ;;  %v6539_v14 = vor.u32 %v7097_v3, %v6538_v53  ;;  %v1045_v62 = vsel %vm1035_vm4, %v1016_v56, %v1044_v60  ;;  %v4874_v63 = vld [vmem:[#allocation5 + $0x288] sm:$0xf] }
  0xb0   :  { %v408_v61 = vpack.c.bf16 %v376_v5, %v376_v5  ;;  %3728 = vmatpush.bf16.msrb.mxu3 %v6087_v34  ;;  %v4939_v17 = vor.u32 %v6697_v58, %v4938_v30  ;;  %v5963_v42 = vor.u32 %v6953_v8, %v5962_v7  ;;  %v6681_v0 = vld [vmem:[#allocation5 + $0x2c4] sm:$0xf0]  ;;  %v6475_v47 = vor.u32 %v7081_v40, %v6474_v12 }
  0xb1   :  { %3734 = vmatpush.bf16.msra.mxu0 %v5003_v59  ;;  %v412_v41 = vpack.c.bf16 %v380_v35, %v380_v35  ;;  %v6841_v19 = vld [vmem:[#allocation5 + $0x7c4] sm:$0xf0]  ;;  %v4875_v10 = vor.u32 %v6681_v0, %v4874_v63 }
  0xb2   :  { %v1020_v18 = vunpack.c.l.b16 %v408_v61  ;;  %v5898_v1 = vld [vmem:[#allocation5 + $0xa88] sm:$0xf]  ;;  %3716 = vmatmul.bf16.vlgmr.msrb.gmra.mxu2 %v7430_v13  ;;  %3690 = vmatmul.bf16.vlgmr.msrb.gmra.mxu0 %v7450_v23  ;;  %v5515_v20 = vor.u32 %v6841_v19, %v5514_v15 }
  0xb3   :  { %3760 = vmatpush.bf16.msra.mxu2 %v6027_v11  ;;  %v6937_v24 = vld [vmem:[#allocation5 + $0xac4] sm:$0xf0]  ;;  %v1024_v25 = vunpack.c.l.b16 %v412_v41  ;;  %3729 = vmatmul.bf16.vlgmr.msrb.gmra.mxu3 %v7440_v29 }
  0xb4   :  { %3773 = vmatpush.bf16.msra.mxu3 %v6539_v14  ;;  %v6410_v54 = vld [vmem:[#allocation5 + $0xe88] sm:$0xf]  ;;  %v1046_v9 = vsel %vm1037_vm5, %v1020_v18, %v1045_v62  ;;  %v5899_v26 = vor.u32 %v6937_v24, %v5898_v1 }
  0xb5   :  { %v7065_v4 = vld [vmem:[#allocation5 + $0xec4] sm:$0xf0]  ;;  %3735 = vmatpush.bf16.msra.mxu0 %v4939_v17  ;;  %v1047_v16 = vsel %vm1039_vm6, %v1024_v25, %v1046_v9 }
  0xb6   :  { %v5450_v32 = vld [vmem:[#allocation5 + $0x708] sm:$0xf]  ;;  %v7463_v33 = vpack.c.b16 %v1047_v16, %v1047_v16  ;;  %v6411_v37 = vor.u32 %v7065_v4, %v6410_v54  ;;  %v6705_v16 = vld [vmem:[#allocation5 + $0x38c] sm:$0xf] }
  0xb7   :  { %3761 = vmatpush.bf16.msra.mxu2 %v5963_v42  ;;  %v4810_v31 = vld [vmem:[#allocation5 + $0x208] sm:$0xf] }
  0xb8   :  { %v6665_v55 = vld [vmem:[#allocation5 + $0x244] sm:$0xf0]  ;;  %3774 = vmatpush.bf16.msra.mxu3 %v6475_v47  ;;  %3651 = vmatmul.bf16.vlgmr.msra.gmra.mxu1 %v7463_v33 }
  0xb9   :  { %v6825_v36 = vld [vmem:[#allocation5 + $0x744] sm:$0xf0]  ;;  %3736 = vmatpush.bf16.msra.mxu0 %v4875_v10  ;;  %v4811_v39 = vor.u32 %v6665_v55, %v4810_v31  ;;  %3747 = vmatpush.bf16.msra.mxu1 %v5515_v20  ;;  %v5004_v20 = vld [vmem:[#allocation5 + $0x3c8] sm:$0xf0] }
  0xba   :  { %v5834_v38 = vld [vmem:[#allocation5 + $0xa08] sm:$0xf]  ;;  %v5451_v44 = vor.u32 %v6825_v36, %v5450_v32  ;;  %v6961_v32 = vld [vmem:[#allocation5 + $0xb8c] sm:$0xf] }
  0xbb   :  { %v6921_v43 = vld [vmem:[#allocation5 + $0xa44] sm:$0xf0]  ;;  %3762 = vmatpush.bf16.msra.mxu2 %v5899_v26  ;;  %v6028_v31 = vld [vmem:[#allocation5 + $0xbc8] sm:$0xf0] }
  0xbc   :  { %v6346_v21 = vld [vmem:[#allocation5 + $0xe08] sm:$0xf]  ;;  %v5835_v48 = vor.u32 %v6921_v43, %v5834_v38  ;;  %3775 = vmatpush.bf16.msra.mxu3 %v6411_v37  ;;  %v7089_v55 = vld [vmem:[#allocation5 + $0xf8c] sm:$0xf] }
  0xbd   :  { %v7049_v22 = vld [vmem:[#allocation5 + $0xe44] sm:$0xf0]  ;;  %3737 = vmatpush.bf16.msra.mxu0 %v4811_v39  ;;  %3748 = vmatpush.bf16.msra.mxu1 %v5451_v44  ;;  %v6540_v36 = vld [vmem:[#allocation5 + $0xfc8] sm:$0xf0]  ;;  %v5007_v39 = vor.u32 %v6705_v16, %v5004_v20  ;;  %v6031_v44 = vor.u32 %v6961_v32, %v6028_v31 }
  0xbe   :  { %v5386_v45 = vld [vmem:[#allocation5 + $0x688] sm:$0xf]  ;;  %v6347_v51 = vor.u32 %v7049_v22, %v6346_v21  ;;  %v6785_v20 = vld [vmem:[#allocation5 + $0x60c] sm:$0xf] }
  0xbf   :  { %v4746_v46 = vld [vmem:[#allocation5 + $0x188] sm:$0xf]  ;;  %3763 = vmatpush.bf16.msra.mxu2 %v5835_v48  ;;  %v6689_v48 = vld [vmem:[#allocation5 + $0x30c] sm:$0xf] }
  0xc0   :  { %v6649_v49 = vld [vmem:[#allocation5 + $0x1c4] sm:$0xf0]  ;;  %3776 = vmatpush.bf16.msra.mxu3 %v6347_v51  ;;  %v7073_v51 = vld [vmem:[#allocation5 + $0xf0c] sm:$0xf] }
  0xc1   :  { %v6809_v50 = vld [vmem:[#allocation5 + $0x6c4] sm:$0xf0]  ;;  %v4747_v56 = vor.u32 %v6649_v49, %v4746_v46  ;;  %v4940_v46 = vld [vmem:[#allocation5 + $0x348] sm:$0xf0] }
  0xc2   :  { %v5770_v27 = vld [vmem:[#allocation5 + $0x988] sm:$0xf]  ;;  %v5387_v57 = vor.u32 %v6809_v50, %v5386_v45  ;;  %v6543_v45 = vor.u32 %v7089_v55, %v6540_v36  ;;  %v6945_v49 = vld [vmem:[#allocation5 + $0xb0c] sm:$0xf] }
  0xc3   :  { %v6905_v52 = vld [vmem:[#allocation5 + $0x9c4] sm:$0xf0]  ;;  %3738 = vmatpush.bf16.msra.mxu0 %v4747_v56  ;;  %v5964_v50 = vld [vmem:[#allocation5 + $0xb48] sm:$0xf0] }
  0xc4   :  { %v6282_v53 = vld [vmem:[#allocation5 + $0xd88] sm:$0xf]  ;;  %v5771_v3 = vor.u32 %v6905_v52, %v5770_v27  ;;  %3749 = vmatpush.bf16.msra.mxu1 %v5387_v57  ;;  %v6476_v27 = vld [vmem:[#allocation5 + $0xf48] sm:$0xf0] }
  0xc5   :  { %v7033_v28 = vld [vmem:[#allocation5 + $0xdc4] sm:$0xf0]  ;;  %v6833_v56 = vld [vmem:[#allocation5 + $0x78c] sm:$0xf] }
  0xc6   :  { %v5322_v2 = vld [vmem:[#allocation5 + $0x608] sm:$0xf]  ;;  %v6283_v6 = vor.u32 %v7033_v28, %v6282_v53  ;;  %3764 = vmatpush.bf16.msra.mxu2 %v5771_v3  ;;  %v5516_v57 = vld [vmem:[#allocation5 + $0x7c8] sm:$0xf0]  ;;  %v5967_v3 = vor.u32 %v6945_v49, %v5964_v50 }
  0xc7   :  { %v4682_v30 = vld [vmem:[#allocation5 + $0x108] sm:$0xf]  ;;  %v5324_v32 = vld [vmem:[#allocation5 + $0x648] sm:$0xf0] }
  0xc8   :  { %v6633_v58 = vld [vmem:[#allocation5 + $0x144] sm:$0xf0]  ;;  %3777 = vmatpush.bf16.msra.mxu3 %v6283_v6  ;;  %3703 = vmatmul.bf16.vlgmr.msrb.gmra.mxu1 %v7463_v33  ;;  %v6929_v6 = vld [vmem:[#allocation5 + $0xa8c] sm:$0xf] }
  0xc9   :  { %v6793_v5 = vld [vmem:[#allocation5 + $0x644] sm:$0xf0]  ;;  %v4683_v35 = vor.u32 %v6633_v58, %v4682_v30  ;;  %v6479_v30 = vor.u32 %v7073_v51, %v6476_v27  ;;  %v6673_v58 = vld [vmem:[#allocation5 + $0x28c] sm:$0xf] }
  0xca   :  { %v5706_v34 = vld [vmem:[#allocation5 + $0x908] sm:$0xf]  ;;  %v5323_v60 = vor.u32 %v6793_v5, %v5322_v2  ;;  %v4943_v2 = vor.u32 %v6689_v48, %v4940_v46  ;;  %v4876_v5 = vld [vmem:[#allocation5 + $0x2c8] sm:$0xf0] }
  0xcb   :  { %v6889_v59 = vld [vmem:[#allocation5 + $0x944] sm:$0xf0]  ;;  %3739 = vmatpush.bf16.msra.mxu0 %v4683_v35  ;;  %v5519_v35 = vor.u32 %v6833_v56, %v5516_v57  ;;  %v6625_v36 = vld [vmem:[#allocation5 + $0x10c] sm:$0xf] }
  0xcc   :  { %v6218_v7 = vld [vmem:[#allocation5 + $0xd08] sm:$0xf]  ;;  %v5707_v12 = vor.u32 %v6889_v59, %v5706_v34  ;;  %3750 = vmatpush.bf16.msra.mxu1 %v5323_v60  ;;  %v5900_v34 = vld [vmem:[#allocation5 + $0xac8] sm:$0xf0] }
  0xcd   :  { %v7017_v8 = vld [vmem:[#allocation5 + $0xd44] sm:$0xf0]  ;;  %v7057_v59 = vld [vmem:[#allocation5 + $0xe8c] sm:$0xf] }
  0xce   :  { %v5258_v11 = vld [vmem:[#allocation5 + $0x588] sm:$0xf]  ;;  %v6219_v41 = vor.u32 %v7017_v8, %v6218_v7  ;;  %3765 = vmatpush.bf16.msra.mxu2 %v5707_v12  ;;  %v6412_v7 = vld [vmem:[#allocation5 + $0xec8] sm:$0xf0]  ;;  %v4879_v12 = vor.u32 %v6673_v58, %v4876_v5 }
  0xcf   :  { %v4618_v40 = vld [vmem:[#allocation5 + $0x88] sm:$0xf]  ;;  %v6817_v60 = vld [vmem:[#allocation5 + $0x70c] sm:$0xf] }
  0xd0   :  { %v6617_v61 = vld [vmem:[#allocation5 + $0xc4] sm:$0xf0]  ;;  %3778 = vmatpush.bf16.msra.mxu3 %v6219_v41  ;;  %v4812_v41 = vld [vmem:[#allocation5 + $0x248] sm:$0xf0] }
  0xd1   :  { %v6777_v14 = vld [vmem:[#allocation5 + $0x5c4] sm:$0xf0]  ;;  %v4619_v18 = vor.u32 %v6617_v61, %v4618_v40  ;;  %v5903_v40 = vor.u32 %v6929_v6, %v5900_v34  ;;  %v6415_v61 = vor.u32 %v7057_v59, %v6412_v7  ;;  %v6609_v50 = vld [vmem:[#allocation5 + $0x8c] sm:$0xf] }
  0xd2   :  { %v5642_v62 = vld [vmem:[#allocation5 + $0x888] sm:$0xf]  ;;  %v5259_v19 = vor.u32 %v6777_v14, %v5258_v11  ;;  %v5452_v11 = vld [vmem:[#allocation5 + $0x748] sm:$0xf0] }
  0xd3   :  { %v6873_v15 = vld [vmem:[#allocation5 + $0x8c4] sm:$0xf0]  ;;  %3740 = vmatpush.bf16.msra.mxu0 %v4619_v18  ;;  %v6657_v14 = vld [vmem:[#allocation5 + $0x20c] sm:$0xf] }
  0xd4   :  { %v6154_v17 = vld [vmem:[#allocation5 + $0xc88] sm:$0xf]  ;;  %v5643_v47 = vor.u32 %v6873_v15, %v5642_v62  ;;  %3751 = vmatpush.bf16.msra.mxu1 %v5259_v19  ;;  %v6913_v62 = vld [vmem:[#allocation5 + $0xa0c] sm:$0xf]  ;;  %v4815_v19 = vor.u32 %v6657_v14, %v4812_v41  ;;  %v6546_v14 = vld [vmem:[#allocation5 + $0xf90] sm:$0xf] }
  0xd5   :  { %v7001_v42 = vld [vmem:[#allocation5 + $0xcc4] sm:$0xf0]  ;;  %v5836_v15 = vld [vmem:[#allocation5 + $0xa48] sm:$0xf0]  ;;  %v7098_v41 = vld [vmem:[#allocation5 + $0xfcc] sm:$0xf0] }
  0xd6   :  { %v5194_v63 = vld [vmem:[#allocation5 + $0x508] sm:$0xf]  ;;  %v6155_v54 = vor.u32 %v7001_v42, %v6154_v17  ;;  %3766 = vmatpush.bf16.msra.mxu2 %v5643_v47  ;;  %v7041_v17 = vld [vmem:[#allocation5 + $0xe0c] sm:$0xf]  ;;  %v5839_v47 = vor.u32 %v6913_v62, %v5836_v15 }
  0xd7   :  { %v6761_v0 = vld [vmem:[#allocation5 + $0x544] sm:$0xf0]  ;;  %v6348_v42 = vld [vmem:[#allocation5 + $0xe48] sm:$0xf0] }
  0xd8   :  { %v4554_v1 = vld [vmem:[#allocation5 + $0x8] sm:$0xf]  ;;  %v5195_v37 = vor.u32 %v6761_v0, %v5194_v63  ;;  %3779 = vmatpush.bf16.msra.mxu3 %v6155_v54  ;;  %v5455_v63 = vor.u32 %v6817_v60, %v5452_v11  ;;  %v6801_v0 = vld [vmem:[#allocation5 + $0x68c] sm:$0xf]  ;;  %v6714_v60 = vld [vmem:[#allocation5 + $0x3cc] sm:$0xf0] }
  0xd9   :  { %v6601_v24 = vld [vmem:[#allocation5 + $0x44] sm:$0xf0]  ;;  %v5388_v18 = vld [vmem:[#allocation5 + $0x6c8] sm:$0xf0]  ;;  %v6034_v11 = vld [vmem:[#allocation5 + $0xb90] sm:$0xf] }
  0xda   :  { %v5578_v25 = vld [vmem:[#allocation5 + $0x808] sm:$0xf]  ;;  %v4555_v26 = vor.u32 %v6601_v24, %v4554_v1  ;;  %3752 = vmatpush.bf16.msra.mxu1 %v5195_v37  ;;  %v6351_v1 = vor.u32 %v7041_v17, %v6348_v42  ;;  %v6641_v24 = vld [vmem:[#allocation5 + $0x18c] sm:$0xf]  ;;  %v5391_v16 = vor.u32 %v6801_v0, %v5388_v18  ;;  %v4946_v18 = vld [vmem:[#allocation5 + $0x310] sm:$0xf] }
  0xdb   :  { %v6857_v4 = vld [vmem:[#allocation5 + $0x844] sm:$0xf0]  ;;  %v6897_v54 = vld [vmem:[#allocation5 + $0x98c] sm:$0xf] }
  0xdc   :  { %v6090_v9 = vld [vmem:[#allocation5 + $0xc08] sm:$0xf]  ;;  %v5579_v38 = vor.u32 %v6857_v4, %v5578_v25  ;;  %3741 = vmatpush.bf16.msra.mxu0 %v4555_v26  ;;  %v4748_v25 = vld [vmem:[#allocation5 + $0x1c8] sm:$0xf0] }
  0xdd   :  { %v6985_v10 = vld [vmem:[#allocation5 + $0xc44] sm:$0xf0]  ;;  %v5772_v4 = vld [vmem:[#allocation5 + $0x9c8] sm:$0xf0]  ;;  %v4751_v26 = vor.u32 %v6641_v24, %v4748_v25  ;;  %v6954_v24 = vld [vmem:[#allocation5 + $0xb4c] sm:$0xf0] }
  0xde   :  { %v5130_v43 = vld [vmem:[#allocation5 + $0x488] sm:$0xf]  ;;  %v6091_v22 = vor.u32 %v6985_v10, %v6090_v9  ;;  %3767 = vmatpush.bf16.msra.mxu2 %v5579_v38  ;;  %v7025_v9 = vld [vmem:[#allocation5 + $0xd8c] sm:$0xf]  ;;  %v5775_v31 = vor.u32 %v6897_v54, %v5772_v4  ;;  %v6482_v54 = vld [vmem:[#allocation5 + $0xf10] sm:$0xf] }
  0xdf   :  { %v6745_v21 = vld [vmem:[#allocation5 + $0x4c4] sm:$0xf0]  ;;  %3742 = vmatmul.bf16.vlgmr.msra.gmra.mxu0 %v7450_v23  ;;  %v6284_v10 = vld [vmem:[#allocation5 + $0xdc8] sm:$0xf0]  ;;  %v7082_v4 = vld [vmem:[#allocation5 + $0xf4c] sm:$0xf0] }
  0xe0   :  { %v5131_v52 = vor.u32 %v6745_v21, %v5130_v43  ;;  %v5066_v53 = vld [vmem:[#allocation5 + $0x408] sm:$0xf]  ;;  %3780 = vmatpush.bf16.msra.mxu3 %v6091_v22  ;;  %3786 = vmatpush.bf16.msrb.mxu0 %v5007_v39  ;;  %v6287_v55 = vor.u32 %v7025_v9, %v6284_v10  ;;  %v4684_v37 = vld [vmem:[#allocation5 + $0x148] sm:$0xf0]  ;;  %v5327_v39 = vor.u32 %v6785_v20, %v5324_v32  ;;  %v6842_v20 = vld [vmem:[#allocation5 + $0x7cc] sm:$0xf0] }
  0xe1   :  { %v6729_v28 = vld [vmem:[#allocation5 + $0x444] sm:$0xf0]  ;;  %3768 = vmatmul.bf16.vlgmr.msra.gmra.mxu2 %v7430_v13  ;;  %v6881_v38 = vld [vmem:[#allocation5 + $0x90c] sm:$0xf]  ;;  %v4687_v48 = vor.u32 %v6625_v36, %v4684_v37  ;;  %v6682_v36 = vld [vmem:[#allocation5 + $0x2cc] sm:$0xf0] }
  0xe2   :  { %3812 = vmatpush.bf16.msrb.mxu2 %v6031_v44  ;;  %3753 = vmatpush.bf16.msra.mxu1 %v5131_v52  ;;  %v5067_v8 = vor.u32 %v6729_v28, %v5066_v53  ;;  %v5708_v43 = vld [vmem:[#allocation5 + $0x948] sm:$0xf0]  ;;  %v5906_v37 = vld [vmem:[#allocation5 + $0xa90] sm:$0xf] }
  0xe3   :  { %3781 = vmatmul.bf16.vlgmr.msra.gmra.mxu3 %v7440_v29  ;;  %v7009_v21 = vld [vmem:[#allocation5 + $0xd0c] sm:$0xf]  ;;  %v5711_v46 = vor.u32 %v6881_v38, %v5708_v43  ;;  %v6938_v38 = vld [vmem:[#allocation5 + $0xacc] sm:$0xf0] }
  0xe4   :  { %3825 = vmatpush.bf16.msrb.mxu3 %v6543_v45  ;;  %3787 = vmatpush.bf16.msrb.mxu0 %v4943_v2  ;;  %v6220_v22 = vld [vmem:[#allocation5 + $0xd48] sm:$0xf0] }
  0xe5   :  { %v6769_v44 = vld [vmem:[#allocation5 + $0x58c] sm:$0xf]  ;;  %v6223_v49 = vor.u32 %v7009_v21, %v6220_v22  ;;  %v6418_v21 = vld [vmem:[#allocation5 + $0xe90] sm:$0xf] }
  0xe6   :  { %3813 = vmatpush.bf16.msrb.mxu2 %v5967_v3  ;;  %3754 = vmatpush.bf16.msra.mxu1 %v5067_v8  ;;  %v5260_v45 = vld [vmem:[#allocation5 + $0x5c8] sm:$0xf0]  ;;  %v7066_v22 = vld [vmem:[#allocation5 + $0xecc] sm:$0xf0] }
  0xe7   :  { %v4620_v51 = vld [vmem:[#allocation5 + $0xc8] sm:$0xf0]  ;;  %v5263_v56 = vor.u32 %v6769_v44, %v5260_v45  ;;  %v5458_v44 = vld [vmem:[#allocation5 + $0x710] sm:$0xf] }
  0xe8   :  { %3826 = vmatpush.bf16.msrb.mxu3 %v6479_v30  ;;  %3788 = vmatpush.bf16.msrb.mxu0 %v4879_v12  ;;  %v6865_v27 = vld [vmem:[#allocation5 + $0x88c] sm:$0xf]  ;;  %v4623_v3 = vor.u32 %v6609_v50, %v4620_v51  ;;  %v6970_v12 = vld [vmem:[#allocation5 + $0xbcc] sm:$0xf0]  ;;  %v6419_v50 = vor.u32 %v7066_v22, %v6418_v21 }
  0xe9   :  { %3755 = vmatmul.bf16.vlgmr.msra.gmra.mxu1 %v7463_v33  ;;  %v5644_v52 = vld [vmem:[#allocation5 + $0x8c8] sm:$0xf0]  ;;  %v6035_v0 = vor.u32 %v6970_v12, %v6034_v11  ;;  %v6826_v45 = vld [vmem:[#allocation5 + $0x74c] sm:$0xf0] }
  0xea   :  { %3799 = vmatpush.bf16.msrb.mxu1 %v5519_v35  ;;  %3814 = vmatpush.bf16.msrb.mxu2 %v5903_v40  ;;  %v6993_v53 = vld [vmem:[#allocation5 + $0xc8c] sm:$0xf]  ;;  %v5647_v58 = vor.u32 %v6865_v27, %v5644_v52  ;;  %v5010_v35 = vld [vmem:[#allocation5 + $0x390] sm:$0xf] }
  0xeb   :  { %v6156_v28 = vld [vmem:[#allocation5 + $0xcc8] sm:$0xf0]  ;;  %v6666_v51 = vld [vmem:[#allocation5 + $0x24c] sm:$0xf0] }
  0xec   :  { %3827 = vmatpush.bf16.msrb.mxu3 %v6415_v61  ;;  %3789 = vmatpush.bf16.msrb.mxu0 %v4815_v19  ;;  %v6753_v57 = vld [vmem:[#allocation5 + $0x50c] sm:$0xf]  ;;  %v6159_v5 = vor.u32 %v6993_v53, %v6156_v28  ;;  %v6547_v19 = vor.u32 %v7098_v41, %v6546_v14  ;;  %v5842_v27 = vld [vmem:[#allocation5 + $0xa10] sm:$0xf] }
  0xed   :  { %v5196_v2 = vld [vmem:[#allocation5 + $0x548] sm:$0xf0]  ;;  %v6922_v52 = vld [vmem:[#allocation5 + $0xa4c] sm:$0xf0] }
  0xee   :  { %3800 = vmatpush.bf16.msrb.mxu1 %v5455_v63  ;;  %3815 = vmatpush.bf16.msrb.mxu2 %v5839_v47  ;;  %v6593_v30 = vld [vmem:[#allocation5 + $0xc] sm:$0xf]  ;;  %v5199_v40 = vor.u32 %v6753_v57, %v5196_v2  ;;  %v5011_v63 = vor.u32 %v6714_v60, %v5010_v35  ;;  %v6698_v47 = vld [vmem:[#allocation5 + $0x34c] sm:$0xf0] }
  0xef   :  { %v4556_v6 = vld [vmem:[#allocation5 + $0x48] sm:$0xf0]  ;;  %v4947_v32 = vor.u32 %v6698_v47, %v4946_v18  ;;  %v6354_v53 = vld [vmem:[#allocation5 + $0xe10] sm:$0xf] }
  0xf0   :  { %3828 = vmatpush.bf16.msrb.mxu3 %v6351_v1  ;;  %3790 = vmatpush.bf16.msrb.mxu0 %v4751_v26  ;;  %v6849_v34 = vld [vmem:[#allocation5 + $0x80c] sm:$0xf]  ;;  %v4559_v61 = vor.u32 %v6593_v30, %v4556_v6  ;;  %v5970_v1 = vld [vmem:[#allocation5 + $0xb10] sm:$0xf]  ;;  %v5843_v30 = vor.u32 %v6922_v52, %v5842_v27 }
  0xf1   :  { %v5580_v59 = vld [vmem:[#allocation5 + $0x848] sm:$0xf0]  ;;  %v5971_v26 = vor.u32 %v6954_v24, %v5970_v1  ;;  %v7050_v28 = vld [vmem:[#allocation5 + $0xe4c] sm:$0xf0] }
  0xf2   :  { %3801 = vmatpush.bf16.msrb.mxu1 %v5391_v16  ;;  %3816 = vmatpush.bf16.msrb.mxu2 %v5775_v31  ;;  %v6977_v7 = vld [vmem:[#allocation5 + $0xc0c] sm:$0xf]  ;;  %v5583_v17 = vor.u32 %v6849_v34, %v5580_v59  ;;  %v5522_v16 = vld [vmem:[#allocation5 + $0x790] sm:$0xf] }
  0xf3   :  { %v6092_v8 = vld [vmem:[#allocation5 + $0xc48] sm:$0xf0]  ;;  %v4882_v31 = vld [vmem:[#allocation5 + $0x290] sm:$0xf] }
  0xf4   :  { %3829 = vmatpush.bf16.msrb.mxu3 %v6287_v55  ;;  %3791 = vmatpush.bf16.msrb.mxu0 %v4687_v48  ;;  %v6737_v62 = vld [vmem:[#allocation5 + $0x48c] sm:$0xf]  ;;  %v6095_v42 = vor.u32 %v6977_v7, %v6092_v8  ;;  %v6483_v55 = vor.u32 %v7082_v4, %v6482_v54  ;;  %v4883_v48 = vor.u32 %v6682_v36, %v4882_v31  ;;  %v5394_v57 = vld [vmem:[#allocation5 + $0x690] sm:$0xf] }
  0xf5   :  { %v5132_v15 = vld [vmem:[#allocation5 + $0x4c8] sm:$0xf0]  ;;  %v6810_v2 = vld [vmem:[#allocation5 + $0x6cc] sm:$0xf0] }
  0xf6   :  { %3802 = vmatpush.bf16.msrb.mxu1 %v5327_v39  ;;  %3817 = vmatpush.bf16.msrb.mxu2 %v5711_v46  ;;  %v5135_v25 = vor.u32 %v6737_v62, %v5132_v15  ;;  %v6721_v9 = vld [vmem:[#allocation5 + $0x40c] sm:$0xf]  ;;  %v5523_v39 = vor.u32 %v6842_v20, %v5522_v16  ;;  %v5907_v46 = vor.u32 %v6938_v38, %v5906_v37  ;;  %v6650_v6 = vld [vmem:[#allocation5 + $0x1cc] sm:$0xf0] }
  0xf7   :  { %v5068_v10 = vld [vmem:[#allocation5 + $0x448] sm:$0xf0]  ;;  %v5778_v34 = vld [vmem:[#allocation5 + $0x990] sm:$0xf]  ;;  %v5395_v35 = vor.u32 %v6810_v2, %v5394_v57 }
  0xf8   :  { %3830 = vmatpush.bf16.msrb.mxu3 %v6223_v49  ;;  %3792 = vmatpush.bf16.msrb.mxu0 %v4623_v3  ;;  %v5071_v43 = vor.u32 %v6721_v9, %v5068_v10  ;;  %v4818_v49 = vld [vmem:[#allocation5 + $0x210] sm:$0xf] }
  0xf9   :  { %v4819_v3 = vor.u32 %v6666_v51, %v4818_v49  ;;  %v6906_v59 = vld [vmem:[#allocation5 + $0x9cc] sm:$0xf0]  ;;  %v7090_v49 = vld [vmem:[#allocation5 + $0xf94] sm:$0xf] }
  0xfa   :  { %3803 = vmatpush.bf16.msrb.mxu1 %v5263_v56  ;;  %3818 = vmatpush.bf16.msrb.mxu2 %v5647_v58  ;;  %v5459_v56 = vor.u32 %v6826_v45, %v5458_v44  ;;  %v4754_v58 = vld [vmem:[#allocation5 + $0x190] sm:$0xf]  ;;  %v5012_v44 = vld [vmem:[#allocation5 + $0x3d0] sm:$0xf0] }
  0xfb   :  { %v6290_v7 = vld [vmem:[#allocation5 + $0xd90] sm:$0xf]  ;;  %v4755_v12 = vor.u32 %v6650_v6, %v4754_v58  ;;  %v6962_v45 = vld [vmem:[#allocation5 + $0xb94] sm:$0xf] }
  0xfc   :  { %3831 = vmatpush.bf16.msrb.mxu3 %v6159_v5  ;;  %3793 = vmatpush.bf16.msrb.mxu0 %v4559_v61  ;;  %v6355_v5 = vor.u32 %v7050_v28, %v6354_v53  ;;  %v7034_v8 = vld [vmem:[#allocation5 + $0xdcc] sm:$0xf0]  ;;  %v6946_v58 = vld [vmem:[#allocation5 + $0xb14] sm:$0xf] }
  0xfd   :  { %v5330_v60 = vld [vmem:[#allocation5 + $0x610] sm:$0xf]  ;;  %v6291_v14 = vor.u32 %v7034_v8, %v6290_v7  ;;  %v5972_v6 = vld [vmem:[#allocation5 + $0xb50] sm:$0xf0] }
  0xfe   :  { %3804 = vmatpush.bf16.msrb.mxu1 %v5199_v40  ;;  %3819 = vmatpush.bf16.msrb.mxu2 %v5583_v17  ;;  %v6794_v11 = vld [vmem:[#allocation5 + $0x64c] sm:$0xf0]  ;;  %v5779_v40 = vor.u32 %v6906_v59, %v5778_v34  ;;  %v7074_v34 = vld [vmem:[#allocation5 + $0xf14] sm:$0xf] }
  0xff   :  { %3794 = vmatmul.bf16.vlgmr.msrb.gmra.mxu0 %v7450_v23  ;;  %v4690_v61 = vld [vmem:[#allocation5 + $0x110] sm:$0xf]  ;;  %v6484_v59 = vld [vmem:[#allocation5 + $0xf50] sm:$0xf0] }
 0x100   :  { %3832 = vmatpush.bf16.msrb.mxu3 %v6095_v42  ;;  %3838 = vmatpush.bf16.msra.mxu0 %v5011_v63  ;;  %v6634_v41 = vld [vmem:[#allocation5 + $0x14c] sm:$0xf0]  ;;  %v5331_v63 = vor.u32 %v6794_v11, %v5330_v60  ;;  %v5524_v60 = vld [vmem:[#allocation5 + $0x7d0] sm:$0xf0] }
 0x101   :  { %3820 = vmatmul.bf16.vlgmr.msrb.gmra.mxu2 %v7430_v13  ;;  %v5714_v62 = vld [vmem:[#allocation5 + $0x910] sm:$0xf] }
 0x102   :  { %3864 = vmatpush.bf16.msra.mxu2 %v6035_v0  ;;  %3805 = vmatpush.bf16.msrb.mxu1 %v5135_v25  ;;  %v6890_v15 = vld [vmem:[#allocation5 + $0x94c] sm:$0xf0] }
 0x103   :  { %3833 = vmatmul.bf16.vlgmr.msrb.gmra.mxu3 %v7440_v29  ;;  %v6226_v17 = vld [vmem:[#allocation5 + $0xd10] sm:$0xf]  ;;  %v5715_v47 = vor.u32 %v6890_v15, %v5714_v62  ;;  %v5908_v15 = vld [vmem:[#allocation5 + $0xad0] sm:$0xf0] }
 0x104   :  { %3877 = vmatpush.bf16.msra.mxu3 %v6547_v19  ;;  %3839 = vmatpush.bf16.msra.mxu0 %v4947_v32  ;;  %v7018_v42 = vld [vmem:[#allocation5 + $0xd4c] sm:$0xf0]  ;;  %v4691_v19 = vor.u32 %v6634_v41, %v4690_v61  ;;  %v6674_v61 = vld [vmem:[#allocation5 + $0x294] sm:$0xf] }
 0x105   :  { %v5266_v0 = vld [vmem:[#allocation5 + $0x590] sm:$0xf]  ;;  %v6227_v24 = vor.u32 %v7018_v42, %v6226_v17  ;;  %v6930_v41 = vld [vmem:[#allocation5 + $0xa94] sm:$0xf] }
 0x106   :  { %3865 = vmatpush.bf16.msra.mxu2 %v5971_v26  ;;  %3806 = vmatpush.bf16.msrb.mxu1 %v5071_v43  ;;  %v6778_v18 = vld [vmem:[#allocation5 + $0x5cc] sm:$0xf0]  ;;  %v7058_v17 = vld [vmem:[#allocation5 + $0xe94] sm:$0xf] }
 0x107   :  { %v4626_v1 = vld [vmem:[#allocation5 + $0x90] sm:$0xf]  ;;  %v5267_v16 = vor.u32 %v6778_v18, %v5266_v0  ;;  %v6420_v42 = vld [vmem:[#allocation5 + $0xed0] sm:$0xf0] }
 0x108   :  { %3878 = vmatpush.bf16.msra.mxu3 %v6483_v55  ;;  %3840 = vmatpush.bf16.msra.mxu0 %v4883_v48  ;;  %v6618_v25 = vld [vmem:[#allocation5 + $0xcc] sm:$0xf0]  ;;  %v6818_v0 = vld [vmem:[#allocation5 + $0x714] sm:$0xf] }
 0x109   :  { %3807 = vmatmul.bf16.vlgmr.msrb.gmra.mxu1 %v7463_v33  ;;  %v5650_v54 = vld [vmem:[#allocation5 + $0x890] sm:$0xf]  ;;  %v4627_v26 = vor.u32 %v6618_v25, %v4626_v1  ;;  %v5460_v18 = vld [vmem:[#allocation5 + $0x750] sm:$0xf0]  ;;  %v6423_v1 = vor.u32 %v7058_v17, %v6420_v42 }
 0x10a   :  { %3851 = vmatpush.bf16.msra.mxu1 %v5523_v39  ;;  %3866 = vmatpush.bf16.msra.mxu2 %v5907_v46  ;;  %v6874_v4 = vld [vmem:[#allocation5 + $0x8cc] sm:$0xf0]  ;;  %v6706_v39 = vld [vmem:[#allocation5 + $0x394] sm:$0xf] }
 0x10b   :  { %v6162_v9 = vld [vmem:[#allocation5 + $0xc90] sm:$0xf]  ;;  %v5651_v31 = vor.u32 %v6874_v4, %v5650_v54  ;;  %v6036_v46 = vld [vmem:[#allocation5 + $0xbd0] sm:$0xf0] }
 0x10c   :  { %3879 = vmatpush.bf16.msra.mxu3 %v6419_v50  ;;  %3841 = vmatpush.bf16.msra.mxu0 %v4819_v3  ;;  %v7002_v10 = vld [vmem:[#allocation5 + $0xccc] sm:$0xf0]  ;;  %v6548_v50 = vld [vmem:[#allocation5 + $0xfd0] sm:$0xf0]  ;;  %v6039_v57 = vor.u32 %v6962_v45, %v6036_v46 }
 0x10d   :  { %v5202_v20 = vld [vmem:[#allocation5 + $0x510] sm:$0xf]  ;;  %v6163_v38 = vor.u32 %v7002_v10, %v6162_v9  ;;  %v6551_v2 = vor.u32 %v7090_v49, %v6548_v50  ;;  %v6690_v3 = vld [vmem:[#allocation5 + $0x314] sm:$0xf] }
 0x10e   :  { %3852 = vmatpush.bf16.msra.mxu1 %v5459_v56  ;;  %3867 = vmatpush.bf16.msra.mxu2 %v5843_v30  ;;  %v6762_v32 = vld [vmem:[#allocation5 + $0x54c] sm:$0xf0]  ;;  %v5015_v56 = vor.u32 %v6706_v39, %v5012_v44  ;;  %v4948_v30 = vld [vmem:[#allocation5 + $0x350] sm:$0xf0] }
 0x10f   :  { %v4562_v55 = vld [vmem:[#allocation5 + $0x10] sm:$0xf]  ;;  %v5203_v48 = vor.u32 %v6762_v32, %v5202_v20  ;;  %v4951_v11 = vor.u32 %v6690_v3, %v4948_v30  ;;  %v4820_v25 = vld [vmem:[#allocation5 + $0x250] sm:$0xf0] }
 0x110   :  { %3880 = vmatpush.bf16.msra.mxu3 %v6355_v5  ;;  %3842 = vmatpush.bf16.msra.mxu0 %v4755_v12  ;;  %v6602_v36 = vld [vmem:[#allocation5 + $0x4c] sm:$0xf0]  ;;  %v5975_v12 = vor.u32 %v6946_v58, %v5972_v6  ;;  %v6914_v54 = vld [vmem:[#allocation5 + $0xa14] sm:$0xf] }
 0x111   :  { %v5586_v37 = vld [vmem:[#allocation5 + $0x810] sm:$0xf]  ;;  %v4563_v52 = vor.u32 %v6602_v36, %v4562_v55  ;;  %v5844_v4 = vld [vmem:[#allocation5 + $0xa50] sm:$0xf0] }
 0x112   :  { %3853 = vmatpush.bf16.msra.mxu1 %v5395_v35  ;;  %3868 = vmatpush.bf16.msra.mxu2 %v5779_v40  ;;  %v6858_v43 = vld [vmem:[#allocation5 + $0x84c] sm:$0xf0]  ;;  %v6834_v35 = vld [vmem:[#allocation5 + $0x794] sm:$0xf]  ;;  %v6487_v40 = vor.u32 %v7074_v34, %v6484_v59 }
 0x113   :  { %v6098_v21 = vld [vmem:[#allocation5 + $0xc10] sm:$0xf]  ;;  %v5587_v53 = vor.u32 %v6858_v43, %v5586_v37  ;;  %v7042_v9 = vld [vmem:[#allocation5 + $0xe14] sm:$0xf] }
 0x114   :  { %3881 = vmatpush.bf16.msra.mxu3 %v6291_v14  ;;  %3843 = vmatpush.bf16.msra.mxu0 %v4691_v19  ;;  %v6986_v22 = vld [vmem:[#allocation5 + $0xc4c] sm:$0xf0]  ;;  %v4884_v14 = vld [vmem:[#allocation5 + $0x2d0] sm:$0xf0] }
 0x115   :  { %v5138_v51 = vld [vmem:[#allocation5 + $0x490] sm:$0xf]  ;;  %v6099_v28 = vor.u32 %v6986_v22, %v6098_v21  ;;  %v4887_v19 = vor.u32 %v6674_v61, %v4884_v14  ;;  %v6356_v10 = vld [vmem:[#allocation5 + $0xe50] sm:$0xf0] }
 0x116   :  { %3854 = vmatpush.bf16.msra.mxu1 %v5331_v63  ;;  %3869 = vmatpush.bf16.msra.mxu2 %v5715_v47  ;;  %v6746_v27 = vld [vmem:[#allocation5 + $0x4cc] sm:$0xf0]  ;;  %v5527_v63 = vor.u32 %v6834_v35, %v5524_v60  ;;  %v5911_v47 = vor.u32 %v6930_v41, %v5908_v15  ;;  %v6802_v20 = vld [vmem:[#allocation5 + $0x694] sm:$0xf]  ;;  %v6359_v55 = vor.u32 %v7042_v9, %v6356_v10  ;;  %v6971_v9 = vld [vmem:[#allocation5 + $0xbd4] sm:$0xf0] }
 0x117   :  { %v5139_v5 = vor.u32 %v6746_v27, %v5138_v51  ;;  %v5074_v7 = vld [vmem:[#allocation5 + $0x410] sm:$0xf]  ;;  %v5396_v32 = vld [vmem:[#allocation5 + $0x6d0] sm:$0xf0] }
 0x118   :  { %3882 = vmatpush.bf16.msra.mxu3 %v6227_v24  ;;  %3844 = vmatpush.bf16.msra.mxu0 %v4627_v26  ;;  %v6730_v8 = vld [vmem:[#allocation5 + $0x44c] sm:$0xf0]  ;;  %v6658_v24 = vld [vmem:[#allocation5 + $0x214] sm:$0xf]  ;;  %v5399_v39 = vor.u32 %v6802_v20, %v5396_v32  ;;  %v6554_v20 = vld [vmem:[#allocation5 + $0xf98] sm:$0xf] }
 0x119   :  { %v5075_v62 = vor.u32 %v6730_v8, %v5074_v7  ;;  %v4823_v26 = vor.u32 %v6658_v24, %v4820_v25  ;;  %v6642_v36 = vld [vmem:[#allocation5 + $0x194] sm:$0xf]  ;;  %v7099_v32 = vld [vmem:[#allocation5 + $0xfd4] sm:$0xf0] }
 0x11a   :  { %3855 = vmatpush.bf16.msra.mxu1 %v5267_v16  ;;  %3870 = vmatpush.bf16.msra.mxu2 %v5651_v31  ;;  %v5463_v16 = vor.u32 %v6818_v0, %v5460_v18  ;;  %v5847_v31 = vor.u32 %v6914_v54, %v5844_v4  ;;  %v4756_v37 = vld [vmem:[#allocation5 + $0x1d0] sm:$0xf0]  ;;  %v6715_v54 = vld [vmem:[#allocation5 + $0x3d4] sm:$0xf0] }
 0x11b   :  { %v5780_v43 = vld [vmem:[#allocation5 + $0x9d0] sm:$0xf0]  ;;  %v6042_v4 = vld [vmem:[#allocation5 + $0xb98] sm:$0xf] }
 0x11c   :  { %3883 = vmatpush.bf16.msra.mxu3 %v6163_v38  ;;  %3845 = vmatpush.bf16.msra.mxu0 %v4563_v52  ;;  %v6898_v38 = vld [vmem:[#allocation5 + $0x994] sm:$0xf]  ;;  %v7479_v52 = vpop.f32.mrf.mxu2 }
 0x11d   :  { %v7026_v21 = vld [vmem:[#allocation5 + $0xd94] sm:$0xf]  ;;  %v5783_v46 = vor.u32 %v6898_v38, %v5780_v43  ;;  %v4954_v38 = vld [vmem:[#allocation5 + $0x318] sm:$0xf] }
 0x11e   :  { %3856 = vmatpush.bf16.msra.mxu1 %v5203_v48  ;;  %3871 = vmatpush.bf16.msra.mxu2 %v5587_v53  ;;  %v6292_v22 = vld [vmem:[#allocation5 + $0xdd0] sm:$0xf0]  ;;  %v4759_v48 = vor.u32 %v6642_v36, %v4756_v37  ;;  %v6043_v37 = vor.u32 %v6971_v9, %v6042_v4 }
 0x11f   :  { %3846 = vmatmul.bf16.vlgmr.msra.gmra.mxu0 %v7450_v23  ;;  %v6786_v44 = vld [vmem:[#allocation5 + $0x614] sm:$0xf]  ;;  %v6295_v49 = vor.u32 %v7026_v21, %v6292_v22  ;;  %v6555_v21 = vor.u32 %v7099_v32, %v6554_v20  ;;  %v6699_v22 = vld [vmem:[#allocation5 + $0x354] sm:$0xf0] }
 0x120   :  { %3884 = vmatpush.bf16.msra.mxu3 %v6099_v28  ;;  %3890 = vmatpush.bf16.msrb.mxu0 %v5015_v56  ;;  %v5332_v45 = vld [vmem:[#allocation5 + $0x650] sm:$0xf0]  ;;  %v5338_v32 = vld [vmem:[#allocation5 + $0x618] sm:$0xf] }
 0x121   :  { %3872 = vmatmul.bf16.vlgmr.msra.gmra.mxu2 %v7430_v13  ;;  %v6626_v50 = vld [vmem:[#allocation5 + $0x114] sm:$0xf] }
 0x122   :  { %3916 = vmatpush.bf16.msrb.mxu2 %v6039_v57  ;;  %3857 = vmatpush.bf16.msra.mxu1 %v5139_v5  ;;  %v4692_v51 = vld [vmem:[#allocation5 + $0x150] sm:$0xf0]  ;;  %v7481_v57 = vpop.f32.mrf.mxu3 }
 0x123   :  { %3885 = vmatmul.bf16.vlgmr.msra.gmra.mxu3 %v7440_v29  ;;  %v6882_v27 = vld [vmem:[#allocation5 + $0x914] sm:$0xf]  ;;  %v4695_v58 = vor.u32 %v6626_v50, %v4692_v51  ;;  %v6843_v50 = vld [vmem:[#allocation5 + $0x7d4] sm:$0xf0] }
 0x124   :  { %3929 = vmatpush.bf16.msrb.mxu3 %v6551_v2  ;;  %3891 = vmatpush.bf16.msrb.mxu0 %v4951_v11  ;;  %v5716_v53 = vld [vmem:[#allocation5 + $0x950] sm:$0xf0]  ;;  %v5335_v2 = vor.u32 %v6786_v44, %v5332_v45  ;;  %v3667_v0 = vpop.f32.mrf.mxu2  ;;  %v6955_v44 = vld [vmem:[#allocation5 + $0xb54] sm:$0xf0] }
 0x125   :  { %v7010_v28 = vld [vmem:[#allocation5 + $0xd14] sm:$0xf]  ;;  %v5719_v5 = vor.u32 %v6882_v27, %v5716_v53  ;;  %v4955_v27 = vor.u32 %v6699_v22, %v4954_v38  ;;  %v6811_v0 = vld [vmem:[#allocation5 + $0x6d4] sm:$0xf0] }
 0x126   :  { %3917 = vmatpush.bf16.msrb.mxu2 %v5975_v12  ;;  %3858 = vmatpush.bf16.msra.mxu1 %v5075_v62  ;;  %v6228_v56 = vld [vmem:[#allocation5 + $0xd50] sm:$0xf0]  ;;  %v6635_v38 = vld [vmem:[#allocation5 + $0x154] sm:$0xf0] }
 0x127   :  { %v6770_v3 = vld [vmem:[#allocation5 + $0x594] sm:$0xf]  ;;  %v6231_v6 = vor.u32 %v7010_v28, %v6228_v56  ;;  %v4890_v28 = vld [vmem:[#allocation5 + $0x298] sm:$0xf] }
 0x128   :  { %3930 = vmatpush.bf16.msrb.mxu3 %v6487_v40  ;;  %3892 = vmatpush.bf16.msrb.mxu0 %v4887_v19  ;;  %v5268_v30 = vld [vmem:[#allocation5 + $0x5d0] sm:$0xf0] }
 0x129   :  { %3859 = vmatmul.bf16.vlgmr.msra.gmra.mxu1 %v7463_v33  ;;  %v6610_v34 = vld [vmem:[#allocation5 + $0x94] sm:$0xf]  ;;  %v5271_v11 = vor.u32 %v6770_v3, %v5268_v30  ;;  %v6683_v3 = vld [vmem:[#allocation5 + $0x2d4] sm:$0xf0] }
 0x12a   :  { %3903 = vmatpush.bf16.msrb.mxu1 %v5527_v63  ;;  %3918 = vmatpush.bf16.msrb.mxu2 %v5911_v47  ;;  %v4628_v59 = vld [vmem:[#allocation5 + $0xd0] sm:$0xf0]  ;;  %v7483_v63 = vpop.f32.mrf.mxu0  ;;  %v3680_v24 = vpop.f32.mrf.mxu3  ;;  %v5914_v30 = vld [vmem:[#allocation5 + $0xa98] sm:$0xf] }
 0x12b   :  { %v6866_v7 = vld [vmem:[#allocation5 + $0x894] sm:$0xf]  ;;  %v4631_v61 = vor.u32 %v6610_v34, %v4628_v59  ;;  %v7067_v34 = vld [vmem:[#allocation5 + $0xed4] sm:$0xf0] }
 0x12c   :  { %3931 = vmatpush.bf16.msrb.mxu3 %v6423_v1  ;;  %3893 = vmatpush.bf16.msrb.mxu0 %v4823_v26  ;;  %v5652_v8 = vld [vmem:[#allocation5 + $0x8d0] sm:$0xf0]  ;;  %v5018_v1 = vld [vmem:[#allocation5 + $0x398] sm:$0xf] }
 0x12d   :  { %v6994_v35 = vld [vmem:[#allocation5 + $0xc94] sm:$0xf]  ;;  %v5655_v41 = vor.u32 %v6866_v7, %v5652_v8  ;;  %v5019_v36 = vor.u32 %v6715_v54, %v5018_v1  ;;  %v5466_v59 = vld [vmem:[#allocation5 + $0x718] sm:$0xf]  ;;  %v7488_v8 = vld [vmem:[#allocation7] sm:$0xff] }
 0x12e   :  { %3904 = vmatpush.bf16.msrb.mxu1 %v5463_v16  ;;  %3919 = vmatpush.bf16.msrb.mxu2 %v5847_v31  ;;  %v6164_v60 = vld [vmem:[#allocation5 + $0xcd0] sm:$0xf0]  ;;  %v6827_v7 = vld [vmem:[#allocation5 + $0x754] sm:$0xf0] }
 0x12f   :  { %v6754_v12 = vld [vmem:[#allocation5 + $0x514] sm:$0xf]  ;;  %v6167_v62 = vor.u32 %v6994_v35, %v6164_v60  ;;  %v4891_v35 = vor.u32 %v6683_v3, %v4890_v28  ;;  %v6651_v24 = vld [vmem:[#allocation5 + $0x1d4] sm:$0xf0] }
 0x130   :  { %3932 = vmatpush.bf16.msrb.mxu3 %v6359_v55  ;;  %3894 = vmatpush.bf16.msrb.mxu0 %v4759_v48  ;;  %v5204_v40 = vld [vmem:[#allocation5 + $0x550] sm:$0xf0]  ;;  %v6490_v48 = vld [vmem:[#allocation5 + $0xf18] sm:$0xf] }
 0x131   :  { %v6594_v14 = vld [vmem:[#allocation5 + $0x14] sm:$0xf]  ;;  %v5207_v25 = vor.u32 %v6754_v12, %v5204_v40  ;;  %v6667_v40 = vld [vmem:[#allocation5 + $0x254] sm:$0xf0] }
 0x132   :  { %3905 = vmatpush.bf16.msrb.mxu1 %v5399_v39  ;;  %3920 = vmatpush.bf16.msrb.mxu2 %v5783_v46  ;;  %v4564_v15 = vld [vmem:[#allocation5 + $0x50] sm:$0xf0]  ;;  %v5978_v39 = vld [vmem:[#allocation5 + $0xb18] sm:$0xf]  ;;  %v3641_v51 = vpop.f32.mrf.mxu0 }
 0x133   :  { %v6850_v17 = vld [vmem:[#allocation5 + $0x814] sm:$0xf]  ;;  %v4567_v16 = vor.u32 %v6594_v14, %v4564_v15  ;;  %v7083_v46 = vld [vmem:[#allocation5 + $0xf54] sm:$0xf0]  ;;  %v5979_v53 = vor.u32 %v6955_v44, %v5978_v39 }
 0x134   :  { %3933 = vmatpush.bf16.msrb.mxu3 %v6295_v49  ;;  %3895 = vmatpush.bf16.msrb.mxu0 %v4695_v58  ;;  %v5588_v42 = vld [vmem:[#allocation5 + $0x850] sm:$0xf0]  ;;  %v5530_v49 = vld [vmem:[#allocation5 + $0x798] sm:$0xf] }
 0x135   :  { %v6738_v18 = vld [vmem:[#allocation5 + $0x494] sm:$0xf]  ;;  %v5591_v26 = vor.u32 %v6850_v17, %v5588_v42  ;;  %v6939_v58 = vld [vmem:[#allocation5 + $0xad4] sm:$0xf0]  ;;  %v931_v17 = vperm.slane %v7488_v8, 0  ;;  %v3652_v22 = vpop.f32.mrf.mxu1 }
 0x136   :  { %3906 = vmatpush.bf16.msrb.mxu1 %v5335_v2  ;;  %3921 = vmatpush.bf16.msrb.mxu2 %v5719_v5  ;;  %v6978_v19 = vld [vmem:[#allocation5 + $0xc14] sm:$0xf]  ;;  %v6491_v2 = vor.u32 %v7083_v46, %v6490_v48  ;;  %v5531_v5 = vor.u32 %v6843_v50, %v5530_v49  ;;  %v5915_v60 = vor.u32 %v6939_v58, %v5914_v30  ;;  %v6923_v14 = vld [vmem:[#allocation5 + $0xa54] sm:$0xf0]  ;;  %v7495_v48 = vpop.f32.mrf.mxu2  ;;  %v7497_v50 = vpop.f32.mrf.mxu3 }
 0x137   :  { %v6100_v47 = vld [vmem:[#allocation5 + $0xc50] sm:$0xf0]  ;;  %v7051_v15 = vld [vmem:[#allocation5 + $0xe54] sm:$0xf0]  ;;  %v3640_v20 = vadd.f32 %v7483_v63, %v931_v17 }
 0x138   :  { %3934 = vmatpush.bf16.msrb.mxu3 %v6231_v6  ;;  %3896 = vmatpush.bf16.msrb.mxu0 %v4631_v61  ;;  %v5140_v10 = vld [vmem:[#allocation5 + $0x4d0] sm:$0xf0]  ;;  %v6103_v31 = vor.u32 %v6978_v19, %v6100_v47  ;;  %v6426_v6 = vld [vmem:[#allocation5 + $0xe98] sm:$0xf] }
 0x139   :  { %v6722_v55 = vld [vmem:[#allocation5 + $0x414] sm:$0xf]  ;;  %v5143_v43 = vor.u32 %v6738_v18, %v5140_v10  ;;  %v6427_v12 = vor.u32 %v7067_v34, %v6426_v6  ;;  %v5850_v61 = vld [vmem:[#allocation5 + $0xa18] sm:$0xf]  ;;  %v3653_v63 = vadd.f32 %v3652_v22, %v3640_v20  ;;  %v6556_v20 = vld [vmem:[#allocation5 + $0xfd8] sm:$0xf0] }
 0x13a   :  { %3907 = vmatpush.bf16.msrb.mxu1 %v5271_v11  ;;  %3922 = vmatpush.bf16.msrb.mxu2 %v5655_v41  ;;  %v5076_v45 = vld [vmem:[#allocation5 + $0x450] sm:$0xf0]  ;;  %v4826_v11 = vld [vmem:[#allocation5 + $0x218] sm:$0xf]  ;;  %v5467_v41 = vor.u32 %v6827_v7, %v5466_v59  ;;  %v5851_v19 = vor.u32 %v6923_v14, %v5850_v61  ;;  %v7492_v4 = vpop.f32.mrf.mxu0 }
 0x13b   :  { %v5079_v56 = vor.u32 %v6722_v55, %v5076_v45  ;;  %v5402_v42 = vld [vmem:[#allocation5 + $0x698] sm:$0xf]  ;;  %v4827_v18 = vor.u32 %v6667_v40, %v4826_v11  ;;  %v3666_v28 = vadd.f32 %v7479_v52, %v3653_v63  ;;  %v5532_v63 = vld [vmem:[#allocation5 + $0x7d8] sm:$0xf0] }
 0x13c   :  { %3935 = vmatpush.bf16.msrb.mxu3 %v6167_v62  ;;  %3897 = vmatpush.bf16.msrb.mxu0 %v4567_v16  ;;  %v6362_v62 = vld [vmem:[#allocation5 + $0xe18] sm:$0xf]  ;;  %v5403_v9 = vor.u32 %v6811_v0, %v5402_v42 }
 0x13d   :  { %v4762_v47 = vld [vmem:[#allocation5 + $0x198] sm:$0xf]  ;;  %v6363_v1 = vor.u32 %v7051_v15, %v6362_v62  ;;  %v3679_v59 = vadd.f32 %v7481_v57, %v3666_v28  ;;  %v3654_v42 = vpop.f32.mrf.mxu1 }
 0x13e   :  { %3908 = vmatpush.bf16.msrb.mxu1 %v5207_v25  ;;  %3923 = vmatpush.bf16.msrb.mxu2 %v5591_v26  ;;  %v5786_v25 = vld [vmem:[#allocation5 + $0x998] sm:$0xf]  ;;  %v7043_v42 = vld [vmem:[#allocation5 + $0xe1c] sm:$0xf] }
 0x13f   :  { %3898 = vmatmul.bf16.vlgmr.msrb.gmra.mxu0 %v7450_v23  ;;  %v6907_v54 = vld [vmem:[#allocation5 + $0x9d4] sm:$0xf0]  ;;  %4462 = vst [vmem:[#allocation8] sm:$0xff] %v3679_v59  ;;  %v4478_v61 = vmax.f32 %v3679_v59, 0.0  ;;  %v7059_v59 = vld [vmem:[#allocation5 + $0xe9c] sm:$0xf] }
 0x140   :  { %3936 = vmatpush.bf16.msrb.mxu3 %v6103_v31  ;;  %3942 = vmatpush.bf16.msra.mxu0 %v5019_v36  ;;  %v6298_v10 = vld [vmem:[#allocation5 + $0xd98] sm:$0xf]  ;;  %v4763_v31 = vor.u32 %v6651_v24, %v4762_v47  ;;  %v5787_v55 = vor.u32 %v6907_v54, %v5786_v25  ;;  %v3719_v47 = vpop.f32.mrf.mxu2  ;;  %v6044_v24 = vld [vmem:[#allocation5 + $0xbd8] sm:$0xf0]  ;;  %v932_v25 = vperm.slane %v7488_v8, 1  ;;  %v3732_v54 = vpop.f32.mrf.mxu3 }
 0x141   :  { %3924 = vmatmul.bf16.vlgmr.msrb.gmra.mxu2 %v7430_v13  ;;  %v7035_v16 = vld [vmem:[#allocation5 + $0xdd4] sm:$0xf0]  ;;  %4494 = vst [vmem:[#allocation9] sm:$0xff] %v4478_v61 }
 0x142   :  { %3968 = vmatpush.bf16.msra.mxu2 %v6043_v37  ;;  %3909 = vmatpush.bf16.msrb.mxu1 %v5143_v43  ;;  %v6795_v26 = vld [vmem:[#allocation5 + $0x654] sm:$0xf0]  ;;  %v6299_v37 = vor.u32 %v7035_v16, %v6298_v10  ;;  %v3693_v58 = vpop.f32.mrf.mxu0  ;;  %v7091_v16 = vld [vmem:[#allocation5 + $0xf9c] sm:$0xf] }
 0x143   :  { %3937 = vmatmul.bf16.vlgmr.msrb.gmra.mxu3 %v7440_v29  ;;  %v4698_v36 = vld [vmem:[#allocation5 + $0x118] sm:$0xf]  ;;  %v5339_v39 = vor.u32 %v6795_v26, %v5338_v32  ;;  %v6559_v22 = vor.u32 %v7091_v16, %v6556_v20  ;;  %v933_v16 = vperm.slane %v7488_v8, 2  ;;  %v5340_v20 = vld [vmem:[#allocation5 + $0x658] sm:$0xf0] }
 0x144   :  { %3981 = vmatpush.bf16.msra.mxu3 %v6555_v21  ;;  %3943 = vmatpush.bf16.msra.mxu0 %v4955_v27  ;;  %v5722_v43 = vld [vmem:[#allocation5 + $0x918] sm:$0xf]  ;;  %v4699_v51 = vor.u32 %v6635_v38, %v4698_v36  ;;  %v6691_v38 = vld [vmem:[#allocation5 + $0x31c] sm:$0xf] }
 0x145   :  { %v6891_v21 = vld [vmem:[#allocation5 + $0x954] sm:$0xf0]  ;;  %v3704_v28 = vpop.f32.mrf.mxu1 }
 0x146   :  { %3969 = vmatpush.bf16.msra.mxu2 %v5979_v53  ;;  %3910 = vmatpush.bf16.msrb.mxu1 %v5079_v56  ;;  %v6234_v44 = vld [vmem:[#allocation5 + $0xd18] sm:$0xf]  ;;  %v5723_v27 = vor.u32 %v6891_v21, %v5722_v43  ;;  %v4956_v43 = vld [vmem:[#allocation5 + $0x358] sm:$0xf0] }
 0x147   :  { %v7019_v45 = vld [vmem:[#allocation5 + $0xd54] sm:$0xf0]  ;;  %v6835_v21 = vld [vmem:[#allocation5 + $0x79c] sm:$0xf] }
 0x148   :  { %3982 = vmatpush.bf16.msra.mxu3 %v6491_v2  ;;  %3944 = vmatpush.bf16.msra.mxu0 %v4891_v35  ;;  %v5274_v46 = vld [vmem:[#allocation5 + $0x598] sm:$0xf]  ;;  %v6235_v56 = vor.u32 %v7019_v45, %v6234_v44  ;;  %v6947_v44 = vld [vmem:[#allocation5 + $0xb1c] sm:$0xf] }
 0x149   :  { %3911 = vmatmul.bf16.vlgmr.msrb.gmra.mxu1 %v7463_v33  ;;  %v6779_v49 = vld [vmem:[#allocation5 + $0x5d4] sm:$0xf0]  ;;  %v5980_v45 = vld [vmem:[#allocation5 + $0xb58] sm:$0xf0] }
 0x14a   :  { %3955 = vmatpush.bf16.msra.mxu1 %v5531_v5  ;;  %3970 = vmatpush.bf16.msra.mxu2 %v5915_v60  ;;  %v4634_v53 = vld [vmem:[#allocation5 + $0x98] sm:$0xf]  ;;  %v5275_v5 = vor.u32 %v6779_v49, %v5274_v46  ;;  %v7075_v46 = vld [vmem:[#allocation5 + $0xf1c] sm:$0xf] }
 0x14b   :  { %v6619_v2 = vld [vmem:[#allocation5 + $0xd4] sm:$0xf0]  ;;  %v6492_v49 = vld [vmem:[#allocation5 + $0xf58] sm:$0xf0] }
 0x14c   :  { %3983 = vmatpush.bf16.msra.mxu3 %v6427_v12  ;;  %3945 = vmatpush.bf16.msra.mxu0 %v4827_v18  ;;  %v5658_v3 = vld [vmem:[#allocation5 + $0x898] sm:$0xf]  ;;  %v4635_v60 = vor.u32 %v6619_v2, %v4634_v53  ;;  %v6707_v18 = vld [vmem:[#allocation5 + $0x39c] sm:$0xf]  ;;  %v5983_v53 = vor.u32 %v6947_v44, %v5980_v45 }
 0x14d   :  { %v6875_v30 = vld [vmem:[#allocation5 + $0x8d4] sm:$0xf0]  ;;  %v4892_v2 = vld [vmem:[#allocation5 + $0x2d8] sm:$0xf0]  ;;  %v3706_v47 = vpop.f32.mrf.mxu1 }
 0x14e   :  { %3956 = vmatpush.bf16.msra.mxu1 %v5467_v41  ;;  %3971 = vmatpush.bf16.msra.mxu2 %v5851_v19  ;;  %v6170_v6 = vld [vmem:[#allocation5 + $0xc98] sm:$0xf]  ;;  %v5659_v11 = vor.u32 %v6875_v30, %v5658_v3  ;;  %v5020_v19 = vld [vmem:[#allocation5 + $0x3d8] sm:$0xf0]  ;;  %v5535_v3 = vor.u32 %v6835_v21, %v5532_v63  ;;  %v6495_v30 = vor.u32 %v7075_v46, %v6492_v49  ;;  %v6972_v47 = vld [vmem:[#allocation5 + $0xbdc] sm:$0xf0] }
 0x14f   :  { %v7003_v34 = vld [vmem:[#allocation5 + $0xcd4] sm:$0xf0]  ;;  %v5276_v45 = vld [vmem:[#allocation5 + $0x5d8] sm:$0xf0] }
 0x150   :  { %3984 = vmatpush.bf16.msra.mxu3 %v6363_v1  ;;  %3946 = vmatpush.bf16.msra.mxu0 %v4763_v31  ;;  %v5210_v7 = vld [vmem:[#allocation5 + $0x518] sm:$0xf]  ;;  %v6171_v62 = vor.u32 %v7003_v34, %v6170_v6  ;;  %v6963_v1 = vld [vmem:[#allocation5 + $0xb9c] sm:$0xf]  ;;  %v5023_v31 = vor.u32 %v6707_v18, %v5020_v19 }
 0x151   :  { %v6763_v35 = vld [vmem:[#allocation5 + $0x554] sm:$0xf0]  ;;  %v5916_v6 = vld [vmem:[#allocation5 + $0xad8] sm:$0xf0] }
 0x152   :  { %3957 = vmatpush.bf16.msra.mxu1 %v5403_v9  ;;  %3972 = vmatpush.bf16.msra.mxu2 %v5787_v55  ;;  %v4570_v12 = vld [vmem:[#allocation5 + $0x18] sm:$0xf]  ;;  %v5211_v57 = vor.u32 %v6763_v35, %v5210_v7  ;;  %v5468_v34 = vld [vmem:[#allocation5 + $0x758] sm:$0xf0] }
 0x153   :  { %v6603_v52 = vld [vmem:[#allocation5 + $0x54] sm:$0xf0]  ;;  %v6428_v7 = vld [vmem:[#allocation5 + $0xed8] sm:$0xf0] }
 0x154   :  { %3985 = vmatpush.bf16.msra.mxu3 %v6299_v37  ;;  %3947 = vmatpush.bf16.msra.mxu0 %v4699_v51  ;;  %v5594_v40 = vld [vmem:[#allocation5 + $0x818] sm:$0xf]  ;;  %v4571_v9 = vor.u32 %v6603_v52, %v4570_v12  ;;  %v6047_v37 = vor.u32 %v6963_v1, %v6044_v24  ;;  %v4959_v51 = vor.u32 %v6691_v38, %v4956_v43  ;;  %v6659_v12 = vld [vmem:[#allocation5 + $0x21c] sm:$0xf] }
 0x155   :  { %v5146_v14 = vld [vmem:[#allocation5 + $0x498] sm:$0xf]  ;;  %v4828_v52 = vld [vmem:[#allocation5 + $0x258] sm:$0xf0] }
 0x156   :  { %3958 = vmatpush.bf16.msra.mxu1 %v5339_v39  ;;  %3973 = vmatpush.bf16.msra.mxu2 %v5723_v27  ;;  %v6747_v41 = vld [vmem:[#allocation5 + $0x4d4] sm:$0xf0]  ;;  %v3692_v39 = vadd.f32 %v7492_v4, %v932_v25  ;;  %v6819_v4 = vld [vmem:[#allocation5 + $0x71c] sm:$0xf] }
 0x157   :  { %v6859_v15 = vld [vmem:[#allocation5 + $0x854] sm:$0xf0]  ;;  %v5147_v55 = vor.u32 %v6747_v41, %v5146_v14  ;;  %v6803_v14 = vld [vmem:[#allocation5 + $0x69c] sm:$0xf]  ;;  %v6431_v41 = vor.u32 %v7059_v59, %v6428_v7 }
 0x158   :  { %3986 = vmatpush.bf16.msra.mxu3 %v6235_v56  ;;  %v6106_v17 = vld [vmem:[#allocation5 + $0xc18] sm:$0xf]  ;;  %3948 = vmatpush.bf16.msra.mxu0 %v4635_v60  ;;  %v5595_v10 = vor.u32 %v6859_v15, %v5594_v40  ;;  %v6675_v56 = vld [vmem:[#allocation5 + $0x29c] sm:$0xf]  ;;  %v3705_v58 = vadd.f32 %v3704_v28, %v3692_v39  ;;  %v5471_v40 = vor.u32 %v6819_v4, %v5468_v34 }
 0x159   :  { %v6987_v0 = vld [vmem:[#allocation5 + $0xc54] sm:$0xf0]  ;;  %v4895_v60 = vor.u32 %v6675_v56, %v4892_v2  ;;  %v5852_v15 = vld [vmem:[#allocation5 + $0xa58] sm:$0xf0] }
 0x15a   :  { %3959 = vmatpush.bf16.msra.mxu1 %v5275_v5  ;;  %3974 = vmatpush.bf16.msra.mxu2 %v5659_v11  ;;  %v5082_v32 = vld [vmem:[#allocation5 + $0x418] sm:$0xf]  ;;  %v6107_v26 = vor.u32 %v6987_v0, %v6106_v17  ;;  %v6931_v5 = vld [vmem:[#allocation5 + $0xa9c] sm:$0xf]  ;;  %v3718_v35 = vadd.f32 %v7495_v48, %v3705_v58  ;;  %v4831_v0 = vor.u32 %v6659_v12, %v4828_v52 }
 0x15b   :  { %v6731_v36 = vld [vmem:[#allocation5 + $0x454] sm:$0xf0]  ;;  %v5919_v11 = vor.u32 %v6931_v5, %v5916_v6  ;;  %v5404_v17 = vld [vmem:[#allocation5 + $0x6d8] sm:$0xf0] }
 0x15c   :  { %3987 = vmatpush.bf16.msra.mxu3 %v6171_v62  ;;  %3949 = vmatpush.bf16.msra.mxu0 %v4571_v9  ;;  %v5083_v27 = vor.u32 %v6731_v36, %v5082_v32  ;;  %v3731_v61 = vadd.f32 %v7497_v50, %v3718_v35  ;;  %v6915_v62 = vld [vmem:[#allocation5 + $0xa1c] sm:$0xf]  ;;  %v3743_v50 = vpop.f32.mrf.mxu0  ;;  %v5407_v25 = vor.u32 %v6803_v14, %v5404_v17 }
 0x15d   :  { %v6787_v18 = vld [vmem:[#allocation5 + $0x61c] sm:$0xf]  ;;  %v5855_v19 = vor.u32 %v6915_v62, %v5852_v15  ;;  %v3744_v44 = vadd.f32 %v3743_v50, %v933_v16  ;;  %v6562_v50 = vld [vmem:[#allocation5 + $0xfa0] sm:$0xf] }
 0x15e   :  { %3960 = vmatpush.bf16.msra.mxu1 %v5211_v57  ;;  %3975 = vmatpush.bf16.msra.mxu2 %v5595_v10  ;;  %v6364_v57 = vld [vmem:[#allocation5 + $0xe58] sm:$0xf0]  ;;  %4463 = vst [vmem:[#allocation8 + $0x8] sm:$0xff] %v3731_v61  ;;  %v4479_v48 = vmax.f32 %v3731_v61, 0.0  ;;  %v5343_v38 = vor.u32 %v6787_v18, %v5340_v20 }
 0x15f   :  { %3950 = vmatmul.bf16.vlgmr.msra.gmra.mxu0 %v7450_v23  ;;  %v6643_v1 = vld [vmem:[#allocation5 + $0x19c] sm:$0xf]  ;;  %v6367_v54 = vor.u32 %v7043_v42, %v6364_v57  ;;  %v5026_v57 = vld [vmem:[#allocation5 + $0x3a0] sm:$0xf] }
 0x160   :  { %3988 = vmatpush.bf16.msra.mxu3 %v6107_v26  ;;  %3994 = vmatpush.bf16.msrb.mxu0 %v5023_v31  ;;  %v4764_v24 = vld [vmem:[#allocation5 + $0x1d8] sm:$0xf0]  ;;  %4495 = vst [vmem:[#allocation9 + $0x8] sm:$0xff] %v4479_v48  ;;  %v6716_v48 = vld [vmem:[#allocation5 + $0x3dc] sm:$0xf0] }
 0x161   :  { %3976 = vmatmul.bf16.vlgmr.msra.gmra.mxu2 %v7430_v13  ;;  %v6899_v9 = vld [vmem:[#allocation5 + $0x99c] sm:$0xf]  ;;  %v4767_v31 = vor.u32 %v6643_v1, %v4764_v24  ;;  %v5027_v16 = vor.u32 %v6716_v48, %v5026_v57  ;;  %v5346_v57 = vld [vmem:[#allocation5 + $0x620] sm:$0xf] }
 0x162   :  { %3961 = vmatpush.bf16.msra.mxu1 %v5147_v55  ;;  %4020 = vmatpush.bf16.msrb.mxu2 %v6047_v37  ;;  %v5788_v10 = vld [vmem:[#allocation5 + $0x9d8] sm:$0xf0] }
 0x163   :  { %3989 = vmatmul.bf16.vlgmr.msra.gmra.mxu3 %v7440_v29  ;;  %v7027_v32 = vld [vmem:[#allocation5 + $0xd9c] sm:$0xf]  ;;  %v5791_v55 = vor.u32 %v6899_v9, %v5788_v10 }
 0x164   :  { %4033 = vmatpush.bf16.msrb.mxu3 %v6559_v22  ;;  %3995 = vmatpush.bf16.msrb.mxu0 %v4959_v51  ;;  %v6300_v26 = vld [vmem:[#allocation5 + $0xdd8] sm:$0xf0]  ;;  %v3769_v49 = vpop.f32.mrf.mxu2 }
 0x165   :  { %v6627_v36 = vld [vmem:[#allocation5 + $0x11c] sm:$0xf]  ;;  %v6303_v21 = vor.u32 %v7027_v32, %v6300_v26 }
 0x166   :  { %3962 = vmatpush.bf16.msra.mxu1 %v5083_v27  ;;  %4021 = vmatpush.bf16.msrb.mxu2 %v5983_v53  ;;  %v4700_v37 = vld [vmem:[#allocation5 + $0x158] sm:$0xf0]  ;;  %v3782_v27 = vpop.f32.mrf.mxu3  ;;  %v3756_v2 = vpop.f32.mrf.mxu1 }
 0x167   :  { %v6771_v43 = vld [vmem:[#allocation5 + $0x59c] sm:$0xf]  ;;  %v4703_v51 = vor.u32 %v6627_v36, %v4700_v37  ;;  %v3757_v34 = vadd.f32 %v3756_v2, %v3744_v44  ;;  %v6956_v44 = vld [vmem:[#allocation5 + $0xb5c] sm:$0xf0] }
 0x168   :  { %4034 = vmatpush.bf16.msrb.mxu3 %v6495_v30  ;;  %3996 = vmatpush.bf16.msrb.mxu0 %v4895_v60  ;;  %v6883_v22 = vld [vmem:[#allocation5 + $0x91c] sm:$0xf]  ;;  %v5279_v4 = vor.u32 %v6771_v43, %v5276_v45  ;;  %v6828_v2 = vld [vmem:[#allocation5 + $0x75c] sm:$0xf0] }
 0x169   :  { %3963 = vmatmul.bf16.vlgmr.msra.gmra.mxu1 %v7463_v33  ;;  %v5724_v39 = vld [vmem:[#allocation5 + $0x958] sm:$0xf0]  ;;  %v3770_v12 = vadd.f32 %v3769_v49, %v3757_v34  ;;  %v4834_v34 = vld [vmem:[#allocation5 + $0x220] sm:$0xf] }
 0x16a   :  { %4007 = vmatpush.bf16.msrb.mxu1 %v5535_v3  ;;  %4022 = vmatpush.bf16.msrb.mxu2 %v5919_v11  ;;  %v7011_v63 = vld [vmem:[#allocation5 + $0xd1c] sm:$0xf]  ;;  %v5727_v53 = vor.u32 %v6883_v22, %v5724_v39  ;;  %v3745_v3 = vpop.f32.mrf.mxu0  ;;  %v6844_v22 = vld [vmem:[#allocation5 + $0x7dc] sm:$0xf0] }
 0x16b   :  { %v6236_v46 = vld [vmem:[#allocation5 + $0xd58] sm:$0xf0]  ;;  %v5986_v39 = vld [vmem:[#allocation5 + $0xb20] sm:$0xf] }
 0x16c   :  { %4035 = vmatpush.bf16.msrb.mxu3 %v6431_v41  ;;  %3997 = vmatpush.bf16.msrb.mxu0 %v4831_v0  ;;  %v6611_v28 = vld [vmem:[#allocation5 + $0x9c] sm:$0xf]  ;;  %v6239_v58 = vor.u32 %v7011_v63, %v6236_v46  ;;  %v3783_v0 = vadd.f32 %v3782_v27, %v3770_v12  ;;  %v3771_v1 = vpop.f32.mrf.mxu2  ;;  %v6498_v63 = vld [vmem:[#allocation5 + $0xf20] sm:$0xf] }
 0x16d   :  { %v4636_v56 = vld [vmem:[#allocation5 + $0xd8] sm:$0xf0]  ;;  %v7084_v46 = vld [vmem:[#allocation5 + $0xf5c] sm:$0xf0] }
 0x16e   :  { %4008 = vmatpush.bf16.msrb.mxu1 %v5471_v40  ;;  %4023 = vmatpush.bf16.msrb.mxu2 %v5855_v19  ;;  %v6755_v30 = vld [vmem:[#allocation5 + $0x51c] sm:$0xf]  ;;  %v4639_v60 = vor.u32 %v6611_v28, %v4636_v56  ;;  %v6050_v19 = vld [vmem:[#allocation5 + $0xba0] sm:$0xf]  ;;  %4464 = vst [vmem:[#allocation8 + $0x10] sm:$0xff] %v3783_v0  ;;  %v3784_v9 = vpop.f32.mrf.mxu3  ;;  %v3758_v20 = vpop.f32.mrf.mxu1  ;;  %v5987_v56 = vor.u32 %v6956_v44, %v5986_v39 }
 0x16f   :  { %v6867_v5 = vld [vmem:[#allocation5 + $0x89c] sm:$0xf]  ;;  %v6051_v43 = vor.u32 %v6972_v47, %v6050_v19  ;;  %v6684_v27 = vld [vmem:[#allocation5 + $0x2dc] sm:$0xf0]  ;;  %v6499_v3 = vor.u32 %v7084_v46, %v6498_v63 }
 0x170   :  { %4036 = vmatpush.bf16.msrb.mxu3 %v6367_v54  ;;  %3998 = vmatpush.bf16.msrb.mxu0 %v4767_v31  ;;  %v5660_v6 = vld [vmem:[#allocation5 + $0x8d8] sm:$0xf0]  ;;  %v4480_v54 = vmax.f32 %v3783_v0, 0.0  ;;  %v4962_v31 = vld [vmem:[#allocation5 + $0x320] sm:$0xf]  ;;  %v934_v0 = vperm.slane %v7488_v8, 3 }
 0x171   :  { %v5212_v59 = vld [vmem:[#allocation5 + $0x558] sm:$0xf0]  ;;  %v5663_v61 = vor.u32 %v6867_v5, %v5660_v6  ;;  %v5474_v28 = vld [vmem:[#allocation5 + $0x720] sm:$0xf] }
 0x172   :  { %4009 = vmatpush.bf16.msrb.mxu1 %v5407_v25  ;;  %4024 = vmatpush.bf16.msrb.mxu2 %v5791_v55  ;;  %v6995_v7 = vld [vmem:[#allocation5 + $0xc9c] sm:$0xf]  ;;  %v5215_v15 = vor.u32 %v6755_v30, %v5212_v59  ;;  %v7100_v25 = vld [vmem:[#allocation5 + $0xfdc] sm:$0xf0]  ;;  %4496 = vst [vmem:[#allocation9 + $0x10] sm:$0xff] %v4480_v54 }
 0x173   :  { %v6172_v35 = vld [vmem:[#allocation5 + $0xcd8] sm:$0xf0]  ;;  %v6700_v55 = vld [vmem:[#allocation5 + $0x35c] sm:$0xf0] }
 0x174   :  { %4037 = vmatpush.bf16.msrb.mxu3 %v6303_v21  ;;  %3999 = vmatpush.bf16.msrb.mxu0 %v4703_v51  ;;  %v6595_v11 = vld [vmem:[#allocation5 + $0x1c] sm:$0xf]  ;;  %v6175_v17 = vor.u32 %v6995_v7, %v6172_v35  ;;  %v6563_v21 = vor.u32 %v7100_v25, %v6562_v50  ;;  %v4963_v45 = vor.u32 %v6700_v55, %v4962_v31  ;;  %v4898_v51 = vld [vmem:[#allocation5 + $0x2a0] sm:$0xf] }
 0x175   :  { %v6739_v52 = vld [vmem:[#allocation5 + $0x49c] sm:$0xf]  ;;  %v6940_v30 = vld [vmem:[#allocation5 + $0xadc] sm:$0xf0]  ;;  %v5475_v7 = vor.u32 %v6828_v2, %v5474_v28 }
 0x176   :  { %4010 = vmatpush.bf16.msrb.mxu1 %v5343_v38  ;;  %4025 = vmatpush.bf16.msrb.mxu2 %v5727_v53  ;;  %v5148_v40 = vld [vmem:[#allocation5 + $0x4d8] sm:$0xf0]  ;;  %v5538_v38 = vld [vmem:[#allocation5 + $0x7a0] sm:$0xf] }
 0x177   :  { %v4572_v14 = vld [vmem:[#allocation5 + $0x58] sm:$0xf0]  ;;  %v5151_v32 = vor.u32 %v6739_v52, %v5148_v40  ;;  %v5539_v53 = vor.u32 %v6844_v22, %v5538_v38  ;;  %v6434_v5 = vld [vmem:[#allocation5 + $0xea0] sm:$0xf] }
 0x178   :  { %v6851_v41 = vld [vmem:[#allocation5 + $0x81c] sm:$0xf]  ;;  %4038 = vmatpush.bf16.msrb.mxu3 %v6239_v58  ;;  %4000 = vmatpush.bf16.msrb.mxu0 %v4639_v60  ;;  %v4575_v24 = vor.u32 %v6595_v11, %v4572_v14  ;;  %v4899_v58 = vor.u32 %v6684_v27, %v4898_v51  ;;  %v7068_v6 = vld [vmem:[#allocation5 + $0xedc] sm:$0xf0] }
 0x179   :  { %v5596_v62 = vld [vmem:[#allocation5 + $0x858] sm:$0xf0]  ;;  %v6668_v59 = vld [vmem:[#allocation5 + $0x25c] sm:$0xf0]  ;;  %v6435_v12 = vor.u32 %v7068_v6, %v6434_v5 }
 0x17a   :  { %4011 = vmatpush.bf16.msrb.mxu1 %v5279_v4  ;;  %v6979_v42 = vld [vmem:[#allocation5 + $0xc1c] sm:$0xf]  ;;  %4026 = vmatpush.bf16.msrb.mxu2 %v5663_v61  ;;  %v5599_v10 = vor.u32 %v6851_v41, %v5596_v62  ;;  %v5922_v4 = vld [vmem:[#allocation5 + $0xaa0] sm:$0xf]  ;;  %v4835_v61 = vor.u32 %v6668_v59, %v4834_v34 }
 0x17b   :  { %v6108_v18 = vld [vmem:[#allocation5 + $0xc58] sm:$0xf0]  ;;  %v5410_v35 = vld [vmem:[#allocation5 + $0x6a0] sm:$0xf]  ;;  %v5923_v60 = vor.u32 %v6940_v30, %v5922_v4 }
 0x17c   :  { %4039 = vmatpush.bf16.msrb.mxu3 %v6175_v17  ;;  %v6111_v26 = vor.u32 %v6979_v42, %v6108_v18  ;;  %v6723_v36 = vld [vmem:[#allocation5 + $0x41c] sm:$0xf]  ;;  %4001 = vmatpush.bf16.msrb.mxu0 %v4575_v24  ;;  %v6812_v11 = vld [vmem:[#allocation5 + $0x6dc] sm:$0xf0]  ;;  %v3795_v17 = vpop.f32.mrf.mxu0 }
 0x17d   :  { %v5084_v37 = vld [vmem:[#allocation5 + $0x458] sm:$0xf0]  ;;  %v5858_v52 = vld [vmem:[#allocation5 + $0xa20] sm:$0xf]  ;;  %v5411_v42 = vor.u32 %v6812_v11, %v5410_v35  ;;  %v6708_v11 = vld [vmem:[#allocation5 + $0x3a4] sm:$0xf] }
 0x17e   :  { %4012 = vmatpush.bf16.msrb.mxu1 %v5215_v15  ;;  %4027 = vmatpush.bf16.msrb.mxu2 %v5599_v10  ;;  %v5087_v49 = vor.u32 %v6723_v36, %v5084_v37  ;;  %v6924_v40 = vld [vmem:[#allocation5 + $0xa5c] sm:$0xf0] }
 0x17f   :  { %4002 = vmatmul.bf16.vlgmr.msrb.gmra.mxu0 %v7450_v23  ;;  %v6370_v14 = vld [vmem:[#allocation5 + $0xe20] sm:$0xf]  ;;  %v5859_v48 = vor.u32 %v6924_v40, %v5858_v52 }
 0x180   :  { %4046 = vmatpush.bf16.msra.mxu0 %v5027_v16  ;;  %4040 = vmatpush.bf16.msrb.mxu3 %v6111_v26  ;;  %v7052_v41 = vld [vmem:[#allocation5 + $0xe5c] sm:$0xf0] }
 0x181   :  { %4028 = vmatmul.bf16.vlgmr.msrb.gmra.mxu2 %v7430_v13  ;;  %v4770_v62 = vld [vmem:[#allocation5 + $0x1a0] sm:$0xf]  ;;  %v6371_v19 = vor.u32 %v7052_v41, %v6370_v14 }
 0x182   :  { %4013 = vmatpush.bf16.msrb.mxu1 %v5151_v32  ;;  %4072 = vmatpush.bf16.msra.mxu2 %v6051_v43  ;;  %v6652_v15 = vld [vmem:[#allocation5 + $0x1dc] sm:$0xf0]  ;;  %v3796_v32 = vadd.f32 %v3795_v17, %v934_v0  ;;  %v6052_v17 = vld [vmem:[#allocation5 + $0xbe0] sm:$0xf0] }
 0x183   :  { %4041 = vmatmul.bf16.vlgmr.msrb.gmra.mxu3 %v7440_v29  ;;  %v6796_v18 = vld [vmem:[#allocation5 + $0x65c] sm:$0xf0]  ;;  %v4771_v24 = vor.u32 %v6652_v15, %v4770_v62  ;;  %v6964_v15 = vld [vmem:[#allocation5 + $0xba4] sm:$0xf] }
 0x184   :  { %4085 = vmatpush.bf16.msra.mxu3 %v6563_v21  ;;  %4047 = vmatpush.bf16.msra.mxu0 %v4963_v45  ;;  %v5794_v47 = vld [vmem:[#allocation5 + $0x9a0] sm:$0xf]  ;;  %v5347_v10 = vor.u32 %v6796_v18, %v5346_v57  ;;  %v3821_v21 = vpop.f32.mrf.mxu2  ;;  %v3797_v27 = vpop.f32.mrf.mxu0  ;;  %v7092_v0 = vld [vmem:[#allocation5 + $0xfa4] sm:$0xf] }
 0x185   :  { %v6908_v1 = vld [vmem:[#allocation5 + $0x9dc] sm:$0xf0]  ;;  %v6564_v18 = vld [vmem:[#allocation5 + $0xfe0] sm:$0xf0] }
 0x186   :  { %4014 = vmatpush.bf16.msrb.mxu1 %v5087_v49  ;;  %4073 = vmatpush.bf16.msra.mxu2 %v5987_v56  ;;  %v6306_v50 = vld [vmem:[#allocation5 + $0xda0] sm:$0xf]  ;;  %v5795_v20 = vor.u32 %v6908_v1, %v5794_v47  ;;  %v3808_v44 = vpop.f32.mrf.mxu1  ;;  %v3834_v45 = vpop.f32.mrf.mxu3 }
 0x187   :  { %v7036_v25 = vld [vmem:[#allocation5 + $0xddc] sm:$0xf0]  ;;  %v3809_v51 = vadd.f32 %v3808_v44, %v3796_v32  ;;  %v5540_v32 = vld [vmem:[#allocation5 + $0x7e0] sm:$0xf0] }
 0x188   :  { %4086 = vmatpush.bf16.msra.mxu3 %v6499_v3  ;;  %4048 = vmatpush.bf16.msra.mxu0 %v4899_v58  ;;  %v4706_v54 = vld [vmem:[#allocation5 + $0x120] sm:$0xf]  ;;  %v6307_v31 = vor.u32 %v7036_v25, %v6306_v50  ;;  %v6692_v50 = vld [vmem:[#allocation5 + $0x324] sm:$0xf] }
 0x189   :  { %4015 = vmatmul.bf16.vlgmr.msrb.gmra.mxu1 %v7463_v33  ;;  %v6636_v9 = vld [vmem:[#allocation5 + $0x15c] sm:$0xf0]  ;;  %v3822_v58 = vadd.f32 %v3821_v21, %v3809_v51  ;;  %v4964_v25 = vld [vmem:[#allocation5 + $0x360] sm:$0xf0] }
 0x18a   :  { %4059 = vmatpush.bf16.msra.mxu1 %v5539_v53  ;;  %4074 = vmatpush.bf16.msra.mxu2 %v5923_v60  ;;  %v5282_v16 = vld [vmem:[#allocation5 + $0x5a0] sm:$0xf]  ;;  %v4707_v37 = vor.u32 %v6636_v9, %v4706_v54  ;;  %v6676_v21 = vld [vmem:[#allocation5 + $0x2a4] sm:$0xf] }
 0x18b   :  { %v6780_v26 = vld [vmem:[#allocation5 + $0x5dc] sm:$0xf0]  ;;  %v3835_v52 = vadd.f32 %v3834_v45, %v3822_v58  ;;  %v6820_v44 = vld [vmem:[#allocation5 + $0x724] sm:$0xf] }
 0x18c   :  { %4087 = vmatpush.bf16.msra.mxu3 %v6435_v12  ;;  %4049 = vmatpush.bf16.msra.mxu0 %v4835_v61  ;;  %v5730_v55 = vld [vmem:[#allocation5 + $0x920] sm:$0xf]  ;;  %v5283_v63 = vor.u32 %v6780_v26, %v5282_v16  ;;  %v5028_v12 = vld [vmem:[#allocation5 + $0x3e0] sm:$0xf0]  ;;  %v3823_v57 = vpop.f32.mrf.mxu2  ;;  %v6567_v26 = vor.u32 %v7092_v0, %v6564_v18 }
 0x18d   :  { %v6892_v36 = vld [vmem:[#allocation5 + $0x95c] sm:$0xf0]  ;;  %4465 = vst [vmem:[#allocation8 + $0x18] sm:$0xff] %v3835_v52  ;;  %v6836_v16 = vld [vmem:[#allocation5 + $0x7a4] sm:$0xf] }
 0x18e   :  { %4060 = vmatpush.bf16.msra.mxu1 %v5475_v7  ;;  %4075 = vmatpush.bf16.msra.mxu2 %v5859_v48  ;;  %v6242_v38 = vld [vmem:[#allocation5 + $0xd20] sm:$0xf]  ;;  %v5731_v49 = vor.u32 %v6892_v36, %v5730_v55  ;;  %v5031_v48 = vor.u32 %v6708_v11, %v5028_v12  ;;  %v3836_v47 = vpop.f32.mrf.mxu3  ;;  %v5988_v55 = vld [vmem:[#allocation5 + $0xb60] sm:$0xf0]  ;;  %v4967_v36 = vor.u32 %v6692_v50, %v4964_v25 }
 0x18f   :  { %v7020_v43 = vld [vmem:[#allocation5 + $0xd5c] sm:$0xf0]  ;;  %v5924_v51 = vld [vmem:[#allocation5 + $0xae0] sm:$0xf0] }
 0x190   :  { %4088 = vmatpush.bf16.msra.mxu3 %v6371_v19  ;;  %4050 = vmatpush.bf16.msra.mxu0 %v4771_v24  ;;  %v4642_v22 = vld [vmem:[#allocation5 + $0xa0] sm:$0xf]  ;;  %v6243_v28 = vor.u32 %v7020_v43, %v6242_v38  ;;  %v3810_v19 = vpop.f32.mrf.mxu1  ;;  %v6500_v38 = vld [vmem:[#allocation5 + $0xf60] sm:$0xf0] }
 0x191   :  { %v6620_v39 = vld [vmem:[#allocation5 + $0xdc] sm:$0xf0]  ;;  %v5412_v58 = vld [vmem:[#allocation5 + $0x6e0] sm:$0xf0] }
 0x192   :  { %4061 = vmatpush.bf16.msra.mxu1 %v5411_v42  ;;  %4076 = vmatpush.bf16.msra.mxu2 %v5795_v20  ;;  %v5218_v46 = vld [vmem:[#allocation5 + $0x520] sm:$0xf]  ;;  %v4643_v3 = vor.u32 %v6620_v39, %v4642_v22  ;;  %v4481_v42 = vmax.f32 %v3835_v52, 0.0  ;;  %v6055_v20 = vor.u32 %v6964_v15, %v6052_v17  ;;  %v4900_v22 = vld [vmem:[#allocation5 + $0x2e0] sm:$0xf0]  ;;  %v5543_v39 = vor.u32 %v6836_v16, %v5540_v32 }
 0x193   :  { %v6764_v53 = vld [vmem:[#allocation5 + $0x55c] sm:$0xf0]  ;;  %v4903_v27 = vor.u32 %v6676_v21, %v4900_v22  ;;  %v4772_v11 = vld [vmem:[#allocation5 + $0x1e0] sm:$0xf0]  ;;  %v935_v15 = vperm.slane %v7488_v8, 4 }
 0x194   :  { %4089 = vmatpush.bf16.msra.mxu3 %v6307_v31  ;;  %v5666_v56 = vld [vmem:[#allocation5 + $0x8a0] sm:$0xf]  ;;  %4051 = vmatpush.bf16.msra.mxu0 %v4707_v37  ;;  %v5219_v7 = vor.u32 %v6764_v53, %v5218_v46  ;;  %4497 = vst [vmem:[#allocation9 + $0x18] sm:$0xff] %v4481_v42  ;;  %v6948_v31 = vld [vmem:[#allocation5 + $0xb24] sm:$0xf] }
 0x195   :  { %v6876_v2 = vld [vmem:[#allocation5 + $0x8dc] sm:$0xf0]  ;;  %v7076_v37 = vld [vmem:[#allocation5 + $0xf24] sm:$0xf]  ;;  %v5991_v45 = vor.u32 %v6948_v31, %v5988_v55 }
 0x196   :  { %4062 = vmatpush.bf16.msra.mxu1 %v5347_v10  ;;  %v6178_v4 = vld [vmem:[#allocation5 + $0xca0] sm:$0xf]  ;;  %4077 = vmatpush.bf16.msra.mxu2 %v5731_v49  ;;  %v5667_v35 = vor.u32 %v6876_v2, %v5666_v56  ;;  %v6503_v46 = vor.u32 %v7076_v37, %v6500_v38  ;;  %v6932_v49 = vld [vmem:[#allocation5 + $0xaa4] sm:$0xf] }
 0x197   :  { %v7004_v30 = vld [vmem:[#allocation5 + $0xcdc] sm:$0xf0]  ;;  %v7060_v53 = vld [vmem:[#allocation5 + $0xea4] sm:$0xf] }
 0x198   :  { %v5154_v5 = vld [vmem:[#allocation5 + $0x4a0] sm:$0xf]  ;;  %4090 = vmatpush.bf16.msra.mxu3 %v6243_v28  ;;  %v6179_v40 = vor.u32 %v7004_v30, %v6178_v4  ;;  %4052 = vmatpush.bf16.msra.mxu0 %v4643_v3  ;;  %v6436_v28 = vld [vmem:[#allocation5 + $0xee0] sm:$0xf0]  ;;  %v5927_v30 = vor.u32 %v6932_v49, %v5924_v51 }
 0x199   :  { %v6748_v6 = vld [vmem:[#allocation5 + $0x4dc] sm:$0xf0]  ;;  %v6660_v56 = vld [vmem:[#allocation5 + $0x224] sm:$0xf] }
 0x19a   :  { %v4578_v34 = vld [vmem:[#allocation5 + $0x20] sm:$0xf]  ;;  %4063 = vmatpush.bf16.msra.mxu1 %v5283_v63  ;;  %v5155_v1 = vor.u32 %v6748_v6, %v5154_v5  ;;  %4078 = vmatpush.bf16.msra.mxu2 %v5667_v35  ;;  %v5476_v63 = vld [vmem:[#allocation5 + $0x760] sm:$0xf0]  ;;  %v6439_v5 = vor.u32 %v7060_v53, %v6436_v28 }
 0x19b   :  { %v6604_v59 = vld [vmem:[#allocation5 + $0x5c] sm:$0xf0]  ;;  %v4836_v2 = vld [vmem:[#allocation5 + $0x260] sm:$0xf0]  ;;  %v5479_v3 = vor.u32 %v6820_v44, %v5476_v63 }
 0x19c   :  { %v5602_v60 = vld [vmem:[#allocation5 + $0x820] sm:$0xf]  ;;  %v4579_v62 = vor.u32 %v6604_v59, %v4578_v34  ;;  %4091 = vmatpush.bf16.msra.mxu3 %v6179_v40  ;;  %v6804_v4 = vld [vmem:[#allocation5 + $0x6a4] sm:$0xf]  ;;  %v4839_v59 = vor.u32 %v6660_v56, %v4836_v2  ;;  %v3847_v17 = vpop.f32.mrf.mxu0 }
 0x19d   :  { %v6860_v61 = vld [vmem:[#allocation5 + $0x85c] sm:$0xf0]  ;;  %v6916_v6 = vld [vmem:[#allocation5 + $0xa24] sm:$0xf]  ;;  %v5415_v12 = vor.u32 %v6804_v4, %v5412_v58  ;;  %v5034_v4 = vld [vmem:[#allocation5 + $0x3a8] sm:$0xf] }
 0x19e   :  { %v6114_v14 = vld [vmem:[#allocation5 + $0xc20] sm:$0xf]  ;;  %4064 = vmatpush.bf16.msra.mxu1 %v5219_v7  ;;  %v5603_v24 = vor.u32 %v6860_v61, %v5602_v60  ;;  %4053 = vmatpush.bf16.msra.mxu0 %v4579_v62  ;;  %v5860_v34 = vld [vmem:[#allocation5 + $0xa60] sm:$0xf0] }
 0x19f   :  { %v6988_v41 = vld [vmem:[#allocation5 + $0xc5c] sm:$0xf0]  ;;  %v7044_v7 = vld [vmem:[#allocation5 + $0xe24] sm:$0xf]  ;;  %v5863_v61 = vor.u32 %v6916_v6, %v5860_v34 }
 0x1a0   :  { %v5090_v54 = vld [vmem:[#allocation5 + $0x420] sm:$0xf]  ;;  %v6115_v10 = vor.u32 %v6988_v41, %v6114_v14  ;;  %4079 = vmatpush.bf16.msra.mxu2 %v5603_v24  ;;  %v6372_v35 = vld [vmem:[#allocation5 + $0xe60] sm:$0xf0] }
 0x1a1   :  { %v6732_v9 = vld [vmem:[#allocation5 + $0x45c] sm:$0xf0]  ;;  %4054 = vmatmul.bf16.vlgmr.msra.gmra.mxu0 %v7450_v23  ;;  %v6644_v60 = vld [vmem:[#allocation5 + $0x1a4] sm:$0xf]  ;;  %v6375_v14 = vor.u32 %v7044_v7, %v6372_v35 }
 0x1a2   :  { %4098 = vmatpush.bf16.msrb.mxu0 %v5031_v48  ;;  %4065 = vmatpush.bf16.msra.mxu1 %v5155_v1  ;;  %v5091_v43 = vor.u32 %v6732_v9, %v5090_v54  ;;  %v6788_v52 = vld [vmem:[#allocation5 + $0x624] sm:$0xf]  ;;  %v4775_v42 = vor.u32 %v6644_v60, %v4772_v11  ;;  %v3848_v9 = vadd.f32 %v3847_v17, %v935_v15  ;;  %v6058_v60 = vld [vmem:[#allocation5 + $0xba8] sm:$0xf] }
 0x1a3   :  { %4092 = vmatpush.bf16.msra.mxu3 %v6115_v10  ;;  %4080 = vmatmul.bf16.vlgmr.msra.gmra.mxu2 %v7430_v13  ;;  %v5348_v40 = vld [vmem:[#allocation5 + $0x660] sm:$0xf0]  ;;  %v6973_v11 = vld [vmem:[#allocation5 + $0xbe4] sm:$0xf0] }
 0x1a4   :  { %4124 = vmatpush.bf16.msrb.mxu2 %v6055_v20  ;;  %v6900_v41 = vld [vmem:[#allocation5 + $0x9a4] sm:$0xf]  ;;  %v5351_v19 = vor.u32 %v6788_v52, %v5348_v40  ;;  %v3873_v20 = vpop.f32.mrf.mxu2  ;;  %v6570_v40 = vld [vmem:[#allocation5 + $0xfa8] sm:$0xf] }
 0x1a5   :  { %v5796_v62 = vld [vmem:[#allocation5 + $0x9e0] sm:$0xf0] }
 0x1a6   :  { %4099 = vmatpush.bf16.msrb.mxu0 %v4967_v36  ;;  %4066 = vmatpush.bf16.msra.mxu1 %v5091_v43  ;;  %v7028_v57 = vld [vmem:[#allocation5 + $0xda4] sm:$0xf]  ;;  %v5799_v1 = vor.u32 %v6900_v41, %v5796_v62  ;;  %v3886_v31 = vpop.f32.mrf.mxu3  ;;  %v3860_v38 = vpop.f32.mrf.mxu1 }
 0x1a7   :  { %4137 = vmatpush.bf16.msrb.mxu3 %v6567_v26  ;;  %v6308_v48 = vld [vmem:[#allocation5 + $0xde0] sm:$0xf0]  ;;  %v3861_v44 = vadd.f32 %v3860_v38, %v3848_v9  ;;  %v6506_v9 = vld [vmem:[#allocation5 + $0xf28] sm:$0xf] }
 0x1a8   :  { %4093 = vmatmul.bf16.vlgmr.msra.gmra.mxu3 %v7440_v29  ;;  %4125 = vmatpush.bf16.msrb.mxu2 %v5991_v45  ;;  %v6628_v0 = vld [vmem:[#allocation5 + $0x124] sm:$0xf]  ;;  %v6311_v50 = vor.u32 %v7028_v57, %v6308_v48  ;;  %v3849_v45 = vpop.f32.mrf.mxu0  ;;  %v6701_v57 = vld [vmem:[#allocation5 + $0x364] sm:$0xf0] }
 0x1a9   :  { %4067 = vmatmul.bf16.vlgmr.msra.gmra.mxu1 %v7463_v33  ;;  %v4708_v18 = vld [vmem:[#allocation5 + $0x160] sm:$0xf0]  ;;  %v3874_v28 = vadd.f32 %v3873_v20, %v3861_v44  ;;  %v6685_v20 = vld [vmem:[#allocation5 + $0x2e4] sm:$0xf0] }
 0x1aa   :  { %4111 = vmatpush.bf16.msrb.mxu1 %v5543_v39  ;;  %4100 = vmatpush.bf16.msrb.mxu0 %v4903_v27  ;;  %v6772_v47 = vld [vmem:[#allocation5 + $0x5a4] sm:$0xf]  ;;  %v4711_v8 = vor.u32 %v6628_v0, %v4708_v18  ;;  %v6941_v38 = vld [vmem:[#allocation5 + $0xae4] sm:$0xf0] }
 0x1ab   :  { %4138 = vmatpush.bf16.msrb.mxu3 %v6503_v46  ;;  %v5284_v24 = vld [vmem:[#allocation5 + $0x5e0] sm:$0xf0]  ;;  %v6669_v44 = vld [vmem:[#allocation5 + $0x264] sm:$0xf0] }
 0x1ac   :  { %4126 = vmatpush.bf16.msrb.mxu2 %v5927_v30  ;;  %v6884_v25 = vld [vmem:[#allocation5 + $0x924] sm:$0xf]  ;;  %v5287_v55 = vor.u32 %v6772_v47, %v5284_v24  ;;  %v6717_v30 = vld [vmem:[#allocation5 + $0x3e4] sm:$0xf0]  ;;  %v6059_v47 = vor.u32 %v6973_v11, %v6058_v60 }
 0x1ad   :  { %v5732_v54 = vld [vmem:[#allocation5 + $0x960] sm:$0xf0]  ;;  %v5035_v52 = vor.u32 %v6717_v30, %v5034_v4  ;;  %v6653_v4 = vld [vmem:[#allocation5 + $0x1e4] sm:$0xf0] }
 0x1ae   :  { %4112 = vmatpush.bf16.msrb.mxu1 %v5479_v3  ;;  %4101 = vmatpush.bf16.msrb.mxu0 %v4839_v59  ;;  %v7012_v10 = vld [vmem:[#allocation5 + $0xd24] sm:$0xf]  ;;  %v5735_v37 = vor.u32 %v6884_v25, %v5732_v54  ;;  %v3887_v59 = vadd.f32 %v3886_v31, %v3874_v28  ;;  %v3888_v41 = vpop.f32.mrf.mxu3  ;;  %v3862_v48 = vpop.f32.mrf.mxu1  ;;  %v6957_v25 = vld [vmem:[#allocation5 + $0xb64] sm:$0xf0] }
 0x1af   :  { %4139 = vmatpush.bf16.msrb.mxu3 %v6439_v5  ;;  %v6244_v16 = vld [vmem:[#allocation5 + $0xd60] sm:$0xf0]  ;;  %v6893_v48 = vld [vmem:[#allocation5 + $0x964] sm:$0xf0] }
 0x1b0   :  { %4127 = vmatpush.bf16.msrb.mxu2 %v5863_v61  ;;  %v6612_v32 = vld [vmem:[#allocation5 + $0xa4] sm:$0xf]  ;;  %v6247_v21 = vor.u32 %v7012_v10, %v6244_v16  ;;  %v7101_v61 = vld [vmem:[#allocation5 + $0xfe4] sm:$0xf0]  ;;  %4466 = vst [vmem:[#allocation8 + $0x20] sm:$0xff] %v3887_v59 }
 0x1b1   :  { %v4644_v26 = vld [vmem:[#allocation5 + $0xe0] sm:$0xf0]  ;;  %v6571_v24 = vor.u32 %v7101_v61, %v6570_v40  ;;  %v4906_v16 = vld [vmem:[#allocation5 + $0x2a8] sm:$0xf] }
 0x1b2   :  { %4113 = vmatpush.bf16.msrb.mxu1 %v5415_v12  ;;  %4102 = vmatpush.bf16.msrb.mxu0 %v4775_v42  ;;  %v6756_v36 = vld [vmem:[#allocation5 + $0x524] sm:$0xf]  ;;  %v4647_v63 = vor.u32 %v6612_v32, %v4644_v26  ;;  %v3875_v12 = vpop.f32.mrf.mxu2  ;;  %v4970_v42 = vld [vmem:[#allocation5 + $0x328] sm:$0xf] }
 0x1b3   :  { %4140 = vmatpush.bf16.msrb.mxu3 %v6375_v14  ;;  %v5220_v43 = vld [vmem:[#allocation5 + $0x560] sm:$0xf0]  ;;  %v4482_v14 = vmax.f32 %v3887_v59, 0.0  ;;  %v4971_v54 = vor.u32 %v6701_v57, %v4970_v42  ;;  %v5482_v26 = vld [vmem:[#allocation5 + $0x728] sm:$0xf] }
 0x1b4   :  { %4128 = vmatpush.bf16.msrb.mxu2 %v5799_v1  ;;  %v6868_v22 = vld [vmem:[#allocation5 + $0x8a4] sm:$0xf]  ;;  %v5223_v56 = vor.u32 %v6756_v36, %v5220_v43  ;;  %v6845_v1 = vld [vmem:[#allocation5 + $0x7e4] sm:$0xf0]  ;;  %v4907_v43 = vor.u32 %v6685_v20, %v4906_v16 }
 0x1b5   :  { %v5668_v39 = vld [vmem:[#allocation5 + $0x8e0] sm:$0xf0]  ;;  %4498 = vst [vmem:[#allocation9 + $0x20] sm:$0xff] %v4482_v14  ;;  %v5802_v59 = vld [vmem:[#allocation5 + $0x9a8] sm:$0xf] }
 0x1b6   :  { %4114 = vmatpush.bf16.msrb.mxu1 %v5351_v19  ;;  %4103 = vmatpush.bf16.msrb.mxu0 %v4711_v8  ;;  %v6996_v46 = vld [vmem:[#allocation5 + $0xca4] sm:$0xf]  ;;  %v5671_v3 = vor.u32 %v6868_v22, %v5668_v39  ;;  %v5546_v19 = vld [vmem:[#allocation5 + $0x7a8] sm:$0xf] }
 0x1b7   :  { %4141 = vmatpush.bf16.msrb.mxu3 %v6311_v50  ;;  %v6180_v49 = vld [vmem:[#allocation5 + $0xce0] sm:$0xf0]  ;;  %v5994_v50 = vld [vmem:[#allocation5 + $0xb28] sm:$0xf]  ;;  %v5547_v32 = vor.u32 %v6845_v1, %v5546_v19 }
 0x1b8   :  { %v6740_v51 = vld [vmem:[#allocation5 + $0x4a4] sm:$0xf]  ;;  %4129 = vmatpush.bf16.msrb.mxu2 %v5735_v37  ;;  %v6183_v58 = vor.u32 %v6996_v46, %v6180_v49  ;;  %v7085_v8 = vld [vmem:[#allocation5 + $0xf64] sm:$0xf0]  ;;  %v5995_v31 = vor.u32 %v6957_v25, %v5994_v50 }
 0x1b9   :  { %v6596_v27 = vld [vmem:[#allocation5 + $0x24] sm:$0xf]  ;;  %v6507_v36 = vor.u32 %v7085_v8, %v6506_v9  ;;  %v5930_v37 = vld [vmem:[#allocation5 + $0xaa8] sm:$0xf] }
 0x1ba   :  { %v4580_v53 = vld [vmem:[#allocation5 + $0x60] sm:$0xf0]  ;;  %4115 = vmatpush.bf16.msrb.mxu1 %v5287_v55  ;;  %4104 = vmatpush.bf16.msrb.mxu0 %v4647_v63  ;;  %v6829_v55 = vld [vmem:[#allocation5 + $0x764] sm:$0xf0]  ;;  %v5931_v46 = vor.u32 %v6941_v38, %v5930_v37 }
 0x1bb   :  { %v5156_v2 = vld [vmem:[#allocation5 + $0x4e0] sm:$0xf0]  ;;  %4142 = vmatpush.bf16.msrb.mxu3 %v6247_v21  ;;  %v4583_v7 = vor.u32 %v6596_v27, %v4580_v53  ;;  %v6442_v21 = vld [vmem:[#allocation5 + $0xea8] sm:$0xf]  ;;  %v5483_v45 = vor.u32 %v6829_v55, %v5482_v26 }
 0x1bc   :  { %v6852_v5 = vld [vmem:[#allocation5 + $0x824] sm:$0xf]  ;;  %v5159_v62 = vor.u32 %v6740_v51, %v5156_v2  ;;  %4130 = vmatpush.bf16.msrb.mxu2 %v5671_v3  ;;  %v7069_v22 = vld [vmem:[#allocation5 + $0xee4] sm:$0xf0]  ;;  %v3899_v40 = vpop.f32.mrf.mxu0 }
 0x1bd   :  { %v5604_v6 = vld [vmem:[#allocation5 + $0x860] sm:$0xf0]  ;;  %v4842_v39 = vld [vmem:[#allocation5 + $0x228] sm:$0xf]  ;;  %v6443_v51 = vor.u32 %v7069_v22, %v6442_v21 }
 0x1be   :  { %v6980_v34 = vld [vmem:[#allocation5 + $0xc24] sm:$0xf]  ;;  %4116 = vmatpush.bf16.msrb.mxu1 %v5223_v56  ;;  %v5607_v17 = vor.u32 %v6852_v5, %v5604_v6  ;;  %4105 = vmatpush.bf16.msrb.mxu0 %v4583_v7  ;;  %v5418_v63 = vld [vmem:[#allocation5 + $0x6a8] sm:$0xf]  ;;  %v4843_v28 = vor.u32 %v6669_v44, %v4842_v39 }
 0x1bf   :  { %v6116_v35 = vld [vmem:[#allocation5 + $0xc60] sm:$0xf0]  ;;  %4143 = vmatpush.bf16.msrb.mxu3 %v6183_v58  ;;  %v6813_v49 = vld [vmem:[#allocation5 + $0x6e4] sm:$0xf0] }
 0x1c0   :  { %v6724_v15 = vld [vmem:[#allocation5 + $0x424] sm:$0xf]  ;;  %v6119_v18 = vor.u32 %v6980_v34, %v6116_v35  ;;  %4131 = vmatpush.bf16.msrb.mxu2 %v5607_v17  ;;  %v5866_v27 = vld [vmem:[#allocation5 + $0xa28] sm:$0xf]  ;;  %v5419_v30 = vor.u32 %v6813_v49, %v5418_v63  ;;  %v5036_v49 = vld [vmem:[#allocation5 + $0x3e8] sm:$0xf0] }
 0x1c1   :  { %v5092_v0 = vld [vmem:[#allocation5 + $0x460] sm:$0xf0]  ;;  %4106 = vmatmul.bf16.vlgmr.msrb.gmra.mxu0 %v7450_v23  ;;  %v6925_v53 = vld [vmem:[#allocation5 + $0xa64] sm:$0xf0] }
 0x1c2   :  { %4150 = vmatpush.bf16.msra.mxu0 %v5035_v52  ;;  %4117 = vmatpush.bf16.msrb.mxu1 %v5159_v62  ;;  %v5095_v10 = vor.u32 %v6724_v15, %v5092_v0  ;;  %v6378_v56 = vld [vmem:[#allocation5 + $0xe28] sm:$0xf]  ;;  %v5867_v6 = vor.u32 %v6925_v53, %v5866_v27  ;;  %v7524_v35 = vld [vmem:[#allocation7] sm:$0xff] }
 0x1c3   :  { %4144 = vmatpush.bf16.msrb.mxu3 %v6119_v18  ;;  %4132 = vmatmul.bf16.vlgmr.msrb.gmra.mxu2 %v7430_v13  ;;  %v7053_v2 = vld [vmem:[#allocation5 + $0xe64] sm:$0xf0]  ;;  %v936_v60 = vperm.slane %v7524_v35, 5 }
 0x1c4   :  { %4176 = vmatpush.bf16.msra.mxu2 %v6059_v47  ;;  %v4778_v3 = vld [vmem:[#allocation5 + $0x1a8] sm:$0xf]  ;;  %v6379_v34 = vor.u32 %v7053_v2, %v6378_v56  ;;  %v3925_v50 = vpop.f32.mrf.mxu2  ;;  %v3901_v38 = vpop.f32.mrf.mxu0 }
 0x1c5   :  { %v5354_v58 = vld [vmem:[#allocation5 + $0x628] sm:$0xf]  ;;  %v4779_v11 = vor.u32 %v6653_v4, %v4778_v3  ;;  %v3900_v0 = vadd.f32 %v3899_v40, %v936_v60  ;;  %v6965_v4 = vld [vmem:[#allocation5 + $0xbac] sm:$0xf] }
 0x1c6   :  { %4151 = vmatpush.bf16.msra.mxu0 %v4971_v54  ;;  %4118 = vmatpush.bf16.msrb.mxu1 %v5095_v10  ;;  %v6797_v5 = vld [vmem:[#allocation5 + $0x664] sm:$0xf0]  ;;  %v3938_v25 = vpop.f32.mrf.mxu3  ;;  %v3912_v10 = vpop.f32.mrf.mxu1  ;;  %v4972_v40 = vld [vmem:[#allocation5 + $0x368] sm:$0xf0] }
 0x1c7   :  { %4189 = vmatpush.bf16.msra.mxu3 %v6571_v24  ;;  %v6909_v7 = vld [vmem:[#allocation5 + $0x9e4] sm:$0xf0]  ;;  %v5355_v41 = vor.u32 %v6797_v5, %v5354_v58  ;;  %v7093_v5 = vld [vmem:[#allocation5 + $0xfac] sm:$0xf] }
 0x1c8   :  { %4145 = vmatmul.bf16.vlgmr.msrb.gmra.mxu3 %v7440_v29  ;;  %4177 = vmatpush.bf16.msra.mxu2 %v5995_v31  ;;  %v6314_v12 = vld [vmem:[#allocation5 + $0xda8] sm:$0xf]  ;;  %v5803_v15 = vor.u32 %v6909_v7, %v5802_v59  ;;  %v3913_v31 = vadd.f32 %v3912_v10, %v3900_v0  ;;  %v6933_v10 = vld [vmem:[#allocation5 + $0xaac] sm:$0xf] }
 0x1c9   :  { %4119 = vmatmul.bf16.vlgmr.msrb.gmra.mxu1 %v7463_v33  ;;  %v7037_v52 = vld [vmem:[#allocation5 + $0xde4] sm:$0xf0] }
 0x1ca   :  { %4163 = vmatpush.bf16.msra.mxu1 %v5547_v32  ;;  %4152 = vmatpush.bf16.msra.mxu0 %v4907_v43  ;;  %v4714_v61 = vld [vmem:[#allocation5 + $0x128] sm:$0xf]  ;;  %v6315_v42 = vor.u32 %v7037_v52, %v6314_v12  ;;  %v3926_v39 = vadd.f32 %v3925_v50, %v3913_v31  ;;  %v6693_v52 = vld [vmem:[#allocation5 + $0x32c] sm:$0xf] }
 0x1cb   :  { %4190 = vmatpush.bf16.msra.mxu3 %v6507_v36  ;;  %v6637_v14 = vld [vmem:[#allocation5 + $0x164] sm:$0xf0]  ;;  %v4975_v0 = vor.u32 %v6693_v52, %v4972_v40  ;;  %v6661_v31 = vld [vmem:[#allocation5 + $0x22c] sm:$0xf] }
 0x1cc   :  { %4178 = vmatpush.bf16.msra.mxu2 %v5931_v46  ;;  %v5290_v62 = vld [vmem:[#allocation5 + $0x5a8] sm:$0xf]  ;;  %v4715_v18 = vor.u32 %v6637_v14, %v4714_v61  ;;  %v6709_v46 = vld [vmem:[#allocation5 + $0x3ac] sm:$0xf]  ;;  %v3939_v56 = vadd.f32 %v3938_v25, %v3926_v39  ;;  %v3927_v59 = vpop.f32.mrf.mxu2 }
 0x1cd   :  { %v6781_v17 = vld [vmem:[#allocation5 + $0x5e4] sm:$0xf0]  ;;  %v5039_v58 = vor.u32 %v6709_v46, %v5036_v49  ;;  %v6821_v25 = vld [vmem:[#allocation5 + $0x72c] sm:$0xf] }
 0x1ce   :  { %4164 = vmatpush.bf16.msra.mxu1 %v5483_v45  ;;  %4153 = vmatpush.bf16.msra.mxu0 %v4843_v28  ;;  %v5738_v57 = vld [vmem:[#allocation5 + $0x928] sm:$0xf]  ;;  %v5291_v54 = vor.u32 %v6781_v17, %v5290_v62  ;;  %4467 = vst [vmem:[#allocation8 + $0x28] sm:$0xff] %v3939_v56  ;;  %v3940_v7 = vpop.f32.mrf.mxu3  ;;  %v3914_v61 = vpop.f32.mrf.mxu1  ;;  %v6837_v62 = vld [vmem:[#allocation5 + $0x7ac] sm:$0xf] }
 0x1cf   :  { %4191 = vmatpush.bf16.msra.mxu3 %v6443_v51  ;;  %v6250_v19 = vld [vmem:[#allocation5 + $0xd28] sm:$0xf]  ;;  %v5739_v8 = vor.u32 %v6893_v48, %v5738_v57  ;;  %v5548_v17 = vld [vmem:[#allocation5 + $0x7e8] sm:$0xf0] }
 0x1d0   :  { %4179 = vmatpush.bf16.msra.mxu2 %v5867_v6  ;;  %v7021_v47 = vld [vmem:[#allocation5 + $0xd64] sm:$0xf0]  ;;  %v6572_v6 = vld [vmem:[#allocation5 + $0xfe8] sm:$0xf0]  ;;  %v5551_v50 = vor.u32 %v6837_v62, %v5548_v17 }
 0x1d1   :  { %v4650_v1 = vld [vmem:[#allocation5 + $0xa8] sm:$0xf]  ;;  %v6251_v20 = vor.u32 %v7021_v47, %v6250_v19  ;;  %v6949_v57 = vld [vmem:[#allocation5 + $0xb2c] sm:$0xf] }
 0x1d2   :  { %4165 = vmatpush.bf16.msra.mxu1 %v5419_v30  ;;  %4154 = vmatpush.bf16.msra.mxu0 %v4779_v11  ;;  %v6621_v24 = vld [vmem:[#allocation5 + $0xe4] sm:$0xf0]  ;;  %v6060_v30 = vld [vmem:[#allocation5 + $0xbe8] sm:$0xf0] }
 0x1d3   :  { %4192 = vmatpush.bf16.msra.mxu3 %v6379_v34  ;;  %v5226_v9 = vld [vmem:[#allocation5 + $0x528] sm:$0xf]  ;;  %v4651_v55 = vor.u32 %v6621_v24, %v4650_v1  ;;  %v4483_v34 = vmax.f32 %v3939_v56, 0.0  ;;  %v5996_v48 = vld [vmem:[#allocation5 + $0xb68] sm:$0xf0] }
 0x1d4   :  { %4180 = vmatpush.bf16.msra.mxu2 %v5803_v15  ;;  %v6765_v16 = vld [vmem:[#allocation5 + $0x564] sm:$0xf0]  ;;  %v6063_v15 = vor.u32 %v6965_v4, %v6060_v30  ;;  %v6508_v19 = vld [vmem:[#allocation5 + $0xf68] sm:$0xf0] }
 0x1d5   :  { %v5674_v32 = vld [vmem:[#allocation5 + $0x8a8] sm:$0xf]  ;;  %v5227_v44 = vor.u32 %v6765_v16, %v5226_v9  ;;  %4499 = vst [vmem:[#allocation9 + $0x28] sm:$0xff] %v4483_v34  ;;  %v6677_v1 = vld [vmem:[#allocation5 + $0x2ac] sm:$0xf] }
 0x1d6   :  { %4166 = vmatpush.bf16.msra.mxu1 %v5355_v41  ;;  %v6877_v26 = vld [vmem:[#allocation5 + $0x8e4] sm:$0xf0]  ;;  %4155 = vmatpush.bf16.msra.mxu0 %v4715_v18  ;;  %v7077_v18 = vld [vmem:[#allocation5 + $0xf2c] sm:$0xf] }
 0x1d7   :  { %4193 = vmatpush.bf16.msra.mxu3 %v6315_v42  ;;  %v6186_v36 = vld [vmem:[#allocation5 + $0xca8] sm:$0xf]  ;;  %v5675_v63 = vor.u32 %v6877_v26, %v5674_v32  ;;  %v6575_v42 = vor.u32 %v7093_v5, %v6572_v6  ;;  %v4908_v24 = vld [vmem:[#allocation5 + $0x2e8] sm:$0xf0] }
 0x1d8   :  { %v7005_v37 = vld [vmem:[#allocation5 + $0xce4] sm:$0xf0]  ;;  %4181 = vmatpush.bf16.msra.mxu2 %v5739_v8  ;;  %v5484_v9 = vld [vmem:[#allocation5 + $0x768] sm:$0xf0]  ;;  %v6511_v8 = vor.u32 %v7077_v18, %v6508_v19 }
 0x1d9   :  { %v5162_v43 = vld [vmem:[#allocation5 + $0x4a8] sm:$0xf]  ;;  %v6187_v51 = vor.u32 %v7005_v37, %v6186_v36  ;;  %v5932_v16 = vld [vmem:[#allocation5 + $0xae8] sm:$0xf0]  ;;  %v5487_v36 = vor.u32 %v6821_v25, %v5484_v9 }
 0x1da   :  { %v4586_v21 = vld [vmem:[#allocation5 + $0x28] sm:$0xf]  ;;  %4167 = vmatpush.bf16.msra.mxu1 %v5291_v54  ;;  %4156 = vmatpush.bf16.msra.mxu0 %v4651_v55  ;;  %v5999_v54 = vor.u32 %v6949_v57, %v5996_v48  ;;  %v7061_v32 = vld [vmem:[#allocation5 + $0xeac] sm:$0xf]  ;;  %v5935_v38 = vor.u32 %v6933_v10, %v5932_v16 }
 0x1db   :  { %v6605_v22 = vld [vmem:[#allocation5 + $0x64] sm:$0xf0]  ;;  %4194 = vmatpush.bf16.msra.mxu3 %v6251_v20  ;;  %v4911_v20 = vor.u32 %v6677_v1, %v4908_v24  ;;  %v6444_v26 = vld [vmem:[#allocation5 + $0xee8] sm:$0xf0] }
 0x1dc   :  { %v6749_v45 = vld [vmem:[#allocation5 + $0x4e4] sm:$0xf0]  ;;  %v4587_v2 = vor.u32 %v6605_v22, %v4586_v21  ;;  %4182 = vmatpush.bf16.msra.mxu2 %v5675_v63  ;;  %v4844_v55 = vld [vmem:[#allocation5 + $0x268] sm:$0xf0]  ;;  %v6447_v21 = vor.u32 %v7061_v32, %v6444_v26  ;;  %v3951_v6 = vpop.f32.mrf.mxu0 }
 0x1dd   :  { %v5610_v27 = vld [vmem:[#allocation5 + $0x828] sm:$0xf]  ;;  %v5163_v60 = vor.u32 %v6749_v45, %v5162_v43  ;;  %v6805_v37 = vld [vmem:[#allocation5 + $0x6ac] sm:$0xf] }
 0x1de   :  { %v6861_v53 = vld [vmem:[#allocation5 + $0x864] sm:$0xf0]  ;;  %4168 = vmatpush.bf16.msra.mxu1 %v5227_v44  ;;  %4157 = vmatpush.bf16.msra.mxu0 %v4587_v2  ;;  %v5420_v43 = vld [vmem:[#allocation5 + $0x6e8] sm:$0xf0]  ;;  %v4847_v44 = vor.u32 %v6661_v31, %v4844_v55 }
 0x1df   :  { %v6122_v28 = vld [vmem:[#allocation5 + $0xc28] sm:$0xf]  ;;  %v5611_v12 = vor.u32 %v6861_v53, %v5610_v27  ;;  %4195 = vmatpush.bf16.msra.mxu3 %v6187_v51  ;;  %v6917_v22 = vld [vmem:[#allocation5 + $0xa2c] sm:$0xf]  ;;  %v5423_v51 = vor.u32 %v6805_v37, %v5420_v43  ;;  %v5042_v43 = vld [vmem:[#allocation5 + $0x3b0] sm:$0xf] }
 0x1e0   :  { %v6989_v3 = vld [vmem:[#allocation5 + $0xc64] sm:$0xf0]  ;;  %v5868_v39 = vld [vmem:[#allocation5 + $0xa68] sm:$0xf0] }
 0x1e1   :  { %v5098_v11 = vld [vmem:[#allocation5 + $0x428] sm:$0xf]  ;;  %v6123_v41 = vor.u32 %v6989_v3, %v6122_v28  ;;  %4183 = vmatpush.bf16.msra.mxu2 %v5611_v12  ;;  %4158 = vmatmul.bf16.vlgmr.msra.gmra.mxu0 %v7450_v23  ;;  %v7045_v45 = vld [vmem:[#allocation5 + $0xe2c] sm:$0xf]  ;;  %v5871_v53 = vor.u32 %v6917_v22, %v5868_v39  ;;  %v937_v28 = vperm.slane %v7524_v35, 6 }
 0x1e2   :  { %v6733_v14 = vld [vmem:[#allocation5 + $0x464] sm:$0xf0]  ;;  %4202 = vmatpush.bf16.msrb.mxu0 %v5039_v58  ;;  %4169 = vmatpush.bf16.msra.mxu1 %v5163_v60  ;;  %v6380_v63 = vld [vmem:[#allocation5 + $0xe68] sm:$0xf0] }
 0x1e3   :  { %v5099_v47 = vor.u32 %v6733_v14, %v5098_v11  ;;  %4196 = vmatpush.bf16.msra.mxu3 %v6123_v41  ;;  %v6645_v46 = vld [vmem:[#allocation5 + $0x1ac] sm:$0xf]  ;;  %v6383_v2 = vor.u32 %v7045_v45, %v6380_v63  ;;  %v3952_v12 = vadd.f32 %v3951_v6, %v937_v28  ;;  %v6578_v28 = vld [vmem:[#allocation5 + $0xfb0] sm:$0xf] }
 0x1e4   :  { %4184 = vmatmul.bf16.vlgmr.msra.gmra.mxu2 %v7430_v13  ;;  %v4780_v49 = vld [vmem:[#allocation5 + $0x1e8] sm:$0xf0]  ;;  %v3977_v48 = vpop.f32.mrf.mxu2 }
 0x1e5   :  { %4228 = vmatpush.bf16.msrb.mxu2 %v6063_v15  ;;  %v6789_v27 = vld [vmem:[#allocation5 + $0x62c] sm:$0xf]  ;;  %v4783_v30 = vor.u32 %v6645_v46, %v4780_v49  ;;  %v6066_v49 = vld [vmem:[#allocation5 + $0xbb0] sm:$0xf] }
 0x1e6   :  { %4203 = vmatpush.bf16.msrb.mxu0 %v4975_v0  ;;  %4170 = vmatpush.bf16.msra.mxu1 %v5099_v47  ;;  %v5356_v56 = vld [vmem:[#allocation5 + $0x668] sm:$0xf0]  ;;  %v3964_v57 = vpop.f32.mrf.mxu1  ;;  %v3990_v1 = vpop.f32.mrf.mxu3 }
 0x1e7   :  { %4241 = vmatpush.bf16.msrb.mxu3 %v6575_v42  ;;  %v6901_v3 = vld [vmem:[#allocation5 + $0x9ac] sm:$0xf]  ;;  %v5359_v7 = vor.u32 %v6789_v27, %v5356_v56  ;;  %v3965_v47 = vadd.f32 %v3964_v57, %v3952_v12  ;;  %v7102_v56 = vld [vmem:[#allocation5 + $0xfec] sm:$0xf0] }
 0x1e8   :  { %4197 = vmatmul.bf16.vlgmr.msra.gmra.mxu3 %v7440_v29  ;;  %v5804_v4 = vld [vmem:[#allocation5 + $0x9e8] sm:$0xf0]  ;;  %v6846_v12 = vld [vmem:[#allocation5 + $0x7ec] sm:$0xf0] }
 0x1e9   :  { %4229 = vmatpush.bf16.msrb.mxu2 %v5999_v54  ;;  %4171 = vmatmul.bf16.vlgmr.msra.gmra.mxu1 %v7463_v33  ;;  %v7029_v58 = vld [vmem:[#allocation5 + $0xdac] sm:$0xf]  ;;  %v5807_v11 = vor.u32 %v6901_v3, %v5804_v4  ;;  %v3978_v16 = vadd.f32 %v3977_v48, %v3965_v47  ;;  %v5490_v48 = vld [vmem:[#allocation5 + $0x730] sm:$0xf] }
 0x1ea   :  { %4215 = vmatpush.bf16.msrb.mxu1 %v5551_v50  ;;  %4204 = vmatpush.bf16.msrb.mxu0 %v4911_v20  ;;  %v6316_v5 = vld [vmem:[#allocation5 + $0xde8] sm:$0xf0]  ;;  %v3953_v20 = vpop.f32.mrf.mxu0  ;;  %v5938_v47 = vld [vmem:[#allocation5 + $0xab0] sm:$0xf] }
 0x1eb   :  { %4242 = vmatpush.bf16.msrb.mxu3 %v6511_v8  ;;  %v6629_v34 = vld [vmem:[#allocation5 + $0x12c] sm:$0xf]  ;;  %v6319_v40 = vor.u32 %v7029_v58, %v6316_v5  ;;  %v3991_v22 = vadd.f32 %v3990_v1, %v3978_v16  ;;  %v4978_v58 = vld [vmem:[#allocation5 + $0x330] sm:$0xf] }
 0x1ec   :  { %v4716_v59 = vld [vmem:[#allocation5 + $0x168] sm:$0xf0]  ;;  %v3979_v3 = vpop.f32.mrf.mxu2  ;;  %v6702_v5 = vld [vmem:[#allocation5 + $0x36c] sm:$0xf0] }
 0x1ed   :  { %4230 = vmatpush.bf16.msrb.mxu2 %v5935_v38  ;;  %v6773_v60 = vld [vmem:[#allocation5 + $0x5ac] sm:$0xf]  ;;  %v4719_v41 = vor.u32 %v6629_v34, %v4716_v59  ;;  %4468 = vst [vmem:[#allocation8 + $0x30] sm:$0xff] %v3991_v22  ;;  %v4484_v27 = vmax.f32 %v3991_v22, 0.0  ;;  %v6942_v1 = vld [vmem:[#allocation5 + $0xaec] sm:$0xf0] }
 0x1ee   :  { %4216 = vmatpush.bf16.msrb.mxu1 %v5487_v36  ;;  %4205 = vmatpush.bf16.msrb.mxu0 %v4847_v44  ;;  %v5292_v52 = vld [vmem:[#allocation5 + $0x5e8] sm:$0xf0]  ;;  %v3992_v6 = vpop.f32.mrf.mxu3  ;;  %v5939_v16 = vor.u32 %v6942_v1, %v5938_v47  ;;  %v6814_v20 = vld [vmem:[#allocation5 + $0x6ec] sm:$0xf0] }
 0x1ef   :  { %4243 = vmatpush.bf16.msrb.mxu3 %v6447_v21  ;;  %v6885_v61 = vld [vmem:[#allocation5 + $0x92c] sm:$0xf]  ;;  %v5295_v0 = vor.u32 %v6773_v60, %v5292_v52  ;;  %v6718_v21 = vld [vmem:[#allocation5 + $0x3ec] sm:$0xf0]  ;;  %4500 = vst [vmem:[#allocation9 + $0x30] sm:$0xff] %v4484_v27  ;;  %v6579_v52 = vor.u32 %v7102_v56, %v6578_v28 }
 0x1f0   :  { %v5740_v14 = vld [vmem:[#allocation5 + $0x968] sm:$0xf0]  ;;  %v5554_v60 = vld [vmem:[#allocation5 + $0x7b0] sm:$0xf] }
 0x1f1   :  { %4231 = vmatpush.bf16.msrb.mxu2 %v5871_v53  ;;  %v7013_v62 = vld [vmem:[#allocation5 + $0xd2c] sm:$0xf]  ;;  %v5743_v19 = vor.u32 %v6885_v61, %v5740_v14  ;;  %v5043_v53 = vor.u32 %v6718_v21, %v5042_v43  ;;  %v6958_v61 = vld [vmem:[#allocation5 + $0xb6c] sm:$0xf0]  ;;  %v4979_v14 = vor.u32 %v6702_v5, %v4978_v58  ;;  %v5555_v57 = vor.u32 %v6846_v12, %v5554_v60 }
 0x1f2   :  { %4217 = vmatpush.bf16.msrb.mxu1 %v5423_v51  ;;  %4206 = vmatpush.bf16.msrb.mxu0 %v4783_v30  ;;  %v6252_v15 = vld [vmem:[#allocation5 + $0xd68] sm:$0xf0]  ;;  %v6974_v51 = vld [vmem:[#allocation5 + $0xbec] sm:$0xf0] }
 0x1f3   :  { %4244 = vmatpush.bf16.msrb.mxu3 %v6383_v2  ;;  %v6613_v17 = vld [vmem:[#allocation5 + $0xac] sm:$0xf]  ;;  %v6255_v50 = vor.u32 %v7013_v62, %v6252_v15  ;;  %v3966_v2 = vpop.f32.mrf.mxu1  ;;  %v7086_v62 = vld [vmem:[#allocation5 + $0xf6c] sm:$0xf0] }
 0x1f4   :  { %v4652_v42 = vld [vmem:[#allocation5 + $0xe8] sm:$0xf0]  ;;  %v6654_v43 = vld [vmem:[#allocation5 + $0x1ec] sm:$0xf0] }
 0x1f5   :  { %4232 = vmatpush.bf16.msrb.mxu2 %v5807_v11  ;;  %v6757_v18 = vld [vmem:[#allocation5 + $0x52c] sm:$0xf]  ;;  %v4655_v9 = vor.u32 %v6613_v17, %v4652_v42  ;;  %v6067_v11 = vor.u32 %v6974_v51, %v6066_v49  ;;  %v4914_v17 = vld [vmem:[#allocation5 + $0x2b0] sm:$0xf] }
 0x1f6   :  { %4218 = vmatpush.bf16.msrb.mxu1 %v5359_v7  ;;  %v5228_v24 = vld [vmem:[#allocation5 + $0x568] sm:$0xf0]  ;;  %4207 = vmatpush.bf16.msrb.mxu0 %v4719_v41  ;;  %v6514_v41 = vld [vmem:[#allocation5 + $0xf30] sm:$0xf] }
 0x1f7   :  { %4245 = vmatpush.bf16.msrb.mxu3 %v6319_v40  ;;  %v6869_v25 = vld [vmem:[#allocation5 + $0x8ac] sm:$0xf]  ;;  %v5231_v36 = vor.u32 %v6757_v18, %v5228_v24  ;;  %v6002_v40 = vld [vmem:[#allocation5 + $0xb30] sm:$0xf] }
 0x1f8   :  { %v5676_v54 = vld [vmem:[#allocation5 + $0x8e8] sm:$0xf0]  ;;  %v6686_v42 = vld [vmem:[#allocation5 + $0x2ec] sm:$0xf0] }
 0x1f9   :  { %v6997_v8 = vld [vmem:[#allocation5 + $0xcac] sm:$0xf]  ;;  %4233 = vmatpush.bf16.msrb.mxu2 %v5743_v19  ;;  %v5679_v37 = vor.u32 %v6869_v25, %v5676_v54  ;;  %v6830_v18 = vld [vmem:[#allocation5 + $0x76c] sm:$0xf0]  ;;  %v6515_v19 = vor.u32 %v7086_v62, %v6514_v41  ;;  %v4915_v24 = vor.u32 %v6686_v42, %v4914_v17 }
 0x1fa   :  { %v6188_v10 = vld [vmem:[#allocation5 + $0xce8] sm:$0xf0]  ;;  %4219 = vmatpush.bf16.msrb.mxu1 %v5295_v0  ;;  %4208 = vmatpush.bf16.msrb.mxu0 %v4655_v9  ;;  %v6003_v0 = vor.u32 %v6958_v61, %v6002_v40  ;;  %v7070_v25 = vld [vmem:[#allocation5 + $0xeec] sm:$0xf0] }
 0x1fb   :  { %v6741_v32 = vld [vmem:[#allocation5 + $0x4ac] sm:$0xf]  ;;  %4246 = vmatpush.bf16.msrb.mxu3 %v6255_v50  ;;  %v6191_v39 = vor.u32 %v6997_v8, %v6188_v10  ;;  %v6450_v50 = vld [vmem:[#allocation5 + $0xeb0] sm:$0xf]  ;;  %v5491_v8 = vor.u32 %v6830_v18, %v5490_v48 }
 0x1fc   :  { %v5164_v26 = vld [vmem:[#allocation5 + $0x4e8] sm:$0xf0]  ;;  %v4850_v54 = vld [vmem:[#allocation5 + $0x230] sm:$0xf]  ;;  %v4003_v28 = vpop.f32.mrf.mxu0 }
 0x1fd   :  { %v6597_v31 = vld [vmem:[#allocation5 + $0x2c] sm:$0xf]  ;;  %v5167_v4 = vor.u32 %v6741_v32, %v5164_v26  ;;  %4234 = vmatpush.bf16.msrb.mxu2 %v5679_v37  ;;  %v6670_v9 = vld [vmem:[#allocation5 + $0x26c] sm:$0xf0]  ;;  %v6451_v32 = vor.u32 %v7070_v25, %v6450_v50 }
 0x1fe   :  { %v4588_v55 = vld [vmem:[#allocation5 + $0x68] sm:$0xf0]  ;;  %4220 = vmatpush.bf16.msrb.mxu1 %v5231_v36  ;;  %v5426_v10 = vld [vmem:[#allocation5 + $0x6b0] sm:$0xf] }
 0x1ff   :  { %v6853_v38 = vld [vmem:[#allocation5 + $0x82c] sm:$0xf]  ;;  %v4591_v46 = vor.u32 %v6597_v31, %v4588_v55  ;;  %4247 = vmatpush.bf16.msrb.mxu3 %v6191_v39  ;;  %v5874_v26 = vld [vmem:[#allocation5 + $0xa30] sm:$0xf]  ;;  %v4851_v55 = vor.u32 %v6670_v9, %v4850_v54  ;;  %v5427_v21 = vor.u32 %v6814_v20, %v5426_v10  ;;  %v5044_v20 = vld [vmem:[#allocation5 + $0x3f0] sm:$0xf0] }
 0x200   :  { %v5612_v44 = vld [vmem:[#allocation5 + $0x868] sm:$0xf0]  ;;  %v6926_v31 = vld [vmem:[#allocation5 + $0xa6c] sm:$0xf0] }
 0x201   :  { %v6981_v45 = vld [vmem:[#allocation5 + $0xc2c] sm:$0xf]  ;;  %v5615_v30 = vor.u32 %v6853_v38, %v5612_v44  ;;  %4209 = vmatpush.bf16.msrb.mxu0 %v4591_v46  ;;  %v6386_v36 = vld [vmem:[#allocation5 + $0xe30] sm:$0xf]  ;;  %v5875_v39 = vor.u32 %v6926_v31, %v5874_v26  ;;  %v938_v44 = vperm.slane %v7524_v35, 7 }
 0x202   :  { %v6124_v63 = vld [vmem:[#allocation5 + $0xc68] sm:$0xf0]  ;;  %4221 = vmatpush.bf16.msrb.mxu1 %v5167_v4  ;;  %v7054_v37 = vld [vmem:[#allocation5 + $0xe6c] sm:$0xf0] }
 0x203   :  { %v6725_v34 = vld [vmem:[#allocation5 + $0x42c] sm:$0xf]  ;;  %v6127_v7 = vor.u32 %v6981_v45, %v6124_v63  ;;  %4235 = vmatpush.bf16.msrb.mxu2 %v5615_v30  ;;  %v4786_v38 = vld [vmem:[#allocation5 + $0x1b0] sm:$0xf]  ;;  %v6387_v63 = vor.u32 %v7054_v37, %v6386_v36  ;;  %v4004_v58 = vadd.f32 %v4003_v28, %v938_v44  ;;  %v6580_v44 = vld [vmem:[#allocation5 + $0xff0] sm:$0xf0] }
 0x204   :  { %v5100_v59 = vld [vmem:[#allocation5 + $0x468] sm:$0xf0]  ;;  %4210 = vmatmul.bf16.vlgmr.msrb.gmra.mxu0 %v7450_v23  ;;  %v5362_v22 = vld [vmem:[#allocation5 + $0x630] sm:$0xf]  ;;  %v4787_v51 = vor.u32 %v6654_v43, %v4786_v38  ;;  %v4029_v62 = vpop.f32.mrf.mxu2  ;;  %v4005_v1 = vpop.f32.mrf.mxu0  ;;  %v6966_v38 = vld [vmem:[#allocation5 + $0xbb4] sm:$0xf] }
 0x205   :  { %4254 = vmatpush.bf16.msra.mxu0 %v5043_v53  ;;  %v5103_v15 = vor.u32 %v6725_v34, %v5100_v59  ;;  %4248 = vmatpush.bf16.msrb.mxu3 %v6127_v7  ;;  %v6798_v45 = vld [vmem:[#allocation5 + $0x66c] sm:$0xf0]  ;;  %v6068_v43 = vld [vmem:[#allocation5 + $0xbf0] sm:$0xf0] }
 0x206   :  { %4236 = vmatmul.bf16.vlgmr.msrb.gmra.mxu2 %v7430_v13  ;;  %v5810_v46 = vld [vmem:[#allocation5 + $0x9b0] sm:$0xf]  ;;  %v5363_v3 = vor.u32 %v6798_v45, %v5362_v22  ;;  %v4042_v48 = vpop.f32.mrf.mxu3 }
 0x207   :  { %4280 = vmatpush.bf16.msra.mxu2 %v6067_v11  ;;  %4222 = vmatpush.bf16.msrb.mxu1 %v5103_v15  ;;  %v6910_v49 = vld [vmem:[#allocation5 + $0x9ec] sm:$0xf0] }
 0x208   :  { %4249 = vmatmul.bf16.vlgmr.msrb.gmra.mxu3 %v7440_v29  ;;  %v6322_v27 = vld [vmem:[#allocation5 + $0xdb0] sm:$0xf]  ;;  %v5811_v30 = vor.u32 %v6910_v49, %v5810_v46  ;;  %v6694_v49 = vld [vmem:[#allocation5 + $0x334] sm:$0xf] }
 0x209   :  { %4293 = vmatpush.bf16.msra.mxu3 %v6579_v52  ;;  %4255 = vmatpush.bf16.msra.mxu0 %v4979_v14  ;;  %v7038_v53 = vld [vmem:[#allocation5 + $0xdec] sm:$0xf0]  ;;  %v4016_v52 = vpop.f32.mrf.mxu1 }
 0x20a   :  { %4223 = vmatmul.bf16.vlgmr.msrb.gmra.mxu1 %v7463_v33  ;;  %v4722_v56 = vld [vmem:[#allocation5 + $0x130] sm:$0xf]  ;;  %v6323_v5 = vor.u32 %v7038_v53, %v6322_v27  ;;  %v4017_v41 = vadd.f32 %v4016_v52, %v4004_v58  ;;  %v6822_v52 = vld [vmem:[#allocation5 + $0x734] sm:$0xf] }
 0x20b   :  { %4267 = vmatpush.bf16.msra.mxu1 %v5555_v57  ;;  %4281 = vmatpush.bf16.msra.mxu2 %v6003_v0  ;;  %v6638_v2 = vld [vmem:[#allocation5 + $0x16c] sm:$0xf0] }
 0x20c   :  { %v5298_v4 = vld [vmem:[#allocation5 + $0x5b0] sm:$0xf]  ;;  %v4723_v59 = vor.u32 %v6638_v2, %v4722_v56  ;;  %v4030_v47 = vadd.f32 %v4029_v62, %v4017_v41  ;;  %v4031_v27 = vpop.f32.mrf.mxu2  ;;  %v6838_v2 = vld [vmem:[#allocation5 + $0x7b4] sm:$0xf] }
 0x20d   :  { %4294 = vmatpush.bf16.msra.mxu3 %v6515_v19  ;;  %4256 = vmatpush.bf16.msra.mxu0 %v4915_v24  ;;  %v6782_v35 = vld [vmem:[#allocation5 + $0x5ec] sm:$0xf0]  ;;  %v6934_v41 = vld [vmem:[#allocation5 + $0xab4] sm:$0xf] }
 0x20e   :  { %v5746_v6 = vld [vmem:[#allocation5 + $0x930] sm:$0xf]  ;;  %v5299_v40 = vor.u32 %v6782_v35, %v5298_v4  ;;  %v4044_v4 = vpop.f32.mrf.mxu3  ;;  %v6950_v35 = vld [vmem:[#allocation5 + $0xb34] sm:$0xf] }
 0x20f   :  { %4268 = vmatpush.bf16.msra.mxu1 %v5491_v8  ;;  %4282 = vmatpush.bf16.msra.mxu2 %v5939_v16  ;;  %v6894_v34 = vld [vmem:[#allocation5 + $0x96c] sm:$0xf0]  ;;  %v6710_v16 = vld [vmem:[#allocation5 + $0x3b4] sm:$0xf] }
 0x210   :  { %v6258_v7 = vld [vmem:[#allocation5 + $0xd30] sm:$0xf]  ;;  %v5747_v14 = vor.u32 %v6894_v34, %v5746_v6  ;;  %v5047_v22 = vor.u32 %v6710_v16, %v5044_v20  ;;  %v7078_v34 = vld [vmem:[#allocation5 + $0xf34] sm:$0xf] }
 0x211   :  { %4295 = vmatpush.bf16.msra.mxu3 %v6451_v32  ;;  %4257 = vmatpush.bf16.msra.mxu0 %v4851_v55  ;;  %v7022_v60 = vld [vmem:[#allocation5 + $0xd6c] sm:$0xf0]  ;;  %v4043_v32 = vadd.f32 %v4042_v48, %v4030_v47  ;;  %v4018_v45 = vpop.f32.mrf.mxu1  ;;  %v5940_v62 = vld [vmem:[#allocation5 + $0xaf0] sm:$0xf0] }
 0x212   :  { %v4658_v11 = vld [vmem:[#allocation5 + $0xb0] sm:$0xf]  ;;  %v6259_v17 = vor.u32 %v7022_v60, %v6258_v7  ;;  %v6678_v60 = vld [vmem:[#allocation5 + $0x2b4] sm:$0xf]  ;;  %v5943_v47 = vor.u32 %v6934_v41, %v5940_v62 }
 0x213   :  { %4269 = vmatpush.bf16.msra.mxu1 %v5427_v21  ;;  %4283 = vmatpush.bf16.msra.mxu2 %v5875_v39  ;;  %v6622_v12 = vld [vmem:[#allocation5 + $0xec] sm:$0xf0]  ;;  %4469 = vst [vmem:[#allocation8 + $0x38] sm:$0xff] %v4043_v32  ;;  %v4485_v21 = vmax.f32 %v4043_v32, 0.0  ;;  %v7094_v39 = vld [vmem:[#allocation5 + $0xfb4] sm:$0xf] }
 0x214   :  { %v5234_v61 = vld [vmem:[#allocation5 + $0x530] sm:$0xf]  ;;  %v4659_v0 = vor.u32 %v6622_v12, %v4658_v11  ;;  %v6583_v58 = vor.u32 %v7094_v39, %v6580_v44  ;;  %v4916_v11 = vld [vmem:[#allocation5 + $0x2f0] sm:$0xf0] }
 0x215   :  { %4296 = vmatpush.bf16.msra.mxu3 %v6387_v63  ;;  %4258 = vmatpush.bf16.msra.mxu0 %v4787_v51  ;;  %v6766_v15 = vld [vmem:[#allocation5 + $0x56c] sm:$0xf0]  ;;  %v4980_v51 = vld [vmem:[#allocation5 + $0x370] sm:$0xf0]  ;;  %4501 = vst [vmem:[#allocation9 + $0x38] sm:$0xff] %v4485_v21 }
 0x216   :  { %v5682_v42 = vld [vmem:[#allocation5 + $0x8b0] sm:$0xf]  ;;  %v5235_v9 = vor.u32 %v6766_v15, %v5234_v61  ;;  %v4983_v6 = vor.u32 %v6694_v49, %v4980_v51  ;;  %v5492_v61 = vld [vmem:[#allocation5 + $0x770] sm:$0xf0]  ;;  %v4919_v15 = vor.u32 %v6678_v60, %v4916_v11 }
 0x217   :  { %4270 = vmatpush.bf16.msra.mxu1 %v5363_v3  ;;  %4284 = vmatpush.bf16.msra.mxu2 %v5811_v30  ;;  %v6878_v57 = vld [vmem:[#allocation5 + $0x8ec] sm:$0xf0]  ;;  %v6071_v3 = vor.u32 %v6966_v38, %v6068_v43  ;;  %v5556_v30 = vld [vmem:[#allocation5 + $0x7f0] sm:$0xf0] }
 0x218   :  { %v6194_v18 = vld [vmem:[#allocation5 + $0xcb0] sm:$0xf]  ;;  %v5683_v8 = vor.u32 %v6878_v57, %v5682_v42  ;;  %v5559_v12 = vor.u32 %v6838_v2, %v5556_v30  ;;  %v6452_v42 = vld [vmem:[#allocation5 + $0xef0] sm:$0xf0] }
 0x219   :  { %4297 = vmatpush.bf16.msra.mxu3 %v6323_v5  ;;  %4259 = vmatpush.bf16.msra.mxu0 %v4723_v59  ;;  %v7006_v19 = vld [vmem:[#allocation5 + $0xcec] sm:$0xf0]  ;;  %v6004_v5 = vld [vmem:[#allocation5 + $0xb70] sm:$0xf0] }
 0x21a   :  { %v5170_v24 = vld [vmem:[#allocation5 + $0x4b0] sm:$0xf]  ;;  %v6195_v26 = vor.u32 %v7006_v19, %v6194_v18  ;;  %v6516_v59 = vld [vmem:[#allocation5 + $0xf70] sm:$0xf0] }
 0x21b   :  { %v6750_v50 = vld [vmem:[#allocation5 + $0x4ec] sm:$0xf0]  ;;  %4271 = vmatpush.bf16.msra.mxu1 %v5299_v40  ;;  %4285 = vmatpush.bf16.msra.mxu2 %v5747_v14  ;;  %v6007_v40 = vor.u32 %v6950_v35, %v6004_v5  ;;  %v6519_v14 = vor.u32 %v7078_v34, %v6516_v59  ;;  %v6662_v57 = vld [vmem:[#allocation5 + $0x234] sm:$0xf] }
 0x21c   :  { %v4594_v25 = vld [vmem:[#allocation5 + $0x30] sm:$0xf]  ;;  %v5171_v63 = vor.u32 %v6750_v50, %v5170_v24  ;;  %v4852_v48 = vld [vmem:[#allocation5 + $0x270] sm:$0xf0] }
 0x21d   :  { %v6606_v54 = vld [vmem:[#allocation5 + $0x6c] sm:$0xf0]  ;;  %4298 = vmatpush.bf16.msra.mxu3 %v6259_v17  ;;  %4260 = vmatpush.bf16.msra.mxu0 %v4659_v0  ;;  %v7062_v17 = vld [vmem:[#allocation5 + $0xeb4] sm:$0xf]  ;;  %v5495_v0 = vor.u32 %v6822_v52, %v5492_v61 }
 0x21e   :  { %v5618_v10 = vld [vmem:[#allocation5 + $0x830] sm:$0xf]  ;;  %v4595_v37 = vor.u32 %v6606_v54, %v4594_v25  ;;  %v6806_v18 = vld [vmem:[#allocation5 + $0x6b4] sm:$0xf]  ;;  %v6455_v1 = vor.u32 %v7062_v17, %v6452_v42  ;;  %v7540_v25 = vld [vmem:[#allocation7 + $0x8] sm:$0xff]  ;;  %v4855_v54 = vor.u32 %v6662_v57, %v4852_v48  ;;  %v4055_v39 = vpop.f32.mrf.mxu0 }
 0x21f   :  { %v6862_v31 = vld [vmem:[#allocation5 + $0x86c] sm:$0xf0]  ;;  %4272 = vmatpush.bf16.msra.mxu1 %v5235_v9  ;;  %4286 = vmatpush.bf16.msra.mxu2 %v5683_v8  ;;  %v5428_v19 = vld [vmem:[#allocation5 + $0x6f0] sm:$0xf0] }
 0x220   :  { %v6130_v55 = vld [vmem:[#allocation5 + $0xc30] sm:$0xf]  ;;  %v5619_v46 = vor.u32 %v6862_v31, %v5618_v10  ;;  %v6918_v24 = vld [vmem:[#allocation5 + $0xa34] sm:$0xf]  ;;  %v5431_v20 = vor.u32 %v6806_v18, %v5428_v19  ;;  %v939_v31 = vperm.slane %v7540_v25, 0 }
 0x221   :  { %v6990_v36 = vld [vmem:[#allocation5 + $0xc6c] sm:$0xf0]  ;;  %4299 = vmatpush.bf16.msra.mxu3 %v6195_v26  ;;  %4261 = vmatpush.bf16.msra.mxu0 %v4595_v37  ;;  %v5876_v50 = vld [vmem:[#allocation5 + $0xa70] sm:$0xf0] }
 0x222   :  { %v5106_v53 = vld [vmem:[#allocation5 + $0x430] sm:$0xf]  ;;  %v6131_v56 = vor.u32 %v6990_v36, %v6130_v55  ;;  %v7046_v9 = vld [vmem:[#allocation5 + $0xe34] sm:$0xf]  ;;  %v5879_v26 = vor.u32 %v6918_v24, %v5876_v50  ;;  %v4056_v51 = vadd.f32 %v4055_v39, %v939_v31  ;;  %v6586_v31 = vld [vmem:[#allocation5 + $0xfb8] sm:$0xf] }
 0x223   :  { %v6734_v28 = vld [vmem:[#allocation5 + $0x46c] sm:$0xf0]  ;;  %4273 = vmatpush.bf16.msra.mxu1 %v5171_v63  ;;  %4287 = vmatpush.bf16.msra.mxu2 %v5619_v46  ;;  %v6388_v8 = vld [vmem:[#allocation5 + $0xe70] sm:$0xf0] }
 0x224   :  { %v5107_v7 = vor.u32 %v6734_v28, %v5106_v53  ;;  %4262 = vmatmul.bf16.vlgmr.msra.gmra.mxu0 %v7450_v23  ;;  %v6646_v10 = vld [vmem:[#allocation5 + $0x1b4] sm:$0xf]  ;;  %v6391_v36 = vor.u32 %v7046_v9, %v6388_v8 }
 0x225   :  { %4306 = vmatpush.bf16.msrb.mxu0 %v5047_v22  ;;  %4300 = vmatpush.bf16.msra.mxu3 %v6131_v56  ;;  %v4788_v16 = vld [vmem:[#allocation5 + $0x1f0] sm:$0xf0] }
 0x226   :  { %4288 = vmatmul.bf16.vlgmr.msra.gmra.mxu2 %v7430_v13  ;;  %v6790_v32 = vld [vmem:[#allocation5 + $0x634] sm:$0xf]  ;;  %v4791_v43 = vor.u32 %v6646_v10, %v4788_v16  ;;  %v4068_v35 = vpop.f32.mrf.mxu1  ;;  %v4081_v52 = vpop.f32.mrf.mxu2  ;;  %v6074_v16 = vld [vmem:[#allocation5 + $0xbb8] sm:$0xf] }
 0x227   :  { %4332 = vmatpush.bf16.msrb.mxu2 %v6071_v3  ;;  %4274 = vmatpush.bf16.msra.mxu1 %v5107_v7  ;;  %v5364_v55 = vld [vmem:[#allocation5 + $0x670] sm:$0xf0]  ;;  %v4069_v59 = vadd.f32 %v4068_v35, %v4056_v51 }
 0x228   :  { %4301 = vmatmul.bf16.vlgmr.msra.gmra.mxu3 %v7440_v29  ;;  %v6902_v37 = vld [vmem:[#allocation5 + $0x9b4] sm:$0xf]  ;;  %v5367_v63 = vor.u32 %v6790_v32, %v5364_v55  ;;  %v7103_v55 = vld [vmem:[#allocation5 + $0xff4] sm:$0xf0] }
 0x229   :  { %4345 = vmatpush.bf16.msrb.mxu3 %v6583_v58  ;;  %4307 = vmatpush.bf16.msrb.mxu0 %v4983_v6  ;;  %v5812_v38 = vld [vmem:[#allocation5 + $0x9f0] sm:$0xf0]  ;;  %v4082_v41 = vadd.f32 %v4081_v52, %v4069_v59  ;;  %v6587_v51 = vor.u32 %v7103_v55, %v6586_v31  ;;  %v7071_v52 = vld [vmem:[#allocation5 + $0xef4] sm:$0xf0] }
 0x22a   :  { %4275 = vmatmul.bf16.vlgmr.msra.gmra.mxu1 %v7463_v33  ;;  %v7030_v21 = vld [vmem:[#allocation5 + $0xdb4] sm:$0xf]  ;;  %v5815_v49 = vor.u32 %v6902_v37, %v5812_v38  ;;  %v4730_v55 = vld [vmem:[#allocation5 + $0x138] sm:$0xf] }
 0x22b   :  { %4319 = vmatpush.bf16.msrb.mxu1 %v5559_v12  ;;  %4333 = vmatpush.bf16.msrb.mxu2 %v6007_v40  ;;  %v6324_v22 = vld [vmem:[#allocation5 + $0xdf0] sm:$0xf0]  ;;  %v4094_v62 = vpop.f32.mrf.mxu3 }
 0x22c   :  { %v6630_v44 = vld [vmem:[#allocation5 + $0x134] sm:$0xf]  ;;  %v6327_v53 = vor.u32 %v7030_v21, %v6324_v22  ;;  %v4095_v24 = vadd.f32 %v4094_v62, %v4082_v41  ;;  %v6703_v21 = vld [vmem:[#allocation5 + $0x374] sm:$0xf0] }
 0x22d   :  { %4346 = vmatpush.bf16.msrb.mxu3 %v6519_v14  ;;  %4308 = vmatpush.bf16.msrb.mxu0 %v4919_v15  ;;  %v4724_v45 = vld [vmem:[#allocation5 + $0x170] sm:$0xf0]  ;;  %v4057_v15 = vpop.f32.mrf.mxu0  ;;  %v5434_v41 = vld [vmem:[#allocation5 + $0x6b8] sm:$0xf] }
 0x22e   :  { %v6774_v46 = vld [vmem:[#allocation5 + $0x5b4] sm:$0xf]  ;;  %v4727_v2 = vor.u32 %v6630_v44, %v4724_v45  ;;  %4470 = vst [vmem:[#allocation8 + $0x40] sm:$0xff] %v4095_v24  ;;  %v4486_v32 = vmax.f32 %v4095_v24, 0.0  ;;  %v5562_v45 = vld [vmem:[#allocation5 + $0x7b8] sm:$0xf] }
 0x22f   :  { %4320 = vmatpush.bf16.msrb.mxu1 %v5495_v0  ;;  %4334 = vmatpush.bf16.msrb.mxu2 %v5943_v47  ;;  %v5300_v27 = vld [vmem:[#allocation5 + $0x5f0] sm:$0xf0]  ;;  %v5050_v47 = vld [vmem:[#allocation5 + $0x3b8] sm:$0xf] }
 0x230   :  { %v6886_v28 = vld [vmem:[#allocation5 + $0x934] sm:$0xf]  ;;  %v5303_v5 = vor.u32 %v6774_v46, %v5300_v27  ;;  %4502 = vst [vmem:[#allocation9 + $0x40] sm:$0xff] %v4486_v32  ;;  %v4083_v46 = vpop.f32.mrf.mxu2  ;;  %v6010_v27 = vld [vmem:[#allocation5 + $0xb38] sm:$0xf] }
 0x231   :  { %4347 = vmatpush.bf16.msrb.mxu3 %v6455_v1  ;;  %4309 = vmatpush.bf16.msrb.mxu0 %v4855_v54  ;;  %v5748_v56 = vld [vmem:[#allocation5 + $0x970] sm:$0xf0]  ;;  %v6719_v1 = vld [vmem:[#allocation5 + $0x3f4] sm:$0xf0] }
 0x232   :  { %v7014_v3 = vld [vmem:[#allocation5 + $0xd34] sm:$0xf]  ;;  %v5751_v34 = vor.u32 %v6886_v28, %v5748_v56  ;;  %v6815_v15 = vld [vmem:[#allocation5 + $0x6f4] sm:$0xf0] }
 0x233   :  { %4321 = vmatpush.bf16.msrb.mxu1 %v5431_v20  ;;  %4335 = vmatpush.bf16.msrb.mxu2 %v5879_v26  ;;  %v6260_v4 = vld [vmem:[#allocation5 + $0xd70] sm:$0xf0]  ;;  %v6975_v20 = vld [vmem:[#allocation5 + $0xbf4] sm:$0xf0]  ;;  %v5051_v26 = vor.u32 %v6719_v1, %v5050_v47  ;;  %v4096_v28 = vpop.f32.mrf.mxu3  ;;  %v5435_v1 = vor.u32 %v6815_v15, %v5434_v41  ;;  %v6711_v15 = vld [vmem:[#allocation5 + $0x3bc] sm:$0xf] }
 0x234   :  { %v6614_v30 = vld [vmem:[#allocation5 + $0xb4] sm:$0xf]  ;;  %v6263_v60 = vor.u32 %v7014_v3, %v6260_v4  ;;  %v7087_v3 = vld [vmem:[#allocation5 + $0xf74] sm:$0xf0] }
 0x235   :  { %4348 = vmatpush.bf16.msrb.mxu3 %v6391_v36  ;;  %4310 = vmatpush.bf16.msrb.mxu0 %v4791_v43  ;;  %v4660_v58 = vld [vmem:[#allocation5 + $0xf0] sm:$0xf0]  ;;  %v4070_v36 = vpop.f32.mrf.mxu1  ;;  %v4986_v43 = vld [vmem:[#allocation5 + $0x338] sm:$0xf] }
 0x236   :  { %v6758_v6 = vld [vmem:[#allocation5 + $0x534] sm:$0xf]  ;;  %v4663_v40 = vor.u32 %v6614_v30, %v4660_v58  ;;  %v4987_v56 = vor.u32 %v6703_v21, %v4986_v43  ;;  %v4922_v30 = vld [vmem:[#allocation5 + $0x2b8] sm:$0xf] }
 0x237   :  { %4322 = vmatpush.bf16.msrb.mxu1 %v5367_v63  ;;  %4336 = vmatpush.bf16.msrb.mxu2 %v5815_v49  ;;  %v5236_v7 = vld [vmem:[#allocation5 + $0x570] sm:$0xf0]  ;;  %v6075_v63 = vor.u32 %v6975_v20, %v6074_v16  ;;  %v6847_v49 = vld [vmem:[#allocation5 + $0x7f4] sm:$0xf0] }
 0x238   :  { %v6870_v11 = vld [vmem:[#allocation5 + $0x8b4] sm:$0xf]  ;;  %v5239_v0 = vor.u32 %v6758_v6, %v5236_v7  ;;  %v6687_v58 = vld [vmem:[#allocation5 + $0x2f4] sm:$0xf0]  ;;  %v5563_v35 = vor.u32 %v6847_v49, %v5562_v45 }
 0x239   :  { %4349 = vmatpush.bf16.msrb.mxu3 %v6327_v53  ;;  %v5684_v12 = vld [vmem:[#allocation5 + $0x8f0] sm:$0xf0]  ;;  %4311 = vmatpush.bf16.msrb.mxu0 %v4727_v2  ;;  %v6959_v53 = vld [vmem:[#allocation5 + $0xb74] sm:$0xf0] }
 0x23a   :  { %v6998_v61 = vld [vmem:[#allocation5 + $0xcb4] sm:$0xf]  ;;  %v5687_v18 = vor.u32 %v6870_v11, %v5684_v12  ;;  %v6522_v2 = vld [vmem:[#allocation5 + $0xf38] sm:$0xf]  ;;  %v6011_v6 = vor.u32 %v6959_v53, %v6010_v27  ;;  %v4923_v11 = vor.u32 %v6687_v58, %v4922_v30 }
 0x23b   :  { %v6196_v14 = vld [vmem:[#allocation5 + $0xcf0] sm:$0xf0]  ;;  %4323 = vmatpush.bf16.msrb.mxu1 %v5303_v5  ;;  %4337 = vmatpush.bf16.msrb.mxu2 %v5751_v34  ;;  %v5498_v5 = vld [vmem:[#allocation5 + $0x738] sm:$0xf]  ;;  %v6523_v59 = vor.u32 %v7087_v3, %v6522_v2 }
 0x23c   :  { %v6742_v17 = vld [vmem:[#allocation5 + $0x4b4] sm:$0xf]  ;;  %v6199_v50 = vor.u32 %v6998_v61, %v6196_v14  ;;  %v6831_v34 = vld [vmem:[#allocation5 + $0x774] sm:$0xf0] }
 0x23d   :  { %v5172_v42 = vld [vmem:[#allocation5 + $0x4f0] sm:$0xf0]  ;;  %4350 = vmatpush.bf16.msrb.mxu3 %v6263_v60  ;;  %4312 = vmatpush.bf16.msrb.mxu0 %v4663_v40  ;;  %v5946_v7 = vld [vmem:[#allocation5 + $0xab8] sm:$0xf]  ;;  %v5499_v14 = vor.u32 %v6831_v34, %v5498_v5 }
 0x23e   :  { %v6598_v57 = vld [vmem:[#allocation5 + $0x34] sm:$0xf]  ;;  %v5175_v37 = vor.u32 %v6742_v17, %v5172_v42  ;;  %v6943_v60 = vld [vmem:[#allocation5 + $0xaf4] sm:$0xf0]  ;;  %v4107_v31 = vpop.f32.mrf.mxu0 }
 0x23f   :  { %v4596_v48 = vld [vmem:[#allocation5 + $0x70] sm:$0xf0]  ;;  %4324 = vmatpush.bf16.msrb.mxu1 %v5239_v0  ;;  %4338 = vmatpush.bf16.msrb.mxu2 %v5687_v18  ;;  %v6458_v12 = vld [vmem:[#allocation5 + $0xeb8] sm:$0xf]  ;;  %v5947_v62 = vor.u32 %v6943_v60, %v5946_v7 }
 0x240   :  { %v6854_v19 = vld [vmem:[#allocation5 + $0x834] sm:$0xf]  ;;  %v4599_v10 = vor.u32 %v6598_v57, %v4596_v48  ;;  %v4858_v40 = vld [vmem:[#allocation5 + $0x238] sm:$0xf]  ;;  %v6459_v17 = vor.u32 %v7071_v52, %v6458_v12 }
 0x241   :  { %v5620_v54 = vld [vmem:[#allocation5 + $0x870] sm:$0xf0]  ;;  %4351 = vmatpush.bf16.msrb.mxu3 %v6199_v50  ;;  %v6671_v61 = vld [vmem:[#allocation5 + $0x274] sm:$0xf0] }
 0x242   :  { %v6982_v9 = vld [vmem:[#allocation5 + $0xc34] sm:$0xf]  ;;  %v5623_v38 = vor.u32 %v6854_v19, %v5620_v54  ;;  %4313 = vmatpush.bf16.msrb.mxu0 %v4599_v10  ;;  %v5882_v42 = vld [vmem:[#allocation5 + $0xa38] sm:$0xf]  ;;  %v4859_v48 = vor.u32 %v6671_v61, %v4858_v40  ;;  %v940_v54 = vperm.slane %v7540_v25, 1 }
 0x243   :  { %v6132_v8 = vld [vmem:[#allocation5 + $0xc70] sm:$0xf0]  ;;  %4325 = vmatpush.bf16.msrb.mxu1 %v5175_v37  ;;  %v6927_v57 = vld [vmem:[#allocation5 + $0xa74] sm:$0xf0] }
 0x244   :  { %v6726_v22 = vld [vmem:[#allocation5 + $0x434] sm:$0xf]  ;;  %v6135_v44 = vor.u32 %v6982_v9, %v6132_v8  ;;  %4339 = vmatpush.bf16.msrb.mxu2 %v5623_v38  ;;  %v6394_v0 = vld [vmem:[#allocation5 + $0xe38] sm:$0xf]  ;;  %v5883_v50 = vor.u32 %v6927_v57, %v5882_v42  ;;  %v4108_v21 = vadd.f32 %v4107_v31, %v940_v54  ;;  %v7095_v54 = vld [vmem:[#allocation5 + $0xfbc] sm:$0xf] }
 0x245   :  { %v5108_v39 = vld [vmem:[#allocation5 + $0x470] sm:$0xf0]  ;;  %4314 = vmatmul.bf16.vlgmr.msrb.gmra.mxu0 %v7450_v23  ;;  %v7055_v18 = vld [vmem:[#allocation5 + $0xe74] sm:$0xf0] }
 0x246   :  { %4358 = vmatpush.bf16.msra.mxu0 %v5051_v26  ;;  %v5111_v4 = vor.u32 %v6726_v22, %v5108_v39  ;;  %4352 = vmatpush.bf16.msrb.mxu3 %v6135_v44  ;;  %v4794_v19 = vld [vmem:[#allocation5 + $0x1b8] sm:$0xf]  ;;  %v6395_v8 = vor.u32 %v7055_v18, %v6394_v0  ;;  %v4120_v53 = vpop.f32.mrf.mxu1  ;;  %v4133_v5 = vpop.f32.mrf.mxu2 }
 0x247   :  { %4340 = vmatmul.bf16.vlgmr.msrb.gmra.mxu2 %v7430_v13  ;;  %v6655_v47 = vld [vmem:[#allocation5 + $0x1f4] sm:$0xf0]  ;;  %v4121_v3 = vadd.f32 %v4120_v53, %v4108_v21 }
 0x248   :  { %4384 = vmatpush.bf16.msra.mxu2 %v6075_v63  ;;  %4326 = vmatpush.bf16.msrb.mxu1 %v5111_v4  ;;  %v5370_v24 = vld [vmem:[#allocation5 + $0x638] sm:$0xf]  ;;  %v4795_v20 = vor.u32 %v6655_v47, %v4794_v19  ;;  %v6967_v47 = vld [vmem:[#allocation5 + $0xbbc] sm:$0xf] }
 0x249   :  { %4353 = vmatmul.bf16.vlgmr.msrb.gmra.mxu3 %v7440_v29  ;;  %v6799_v9 = vld [vmem:[#allocation5 + $0x674] sm:$0xf0]  ;;  %v4134_v7 = vadd.f32 %v4133_v5, %v4121_v3  ;;  %v6460_v5 = vld [vmem:[#allocation5 + $0xef8] sm:$0xf0] }
 0x24a   :  { %4397 = vmatpush.bf16.msra.mxu3 %v6587_v51  ;;  %4359 = vmatpush.bf16.msra.mxu0 %v4987_v56  ;;  %v5818_v10 = vld [vmem:[#allocation5 + $0x9b8] sm:$0xf]  ;;  %v5371_v37 = vor.u32 %v6799_v9, %v5370_v24  ;;  %v6588_v9 = vld [vmem:[#allocation5 + $0xff8] sm:$0xf0] }
 0x24b   :  { %4327 = vmatmul.bf16.vlgmr.msrb.gmra.mxu1 %v7463_v33  ;;  %v6911_v16 = vld [vmem:[#allocation5 + $0x9f4] sm:$0xf0]  ;;  %v4146_v60 = vpop.f32.mrf.mxu3  ;;  %v6591_v21 = vor.u32 %v7095_v54, %v6588_v9  ;;  %v6631_v9 = vld [vmem:[#allocation5 + $0x13c] sm:$0xf] }
 0x24c   :  { %4371 = vmatpush.bf16.msra.mxu1 %v5563_v35  ;;  %4385 = vmatpush.bf16.msra.mxu2 %v6011_v6  ;;  %v6330_v32 = vld [vmem:[#allocation5 + $0xdb8] sm:$0xf]  ;;  %v5819_v43 = vor.u32 %v6911_v16, %v5818_v10  ;;  %v4147_v42 = vadd.f32 %v4146_v60, %v4134_v7  ;;  %v6807_v7 = vld [vmem:[#allocation5 + $0x6bc] sm:$0xf] }
 0x24d   :  { %v7039_v26 = vld [vmem:[#allocation5 + $0xdf4] sm:$0xf0] }
 0x24e   :  { %4398 = vmatpush.bf16.msra.mxu3 %v6523_v59  ;;  %4360 = vmatpush.bf16.msra.mxu0 %v4923_v11  ;;  %v6639_v36 = vld [vmem:[#allocation5 + $0x174] sm:$0xf0]  ;;  %v6331_v39 = vor.u32 %v7039_v26, %v6330_v32  ;;  %v4109_v11 = vpop.f32.mrf.mxu0  ;;  %4471 = vst [vmem:[#allocation8 + $0x48] sm:$0xff] %v4147_v42  ;;  %v4487_v24 = vmax.f32 %v4147_v42, 0.0  ;;  %v4988_v32 = vld [vmem:[#allocation5 + $0x378] sm:$0xf0] }
 0x24f   :  { %v5306_v38 = vld [vmem:[#allocation5 + $0x5b8] sm:$0xf]  ;;  %v4731_v63 = vor.u32 %v6639_v36, %v4730_v55  ;;  %v6839_v36 = vld [vmem:[#allocation5 + $0x7bc] sm:$0xf] }
 0x250   :  { %4372 = vmatpush.bf16.msra.mxu1 %v5499_v14  ;;  %4386 = vmatpush.bf16.msra.mxu2 %v5947_v62  ;;  %v6783_v22 = vld [vmem:[#allocation5 + $0x5f4] sm:$0xf0]  ;;  %4503 = vst [vmem:[#allocation9 + $0x48] sm:$0xff] %v4487_v24  ;;  %v5436_v11 = vld [vmem:[#allocation5 + $0x6f8] sm:$0xf0] }
 0x251   :  { %v5754_v44 = vld [vmem:[#allocation5 + $0x938] sm:$0xf]  ;;  %v5307_v28 = vor.u32 %v6783_v22, %v5306_v38  ;;  %v4135_v38 = vpop.f32.mrf.mxu2  ;;  %v6951_v22 = vld [vmem:[#allocation5 + $0xb3c] sm:$0xf] }
 0x252   :  { %4399 = vmatpush.bf16.msra.mxu3 %v6459_v17  ;;  %4361 = vmatpush.bf16.msra.mxu0 %v4859_v48  ;;  %v6895_v45 = vld [vmem:[#allocation5 + $0x974] sm:$0xf0]  ;;  %v5052_v17 = vld [vmem:[#allocation5 + $0x3f8] sm:$0xf0] }
 0x253   :  { %v6266_v46 = vld [vmem:[#allocation5 + $0xd38] sm:$0xf]  ;;  %v5755_v2 = vor.u32 %v6895_v45, %v5754_v44  ;;  %v4148_v44 = vpop.f32.mrf.mxu3  ;;  %v6791_v42 = vld [vmem:[#allocation5 + $0x63c] sm:$0xf] }
 0x254   :  { %4373 = vmatpush.bf16.msra.mxu1 %v5435_v1  ;;  %4387 = vmatpush.bf16.msra.mxu2 %v5883_v50  ;;  %v7023_v49 = vld [vmem:[#allocation5 + $0xd74] sm:$0xf0]  ;;  %v6076_v1 = vld [vmem:[#allocation5 + $0xbf8] sm:$0xf0]  ;;  %v5055_v50 = vor.u32 %v6711_v15, %v5052_v17  ;;  %v5439_v17 = vor.u32 %v6807_v7, %v5436_v11 }
 0x255   :  { %v4666_v51 = vld [vmem:[#allocation5 + $0xb8] sm:$0xf]  ;;  %v6267_v30 = vor.u32 %v7023_v49, %v6266_v46  ;;  %v6524_v46 = vld [vmem:[#allocation5 + $0xf78] sm:$0xf0] }
 0x256   :  { %4400 = vmatpush.bf16.msra.mxu3 %v6395_v8  ;;  %4362 = vmatpush.bf16.msra.mxu0 %v4795_v20  ;;  %v6623_v27 = vld [vmem:[#allocation5 + $0xf4] sm:$0xf0]  ;;  %v4122_v8 = vpop.f32.mrf.mxu1  ;;  %v6695_v20 = vld [vmem:[#allocation5 + $0x33c] sm:$0xf] }
 0x257   :  { %v5242_v56 = vld [vmem:[#allocation5 + $0x538] sm:$0xf]  ;;  %v4667_v6 = vor.u32 %v6623_v27, %v4666_v51  ;;  %v4991_v45 = vor.u32 %v6695_v20, %v4988_v32  ;;  %v6679_v51 = vld [vmem:[#allocation5 + $0x2bc] sm:$0xf] }
 0x258   :  { %4374 = vmatpush.bf16.msra.mxu1 %v5371_v37  ;;  %4388 = vmatpush.bf16.msra.mxu2 %v5819_v43  ;;  %v6767_v4 = vld [vmem:[#allocation5 + $0x574] sm:$0xf0]  ;;  %v6079_v37 = vor.u32 %v6967_v47, %v6076_v1  ;;  %v5564_v43 = vld [vmem:[#allocation5 + $0x7f8] sm:$0xf0] }
 0x259   :  { %v5690_v58 = vld [vmem:[#allocation5 + $0x8b8] sm:$0xf]  ;;  %v5243_v14 = vor.u32 %v6767_v4, %v5242_v56  ;;  %v4924_v27 = vld [vmem:[#allocation5 + $0x2f8] sm:$0xf0]  ;;  %v5567_v53 = vor.u32 %v6839_v36, %v5564_v43 }
 0x25a   :  { %4401 = vmatpush.bf16.msra.mxu3 %v6331_v39  ;;  %v6879_v35 = vld [vmem:[#allocation5 + $0x8f4] sm:$0xf0]  ;;  %4363 = vmatpush.bf16.msra.mxu0 %v4731_v63  ;;  %v6012_v39 = vld [vmem:[#allocation5 + $0xb78] sm:$0xf0] }
 0x25b   :  { %v6202_v34 = vld [vmem:[#allocation5 + $0xcb8] sm:$0xf]  ;;  %v5691_v41 = vor.u32 %v6879_v35, %v5690_v58  ;;  %v7079_v63 = vld [vmem:[#allocation5 + $0xf3c] sm:$0xf]  ;;  %v6015_v56 = vor.u32 %v6951_v22, %v6012_v39  ;;  %v4927_v58 = vor.u32 %v6679_v51, %v4924_v27 }
 0x25c   :  { %v7007_v59 = vld [vmem:[#allocation5 + $0xcf4] sm:$0xf0]  ;;  %4375 = vmatpush.bf16.msra.mxu1 %v5307_v28  ;;  %4389 = vmatpush.bf16.msra.mxu2 %v5755_v2  ;;  %v6823_v28 = vld [vmem:[#allocation5 + $0x73c] sm:$0xf]  ;;  %v6527_v3 = vor.u32 %v7079_v63, %v6524_v46 }
 0x25d   :  { %v5178_v12 = vld [vmem:[#allocation5 + $0x4b8] sm:$0xf]  ;;  %v6203_v57 = vor.u32 %v7007_v59, %v6202_v34  ;;  %v5500_v2 = vld [vmem:[#allocation5 + $0x778] sm:$0xf0] }
 0x25e   :  { %v6751_v52 = vld [vmem:[#allocation5 + $0x4f4] sm:$0xf0]  ;;  %4402 = vmatpush.bf16.msra.mxu3 %v6267_v30  ;;  %4364 = vmatpush.bf16.msra.mxu0 %v4667_v6  ;;  %v6935_v4 = vld [vmem:[#allocation5 + $0xabc] sm:$0xf]  ;;  %v5503_v59 = vor.u32 %v6823_v28, %v5500_v2  ;;  %v4159_v54 = vpop.f32.mrf.mxu0 }
 0x25f   :  { %v4602_v40 = vld [vmem:[#allocation5 + $0x38] sm:$0xf]  ;;  %v5179_v10 = vor.u32 %v6751_v52, %v5178_v12  ;;  %v5948_v30 = vld [vmem:[#allocation5 + $0xaf8] sm:$0xf0] }
 0x260   :  { %v6607_v61 = vld [vmem:[#allocation5 + $0x74] sm:$0xf0]  ;;  %4376 = vmatpush.bf16.msra.mxu1 %v5243_v14  ;;  %4390 = vmatpush.bf16.msra.mxu2 %v5691_v41  ;;  %v7063_v35 = vld [vmem:[#allocation5 + $0xebc] sm:$0xf]  ;;  %v5951_v60 = vor.u32 %v6935_v4, %v5948_v30 }
 0x261   :  { %v5626_v62 = vld [vmem:[#allocation5 + $0x838] sm:$0xf]  ;;  %v4603_v19 = vor.u32 %v6607_v61, %v4602_v40  ;;  %v6663_v6 = vld [vmem:[#allocation5 + $0x23c] sm:$0xf]  ;;  %v6463_v12 = vor.u32 %v7063_v35, %v6460_v5 }
 0x262   :  { %v6863_v48 = vld [vmem:[#allocation5 + $0x874] sm:$0xf0]  ;;  %4403 = vmatpush.bf16.msra.mxu3 %v6203_v57  ;;  %v4860_v34 = vld [vmem:[#allocation5 + $0x278] sm:$0xf0] }
 0x263   :  { %v6138_v0 = vld [vmem:[#allocation5 + $0xc38] sm:$0xf]  ;;  %v5627_v16 = vor.u32 %v6863_v48, %v5626_v62  ;;  %4365 = vmatpush.bf16.msra.mxu0 %v4603_v19  ;;  %v6919_v52 = vld [vmem:[#allocation5 + $0xa3c] sm:$0xf]  ;;  %v4863_v61 = vor.u32 %v6663_v6, %v4860_v34  ;;  %v941_v48 = vperm.slane %v7540_v25, 2 }
 0x264   :  { %v6991_v18 = vld [vmem:[#allocation5 + $0xc74] sm:$0xf0]  ;;  %4377 = vmatpush.bf16.msra.mxu1 %v5179_v10  ;;  %v5884_v40 = vld [vmem:[#allocation5 + $0xa78] sm:$0xf0] }
 0x265   :  { %v5114_v26 = vld [vmem:[#allocation5 + $0x438] sm:$0xf]  ;;  %v6139_v55 = vor.u32 %v6991_v18, %v6138_v0  ;;  %4391 = vmatpush.bf16.msra.mxu2 %v5627_v16  ;;  %v7047_v14 = vld [vmem:[#allocation5 + $0xe3c] sm:$0xf]  ;;  %v5887_v57 = vor.u32 %v6919_v52, %v5884_v40  ;;  %v4160_v32 = vadd.f32 %v4159_v54, %v941_v48 }
 0x266   :  { %v6735_v31 = vld [vmem:[#allocation5 + $0x474] sm:$0xf0]  ;;  %4366 = vmatmul.bf16.vlgmr.msra.gmra.mxu0 %v7450_v23  ;;  %v6396_v41 = vld [vmem:[#allocation5 + $0xe78] sm:$0xf0]  ;;  %v4172_v39 = vpop.f32.mrf.mxu1 }
 0x267   :  { %4410 = vmatpush.bf16.msrb.mxu0 %v5055_v50  ;;  %v5115_v49 = vor.u32 %v6735_v31, %v5114_v26  ;;  %4404 = vmatpush.bf16.msra.mxu3 %v6139_v55  ;;  %v6647_v62 = vld [vmem:[#allocation5 + $0x1bc] sm:$0xf]  ;;  %v6399_v18 = vor.u32 %v7047_v14, %v6396_v41  ;;  %v4173_v46 = vadd.f32 %v4172_v39, %v4160_v32  ;;  %v4185_v28 = vpop.f32.mrf.mxu2 }
 0x268   :  { %4392 = vmatmul.bf16.vlgmr.msra.gmra.mxu2 %v7430_v13  ;;  %v4796_v15 = vld [vmem:[#allocation5 + $0x1f8] sm:$0xf0] }
 0x269   :  { %4436 = vmatpush.bf16.msrb.mxu2 %v6079_v37  ;;  %4378 = vmatpush.bf16.msra.mxu1 %v5115_v49  ;;  %v5372_v0 = vld [vmem:[#allocation5 + $0x678] sm:$0xf0]  ;;  %v4799_v1 = vor.u32 %v6647_v62, %v4796_v15  ;;  %v4186_v4 = vadd.f32 %v4185_v28, %v4173_v46  ;;  %v944_v46 = vperm.slane %v7540_v25, 5 }
 0x26a   :  { %4405 = vmatmul.bf16.vlgmr.msra.gmra.mxu3 %v7440_v29  ;;  %v6903_v19 = vld [vmem:[#allocation5 + $0x9bc] sm:$0xf]  ;;  %v5375_v10 = vor.u32 %v6791_v42, %v5372_v0 }
 0x26b   :  { %4449 = vmatpush.bf16.msrb.mxu3 %v6591_v21  ;;  %4411 = vmatpush.bf16.msrb.mxu0 %v4991_v45  ;;  %v5820_v47 = vld [vmem:[#allocation5 + $0x9f8] sm:$0xf0]  ;;  %v4198_v30 = vpop.f32.mrf.mxu3 }
 0x26c   :  { %4379 = vmatmul.bf16.vlgmr.msra.gmra.mxu1 %v7463_v33  ;;  %v7031_v24 = vld [vmem:[#allocation5 + $0xdbc] sm:$0xf]  ;;  %v5823_v20 = vor.u32 %v6903_v19, %v5820_v47  ;;  %v4199_v7 = vadd.f32 %v4198_v30, %v4186_v4  ;;  %v942_v47 = vperm.slane %v7540_v25, 3 }
 0x26d   :  { %4423 = vmatpush.bf16.msrb.mxu1 %v5567_v53  ;;  %4437 = vmatpush.bf16.msrb.mxu2 %v6015_v56  ;;  %v6332_v50 = vld [vmem:[#allocation5 + $0xdf8] sm:$0xf0] }
 0x26e   :  { %v4732_v8 = vld [vmem:[#allocation5 + $0x178] sm:$0xf0]  ;;  %v6335_v31 = vor.u32 %v7031_v24, %v6332_v50  ;;  %4472 = vst [vmem:[#allocation8 + $0x50] sm:$0xff] %v4199_v7  ;;  %v4488_v41 = vmax.f32 %v4199_v7, 0.0  ;;  %v4174_v62 = vpop.f32.mrf.mxu1 }
 0x26f   :  { %4450 = vmatpush.bf16.msrb.mxu3 %v6527_v3  ;;  %4412 = vmatpush.bf16.msrb.mxu0 %v4927_v58  ;;  %v6775_v16 = vld [vmem:[#allocation5 + $0x5bc] sm:$0xf]  ;;  %v4735_v37 = vor.u32 %v6631_v9, %v4732_v8  ;;  %v4161_v58 = vpop.f32.mrf.mxu0  ;;  %v4187_v0 = vpop.f32.mrf.mxu2 }
 0x270   :  { %v5308_v26 = vld [vmem:[#allocation5 + $0x5f8] sm:$0xf0]  ;;  %4504 = vst [vmem:[#allocation9 + $0x50] sm:$0xff] %v4488_v41 }
 0x271   :  { %4424 = vmatpush.bf16.msrb.mxu1 %v5503_v59  ;;  %4438 = vmatpush.bf16.msrb.mxu2 %v5951_v60  ;;  %v6887_v55 = vld [vmem:[#allocation5 + $0x93c] sm:$0xf]  ;;  %v5311_v44 = vor.u32 %v6775_v16, %v5308_v26 }
 0x272   :  { %v5756_v36 = vld [vmem:[#allocation5 + $0x978] sm:$0xf0] }
 0x273   :  { %4451 = vmatpush.bf16.msrb.mxu3 %v6463_v12  ;;  %4413 = vmatpush.bf16.msrb.mxu0 %v4863_v61  ;;  %v7015_v38 = vld [vmem:[#allocation5 + $0xd3c] sm:$0xf]  ;;  %v5759_v63 = vor.u32 %v6887_v55, %v5756_v36 }
 0x274   :  { %v6268_v43 = vld [vmem:[#allocation5 + $0xd78] sm:$0xf0] }
 0x275   :  { %4425 = vmatpush.bf16.msrb.mxu1 %v5439_v17  ;;  %4439 = vmatpush.bf16.msrb.mxu2 %v5887_v57  ;;  %v6615_v21 = vld [vmem:[#allocation5 + $0xbc] sm:$0xf]  ;;  %v6271_v51 = vor.u32 %v7015_v38, %v6268_v43 }
 0x276   :  { %v4668_v22 = vld [vmem:[#allocation5 + $0xf8] sm:$0xf0] }
 0x277   :  { %4452 = vmatpush.bf16.msrb.mxu3 %v6399_v18  ;;  %4414 = vmatpush.bf16.msrb.mxu0 %v4799_v1  ;;  %v6759_v45 = vld [vmem:[#allocation5 + $0x53c] sm:$0xf]  ;;  %v4671_v56 = vor.u32 %v6615_v21, %v4668_v22  ;;  %v4200_v18 = vpop.f32.mrf.mxu3 }
 0x278   :  { %v5244_v49 = vld [vmem:[#allocation5 + $0x578] sm:$0xf0] }
 0x279   :  { %4426 = vmatpush.bf16.msrb.mxu1 %v5375_v10  ;;  %4440 = vmatpush.bf16.msrb.mxu2 %v5823_v20  ;;  %v6871_v27 = vld [vmem:[#allocation5 + $0x8bc] sm:$0xf]  ;;  %v5247_v6 = vor.u32 %v6759_v45, %v5244_v49 }
 0x27a   :  { %v5692_v53 = vld [vmem:[#allocation5 + $0x8f8] sm:$0xf0] }
 0x27b   :  { %4453 = vmatpush.bf16.msrb.mxu3 %v6335_v31  ;;  %4415 = vmatpush.bf16.msrb.mxu0 %v4735_v37  ;;  %v6999_v2 = vld [vmem:[#allocation5 + $0xcbc] sm:$0xf]  ;;  %v5695_v59 = vor.u32 %v6871_v27, %v5692_v53 }
 0x27c   :  { %v6204_v3 = vld [vmem:[#allocation5 + $0xcf8] sm:$0xf0] }
 0x27d   :  { %v6599_v35 = vld [vmem:[#allocation5 + $0x3c] sm:$0xf]  ;;  %4427 = vmatpush.bf16.msrb.mxu1 %v5311_v44  ;;  %4441 = vmatpush.bf16.msrb.mxu2 %v5759_v63  ;;  %v6207_v11 = vor.u32 %v6999_v2, %v6204_v3 }
 0x27e   :  { %v4604_v5 = vld [vmem:[#allocation5 + $0x78] sm:$0xf0] }
 0x27f   :  { %v6743_v34 = vld [vmem:[#allocation5 + $0x4bc] sm:$0xf]  ;;  %4454 = vmatpush.bf16.msrb.mxu3 %v6271_v51  ;;  %4416 = vmatpush.bf16.msrb.mxu0 %v4671_v56  ;;  %v4607_v40 = vor.u32 %v6599_v35, %v4604_v5 }
 0x280   :  { %v5180_v60 = vld [vmem:[#allocation5 + $0x4f8] sm:$0xf0] }
 0x281   :  { %v6855_v12 = vld [vmem:[#allocation5 + $0x83c] sm:$0xf]  ;;  %4428 = vmatpush.bf16.msrb.mxu1 %v5247_v6  ;;  %v5183_v15 = vor.u32 %v6743_v34, %v5180_v60  ;;  %4442 = vmatpush.bf16.msrb.mxu2 %v5695_v59  ;;  %v4211_v1 = vpop.f32.mrf.mxu0  ;;  %v945_v6 = vperm.slane %v7540_v25, 6 }
 0x282   :  { %v5628_v52 = vld [vmem:[#allocation5 + $0x878] sm:$0xf0]  ;;  %v4212_v24 = vadd.f32 %v4211_v1, %v942_v47 }
 0x283   :  { %v6983_v61 = vld [vmem:[#allocation5 + $0xc3c] sm:$0xf]  ;;  %v5631_v17 = vor.u32 %v6855_v12, %v5628_v52  ;;  %4455 = vmatpush.bf16.msrb.mxu3 %v6207_v11  ;;  %4417 = vmatpush.bf16.msrb.mxu0 %v4607_v40 }
 0x284   :  { %v6140_v14 = vld [vmem:[#allocation5 + $0xc78] sm:$0xf0] }
 0x285   :  { %v6727_v42 = vld [vmem:[#allocation5 + $0x43c] sm:$0xf]  ;;  %v6143_v48 = vor.u32 %v6983_v61, %v6140_v14  ;;  %4429 = vmatpush.bf16.msrb.mxu1 %v5183_v15  ;;  %4443 = vmatpush.bf16.msrb.mxu2 %v5631_v17  ;;  %v946_v17 = vperm.slane %v7540_v25, 7 }
 0x286   :  { %v5116_v57 = vld [vmem:[#allocation5 + $0x478] sm:$0xf0]  ;;  %4418 = vmatmul.bf16.vlgmr.msrb.gmra.mxu0 %v7450_v23 }
 0x287   :  { %v5119_v19 = vor.u32 %v6727_v42, %v5116_v57  ;;  %4456 = vmatpush.bf16.msrb.mxu3 %v6143_v48  ;;  %v4224_v50 = vpop.f32.mrf.mxu1 }
 0x288   :  { %4444 = vmatmul.bf16.vlgmr.msrb.gmra.mxu2 %v7430_v13  ;;  %v4225_v54 = vadd.f32 %v4224_v50, %v4212_v24 }
 0x289   :  { %4430 = vmatpush.bf16.msrb.mxu1 %v5119_v19  ;;  %v4237_v9 = vpop.f32.mrf.mxu2  ;;  %v4213_v16 = vpop.f32.mrf.mxu0 }
 0x28a   :  { %4457 = vmatmul.bf16.vlgmr.msrb.gmra.mxu3 %v7440_v29  ;;  %v4238_v8 = vadd.f32 %v4237_v9, %v4225_v54  ;;  %v943_v29 = vperm.slane %v7540_v25, 4 }
 0x28b   :  { %v4250_v10 = vpop.f32.mrf.mxu3 }
 0x28c   :  { %4431 = vmatmul.bf16.vlgmr.msrb.gmra.mxu1 %v7463_v33  ;;  %v4251_v20 = vadd.f32 %v4250_v10, %v4238_v8 }
 0x28e   :  { %4473 = vst [vmem:[#allocation8 + $0x58] sm:$0xff] %v4251_v20  ;;  %v4489_v23 = vmax.f32 %v4251_v20, 0.0 }
 0x28f   :  { %v4226_v32 = vpop.f32.mrf.mxu1 }
 0x290   :  { %4505 = vst [vmem:[#allocation9 + $0x58] sm:$0xff] %v4489_v23 }
 0x291   :  { %v4239_v13 = vpop.f32.mrf.mxu2 }
 0x293   :  { %v4252_v26 = vpop.f32.mrf.mxu3 }
 0x2a1   :  { %v4263_v33 = vpop.f32.mrf.mxu0 }
 0x2a2   :  { %v4264_v31 = vadd.f32 %v4263_v33, %v943_v29 }
 0x2a7   :  { %v4276_v55 = vpop.f32.mrf.mxu1 }
 0x2a8   :  { %v4277_v36 = vadd.f32 %v4276_v55, %v4264_v31 }
 0x2a9   :  { %v4289_v37 = vpop.f32.mrf.mxu2  ;;  %v4265_v21 = vpop.f32.mrf.mxu0 }
 0x2aa   :  { %v4290_v38 = vadd.f32 %v4289_v37, %v4277_v36 }
 0x2ab   :  { %v4302_v43 = vpop.f32.mrf.mxu3 }
 0x2ac   :  { %v4303_v22 = vadd.f32 %v4302_v43, %v4290_v38 }
 0x2ae   :  { %4474 = vst [vmem:[#allocation8 + $0x60] sm:$0xff] %v4303_v22  ;;  %v4490_v39 = vmax.f32 %v4303_v22, 0.0 }
 0x2af   :  { %v4278_v44 = vpop.f32.mrf.mxu1 }
 0x2b0   :  { %4506 = vst [vmem:[#allocation9 + $0x60] sm:$0xff] %v4490_v39 }
 0x2b1   :  { %v4291_v45 = vpop.f32.mrf.mxu2 }
 0x2b3   :  { %v4304_v63 = vpop.f32.mrf.mxu3 }
 0x2c2   :  { %v4315_v49 = vpop.f32.mrf.mxu0 }
 0x2c3   :  { %v4316_v51 = vadd.f32 %v4315_v49, %v944_v46 }
 0x2c8   :  { %v4328_v27 = vpop.f32.mrf.mxu1 }
 0x2c9   :  { %v4329_v53 = vadd.f32 %v4328_v27, %v4316_v51 }
 0x2ca   :  { %v4341_v28 = vpop.f32.mrf.mxu2  ;;  %v4317_v3 = vpop.f32.mrf.mxu0 }
 0x2cb   :  { %v4342_v56 = vadd.f32 %v4341_v28, %v4329_v53 }
 0x2cc   :  { %v4354_v2 = vpop.f32.mrf.mxu3 }
 0x2cd   :  { %v4355_v4 = vadd.f32 %v4354_v2, %v4342_v56 }
 0x2cf   :  { %4475 = vst [vmem:[#allocation8 + $0x68] sm:$0xff] %v4355_v4  ;;  %v4491_v30 = vmax.f32 %v4355_v4, 0.0 }
 0x2d0   :  { %v4330_v58 = vpop.f32.mrf.mxu1 }
 0x2d1   :  { %4507 = vst [vmem:[#allocation9 + $0x68] sm:$0xff] %v4491_v30 }
 0x2d2   :  { %v4343_v35 = vpop.f32.mrf.mxu2 }
 0x2d4   :  { %v4356_v5 = vpop.f32.mrf.mxu3 }
 0x2e3   :  { %v4367_v34 = vpop.f32.mrf.mxu0 }
 0x2e4   :  { %v4368_v59 = vadd.f32 %v4367_v34, %v945_v6 }
 0x2e9   :  { %v4380_v7 = vpop.f32.mrf.mxu1 }
 0x2ea   :  { %v4381_v60 = vadd.f32 %v4380_v7, %v4368_v59 }
 0x2eb   :  { %v4393_v11 = vpop.f32.mrf.mxu2  ;;  %v4369_v40 = vpop.f32.mrf.mxu0 }
 0x2ec   :  { %v4394_v12 = vadd.f32 %v4393_v11, %v4381_v60 }
 0x2ed   :  { %v4406_v52 = vpop.f32.mrf.mxu3 }
 0x2ee   :  { %v4407_v61 = vadd.f32 %v4406_v52, %v4394_v12 }
 0x2f0   :  { %4476 = vst [vmem:[#allocation8 + $0x70] sm:$0xff] %v4407_v61  ;;  %v4492_v14 = vmax.f32 %v4407_v61, 0.0 }
 0x2f1   :  { %v4382_v41 = vpop.f32.mrf.mxu1 }
 0x2f2   :  { %4508 = vst [vmem:[#allocation9 + $0x70] sm:$0xff] %v4492_v14 }
 0x2f3   :  { %v4395_v62 = vpop.f32.mrf.mxu2 }
 0x2f5   :  { %v4408_v15 = vpop.f32.mrf.mxu3 }
 0x303   :  { %v4419_v42 = vpop.f32.mrf.mxu0 }
 0x304   :  { %v4420_v57 = vadd.f32 %v4419_v42, %v946_v17 }
 0x309   :  { %v4432_v48 = vpop.f32.mrf.mxu1 }
 0x30a   :  { %v4433_v0 = vadd.f32 %v4432_v48, %v4420_v57 }
 0x30b   :  { %v4445_v18 = vpop.f32.mrf.mxu2  ;;  %v4421_v19 = vpop.f32.mrf.mxu0 }
 0x30c   :  { %v4446_v47 = vadd.f32 %v4445_v18, %v4433_v0 }
 0x30d   :  { %v4458_v1 = vpop.f32.mrf.mxu3 }
 0x30e   :  { %v4459_v25 = vadd.f32 %v4458_v1, %v4446_v47 }
 0x310   :  { %4477 = vst [vmem:[#allocation8 + $0x78] sm:$0xff] %v4459_v25  ;;  %v4493_v24 = vmax.f32 %v4459_v25, 0.0 }
 0x311   :  { %v4434_v50 = vpop.f32.mrf.mxu1  ;;  %4520 = dma.vmem_to_hbm [thread:$0]  %s4516_s2, 2048, %s4518_s9, [#allocation4]  }
 0x312   :  { %4509 = vst [vmem:[#allocation9 + $0x78] sm:$0xff] %v4493_v24 }
 0x313   :  { %v4447_v54 = vpop.f32.mrf.mxu2  ;;  %4531 = dma.vmem_to_hbm [thread:$0]  %s4527_s11, 2048, %s4529_s14, [#allocation10]  }
 0x315   :  { %v4460_v9 = vpop.f32.mrf.mxu3 }
 0x316   :  { %7238 = dma.done.wait [#allocation4], 2048  }
 0x317   :  { %7239 = vsyncadd [#allocation4], 4294965248 }
 0x318   :  { %7240 = dma.done.wait [#allocation10], 2048  }
 0x319   :  { %7241 = vsyncadd [#allocation10], 4294965248 }
 0x31a   :  { %4540 = vsyncpa [#allocation3], 1 }
 0x31b   :  { %4541 = vsyncpa [#allocation6], 1 }
 0x31c   :  { %4542 = vsyncpa [#allocation4], 1 }
 0x31d   :  { %4543 = vsyncpa [#allocation10], 1 }

</bundles_post_ra>
